<compile_context>
chip_gen: v5e
topology: v5e:2x2
jax: 0.10.0
libtpu: 0.0.40
codegen_flags: <defaults>
</compile_context>

<pallas_src>
import functools

import jax
import jax.numpy as jnp
from jax.experimental import pallas as pl
from jax.experimental.pallas import tpu as pltpu

POOL = 4                   # adaptive pool target (4, 4)
S = POOL * POOL            # 16 spatial positions after pooling
C_MID = 128                # conv output channels
HID = 1024                 # fc1 width
FLAT = C_MID * S           # 2048 = fc1 input width
PAD_CLASSES = 128          # fc2 output padded to a full lane slab


# ----------------------------- Fused Pallas kernel ---------------------------

def _aux_kernel(x_ref, wc_ref, shift_ref, w1_ref, b1_ref, w2_ref, b2_ref,
                o_ref, z_ref, *, n_batch):
    # Grid: (p, j).  p = reduction split (sharded across TCs on v7x via
    # "parallel"), j = fc1 column tiles within that split (accumulated).
    p = pl.program_id(0)
    j = pl.program_id(1)

    @pl.when(j == 0)
    def _():
        # 1x1 conv (BN scale folded into the weight) + shift + ReLU, written
        # into the flat (N, 2048) layout matching torch.flatten on NCHW after
        # the w1 permutation.  Recomputed per split p so each core's scratch
        # is valid under the parallel axis; it is a trivial (32x4)@(4x128) dot.
        z = jnp.dot(x_ref[...], wc_ref[...], preferred_element_type=jnp.float32)
        z = jnp.maximum(z + shift_ref[...], 0.0)
        for s in range(S):
            z_ref[:, s * C_MID:(s + 1) * C_MID] = (
                z[s * n_batch:(s + 1) * n_batch, :].astype(z_ref.dtype))
        # Partial logits start from b2 on split 0 only (zeros on other splits);
        # the wrapper sums the partials, so b2 is added exactly once.
        o_ref[...] = jnp.broadcast_to(
            b2_ref[...] * (p == 0).astype(jnp.float32), o_ref.shape)

    # fc1 column tile: one K=2048 MXU dot (full contraction depth), bias, ReLU.
    h = jnp.dot(z_ref[...], w1_ref[...], preferred_element_type=jnp.float32)
    h = jnp.maximum(h + b1_ref[...], 0.0)
    # TODO(synk): F.dropout(p=0.7) is identity in eval mode (deterministic fwd).

    # fc2 partial product (f32 weights), accumulated into the resident block.
    o_ref[...] += jnp.dot(h, w2_ref[...], preferred_element_type=jnp.float32)


# ----------------------------- Wrapper ---------------------------------------

def inception_aux_forward(x, params, *, num_classes, tn=512, n_split=2):
    """x: (N, C_in, H, W) float32, NCHW (PyTorch convention)."""
    N, C_in, H, W = x.shape
    assert HID % (n_split * tn) == 0
    inner = HID // (n_split * tn)

    # adaptive_avg_pool2d(x, (4, 4))
    # TODO(synk): assumes H, W divisible by 4 (exact match to PyTorch there).
    pooled = x.reshape(N, C_in, POOL, H // POOL, POOL, W // POOL).mean(axis=(3, 5))
    # pixels-x-channels, spatial-major rows: row = s*N + n  (s = h*4 + w)
    x_pix = pooled.reshape(N, C_in, S).transpose(2, 0, 1).reshape(S * N, C_in)

    partials = pl.pallas_call(
        functools.partial(_aux_kernel, n_batch=N),
        out_shape=jax.ShapeDtypeStruct((n_split, N, PAD_CLASSES), jnp.float32),
        grid=(n_split, inner),
        in_specs=[
            pl.BlockSpec((S * N, C_in), lambda p, j: (0, 0)),            # x_pix
            pl.BlockSpec((C_in, C_MID), lambda p, j: (0, 0)),            # conv w (BN-folded)
            pl.BlockSpec((1, C_MID), lambda p, j: (0, 0)),               # BN shift
            pl.BlockSpec((FLAT, tn), lambda p, j: (0, p * inner + j)),   # w1f tile (bf16)
            pl.BlockSpec((1, tn), lambda p, j: (0, p * inner + j)),      # b1 tile
            pl.BlockSpec((tn, PAD_CLASSES), lambda p, j: (p * inner + j, 0)),  # w2 tile (f32)
            pl.BlockSpec((1, PAD_CLASSES), lambda p, j: (0, 0)),         # b2 (padded)
        ],
        out_specs=pl.BlockSpec((None, N, PAD_CLASSES), lambda p, j: (p, 0, 0)),
        scratch_shapes=[pltpu.VMEM((N, FLAT), jnp.bfloat16)],            # flat conv output
        compiler_params=pltpu.CompilerParams(
            dimension_semantics=("parallel", "arbitrary")),
    )(x_pix, params["w_conv"], params["bn_shift"],
      params["w1f"], params["b1"], params["w2t_pad"], params["b2_pad"])

    out = partials.sum(axis=0)          # (N, 128): combine the reduction splits
    return out[:, :num_classes]


# ----------------------------- Parameter init --------------------------------

def init_params(key, in_channels, num_classes):
    ks = jax.random.split(key, 8)
    conv_w = jax.random.normal(ks[0], (C_MID, in_channels), jnp.float32) * 0.05
    # BatchNorm2d(128, eps=1e-3): eval mode, folded into scale/shift.
    gamma = 1.0 + 0.1 * jax.random.normal(ks[1], (C_MID,), jnp.float32)
    beta = 0.1 * jax.random.normal(ks[2], (C_MID,), jnp.float32)
    run_mean = 0.05 * jax.random.normal(ks[3], (C_MID,), jnp.float32)
    run_var = jnp.abs(1.0 + 0.1 * jax.random.normal(ks[4], (C_MID,), jnp.float32))
    scale = gamma / jnp.sqrt(run_var + 1e-3)
    shift = beta - run_mean * scale

    w1 = jax.random.normal(ks[5], (HID, FLAT), jnp.float32) * 0.02   # torch (out,in)
    b1 = 0.01 * jax.random.normal(ks[6], (HID,), jnp.float32)
    w2 = jax.random.normal(ks[7], (num_classes, HID), jnp.float32) * 0.02
    b2 = 0.01 * jax.random.normal(ks[7], (num_classes,), jnp.float32)

    # Fold the BN scale into the conv weight: (C_in, 128).
    wc_folded = conv_w.T * scale[None, :]
    # Bake the torch.flatten(NCHW) permutation into a flat 2-D fc1 weight:
    # w1f[s*128 + c, j] = w1[j, c*16 + s]  -> matches the kernel's z layout.
    w1f = w1.T.reshape(C_MID, S, HID).transpose(1, 0, 2).reshape(FLAT, HID)
    # Pad fc2 to a 128-wide lane slab (zeros in the padding columns); keep f32.
    w2t_pad = jnp.zeros((HID, PAD_CLASSES), jnp.float32).at[:, :num_classes].set(w2.T)
    b2_pad = jnp.zeros((1, PAD_CLASSES), jnp.float32).at[0, :num_classes].set(b2)

    kernel_params = {
        "w_conv": wc_folded,                    # (C_in, 128) f32, BN scale folded
        "bn_shift": shift.reshape(1, C_MID),
        "w1f": w1f.astype(jnp.bfloat16),        # bf16: halves dominant HBM load
        "b1": b1.reshape(1, HID),
        "w2t_pad": w2t_pad,                     # f32 (tiny; better logit accuracy)
        "b2_pad": b2_pad,
    }
    ref_params = {"conv_w": conv_w, "scale": scale, "shift": shift,
                  "w1": w1, "b1": b1, "w2": w2, "b2": b2}
    return kernel_params, ref_params


# ----------------------------- Pure-JAX reference ----------------------------

def reference_forward(x, p, num_classes):
    N, C_in, H, W = x.shape
    pooled = x.reshape(N, C_in, POOL, H // POOL, POOL, W // POOL).mean(axis=(3, 5))
    z = jnp.einsum("nchw,kc->nkhw", pooled, p["conv_w"])
    z = z * p["scale"][None, :, None, None] + p["shift"][None, :, None, None]
    z = jnp.maximum(z, 0.0)
    flat = z.reshape(N, -1)                       # torch.flatten(x, 1) on NCHW
    h = jnp.maximum(flat @ p["w1"].T + p["b1"], 0.0)
    return h @ p["w2"].T + p["b2"]


# ----------------------------- Main -------------------------------------------

if __name__ == "__main__":
    key = jax.random.PRNGKey(0)
    k_x, k_p = jax.random.split(key)

    N, C_in, H, W = 2, 4, 16, 16
    num_classes = 10

    x = jax.random.normal(k_x, (N, C_in, H, W), jnp.float32)
    kernel_params, ref_params = init_params(k_p, C_in, num_classes)

    fwd = jax.jit(functools.partial(inception_aux_forward, num_classes=num_classes))
    out = fwd(x, kernel_params)
    jax.block_until_ready(out)
    assert out.shape == (N, num_classes), out.shape

    ref = reference_forward(x, ref_params, num_classes)
    max_err = float(jnp.max(jnp.abs(out - ref)))
    assert jnp.allclose(out, ref, rtol=5e-2, atol=1e-2), max_err

    print("KERNEL_OK")
</pallas_src>

<mosaic_0001>
module attributes {stable_mosaic.version = 11 : i64} {
  func.func @_aux_kernel(%arg0: i32, %arg1: i32, %arg2: memref<32x4xf32, #tpu.memory_space<vmem>>, %arg3: memref<4x128xf32, #tpu.memory_space<vmem>>, %arg4: memref<1x128xf32, #tpu.memory_space<vmem>>, %arg5: memref<2048x512xbf16, #tpu.memory_space<vmem>>, %arg6: memref<1x512xf32, #tpu.memory_space<vmem>>, %arg7: memref<512x128xf32, #tpu.memory_space<vmem>>, %arg8: memref<1x128xf32, #tpu.memory_space<vmem>>, %arg9: memref<1x2x128xf32, #tpu.memory_space<vmem>>, %arg10: memref<2x2048xbf16, #tpu.memory_space<vmem>>) attributes {dimension_semantics = [#tpu.dimension_semantics<parallel>, #tpu.dimension_semantics<arbitrary>], iteration_bounds = array<i64: 2, 1>, scalar_prefetch = 0 : i64, scratch_operands = 1 : i64, tpu.core_type = #tpu.core_type<tc>, window_params = [{pipeline_mode = #tpu.pipeline_mode<synchronous>, transform_indices = @transform_0, window_bounds = array<i64: 32, 4>}, {pipeline_mode = #tpu.pipeline_mode<synchronous>, transform_indices = @transform_1, window_bounds = array<i64: 4, 128>}, {pipeline_mode = #tpu.pipeline_mode<synchronous>, transform_indices = @transform_2, window_bounds = array<i64: 1, 128>}, {transform_indices = @transform_3, window_bounds = array<i64: 2048, 512>}, {transform_indices = @transform_4, window_bounds = array<i64: 1, 512>}, {transform_indices = @transform_5, window_bounds = array<i64: 512, 128>}, {pipeline_mode = #tpu.pipeline_mode<synchronous>, transform_indices = @transform_6, window_bounds = array<i64: 1, 128>}, {transform_indices = @transform_7, window_bounds = array<i64: 1, 2, 128>}]} {
    %c0_i32 = arith.constant 0 : i32
    %0 = arith.cmpi eq, %arg1, %c0_i32 : i32
    %1 = arith.extui %0 : i1 to i32
    %c0_i32_0 = arith.constant 0 : i32
    %2 = arith.cmpi ne, %1, %c0_i32_0 : i32
    scf.if %2 {
      %c0_16 = arith.constant 0 : index
      %c0_17 = arith.constant 0 : index
      %19 = vector.load %arg2[%c0_16, %c0_17] : memref<32x4xf32, #tpu.memory_space<vmem>>, vector<32x4xf32>
      %c0_18 = arith.constant 0 : index
      %c0_19 = arith.constant 0 : index
      %20 = vector.load %arg3[%c0_18, %c0_19] : memref<4x128xf32, #tpu.memory_space<vmem>>, vector<4x128xf32>
      %cst_20 = arith.constant dense<0.000000e+00> : vector<32x128xf32>
      %21 = tpu.matmul %19, %20, %cst_20 {dimension_numbers = #tpu.dot_dimension_numbers<[1], [0], [0], [1], [0, 0, 1, 1], [], []>} : vector<32x4xf32>, vector<4x128xf32>, vector<32x128xf32> -> vector<32x128xf32>
      %c0_21 = arith.constant 0 : index
      %c0_22 = arith.constant 0 : index
      %22 = vector.load %arg4[%c0_21, %c0_22] : memref<1x128xf32, #tpu.memory_space<vmem>>, vector<1x128xf32>
      %23 = vector.broadcast %22 : vector<1x128xf32> to vector<32x128xf32>
      %24 = arith.addf %21, %23 : vector<32x128xf32>
      %cst_23 = arith.constant 0.000000e+00 : f32
      %25 = vector.broadcast %cst_23 : f32 to vector<32x128xf32>
      %26 = arith.maximumf %24, %25 : vector<32x128xf32>
      %27 = vector.extract_strided_slice %26 {offsets = [0, 0], sizes = [2, 128], strides = [1, 1]} : vector<32x128xf32> to vector<2x128xf32>
      %28 = arith.truncf %27 : vector<2x128xf32> to vector<2x128xbf16>
      %c0_24 = arith.constant 0 : index
      %c0_25 = arith.constant 0 : index
      %29 = vector.load %arg10[%c0_24, %c0_25] : memref<2x2048xbf16, #tpu.memory_space<vmem>>, vector<2x128xbf16>
      tpu.vector_store %arg10[%c0_24, %c0_25], %28 {strides = array<i32>} : memref<2x2048xbf16, #tpu.memory_space<vmem>>, vector<2x128xbf16>,
      %30 = vector.extract_strided_slice %26 {offsets = [2, 0], sizes = [2, 128], strides = [1, 1]} : vector<32x128xf32> to vector<2x128xf32>
      %31 = arith.truncf %30 : vector<2x128xf32> to vector<2x128xbf16>
      %c0_26 = arith.constant 0 : index
      %c128 = arith.constant 128 : index
      %32 = vector.load %arg10[%c0_26, %c128] : memref<2x2048xbf16, #tpu.memory_space<vmem>>, vector<2x128xbf16>
      tpu.vector_store %arg10[%c0_26, %c128], %31 {strides = array<i32>} : memref<2x2048xbf16, #tpu.memory_space<vmem>>, vector<2x128xbf16>,
      %33 = vector.extract_strided_slice %26 {offsets = [4, 0], sizes = [2, 128], strides = [1, 1]} : vector<32x128xf32> to vector<2x128xf32>
      %34 = arith.truncf %33 : vector<2x128xf32> to vector<2x128xbf16>
      %c0_27 = arith.constant 0 : index
      %c256 = arith.constant 256 : index
      %35 = vector.load %arg10[%c0_27, %c256] : memref<2x2048xbf16, #tpu.memory_space<vmem>>, vector<2x128xbf16>
      tpu.vector_store %arg10[%c0_27, %c256], %34 {strides = array<i32>} : memref<2x2048xbf16, #tpu.memory_space<vmem>>, vector<2x128xbf16>,
      %36 = vector.extract_strided_slice %26 {offsets = [6, 0], sizes = [2, 128], strides = [1, 1]} : vector<32x128xf32> to vector<2x128xf32>
      %37 = arith.truncf %36 : vector<2x128xf32> to vector<2x128xbf16>
      %c0_28 = arith.constant 0 : index
      %c384 = arith.constant 384 : index
      %38 = vector.load %arg10[%c0_28, %c384] : memref<2x2048xbf16, #tpu.memory_space<vmem>>, vector<2x128xbf16>
      tpu.vector_store %arg10[%c0_28, %c384], %37 {strides = array<i32>} : memref<2x2048xbf16, #tpu.memory_space<vmem>>, vector<2x128xbf16>,
      %39 = vector.extract_strided_slice %26 {offsets = [8, 0], sizes = [2, 128], strides = [1, 1]} : vector<32x128xf32> to vector<2x128xf32>
      %40 = arith.truncf %39 : vector<2x128xf32> to vector<2x128xbf16>
      %c0_29 = arith.constant 0 : index
      %c512 = arith.constant 512 : index
      %41 = vector.load %arg10[%c0_29, %c512] : memref<2x2048xbf16, #tpu.memory_space<vmem>>, vector<2x128xbf16>
      tpu.vector_store %arg10[%c0_29, %c512], %40 {strides = array<i32>} : memref<2x2048xbf16, #tpu.memory_space<vmem>>, vector<2x128xbf16>,
      %42 = vector.extract_strided_slice %26 {offsets = [10, 0], sizes = [2, 128], strides = [1, 1]} : vector<32x128xf32> to vector<2x128xf32>
      %43 = arith.truncf %42 : vector<2x128xf32> to vector<2x128xbf16>
      %c0_30 = arith.constant 0 : index
      %c640 = arith.constant 640 : index
      %44 = vector.load %arg10[%c0_30, %c640] : memref<2x2048xbf16, #tpu.memory_space<vmem>>, vector<2x128xbf16>
      tpu.vector_store %arg10[%c0_30, %c640], %43 {strides = array<i32>} : memref<2x2048xbf16, #tpu.memory_space<vmem>>, vector<2x128xbf16>,
      %45 = vector.extract_strided_slice %26 {offsets = [12, 0], sizes = [2, 128], strides = [1, 1]} : vector<32x128xf32> to vector<2x128xf32>
      %46 = arith.truncf %45 : vector<2x128xf32> to vector<2x128xbf16>
      %c0_31 = arith.constant 0 : index
      %c768 = arith.constant 768 : index
      %47 = vector.load %arg10[%c0_31, %c768] : memref<2x2048xbf16, #tpu.memory_space<vmem>>, vector<2x128xbf16>
      tpu.vector_store %arg10[%c0_31, %c768], %46 {strides = array<i32>} : memref<2x2048xbf16, #tpu.memory_space<vmem>>, vector<2x128xbf16>,
      %48 = vector.extract_strided_slice %26 {offsets = [14, 0], sizes = [2, 128], strides = [1, 1]} : vector<32x128xf32> to vector<2x128xf32>
      %49 = arith.truncf %48 : vector<2x128xf32> to vector<2x128xbf16>
      %c0_32 = arith.constant 0 : index
      %c896 = arith.constant 896 : index
      %50 = vector.load %arg10[%c0_32, %c896] : memref<2x2048xbf16, #tpu.memory_space<vmem>>, vector<2x128xbf16>
      tpu.vector_store %arg10[%c0_32, %c896], %49 {strides = array<i32>} : memref<2x2048xbf16, #tpu.memory_space<vmem>>, vector<2x128xbf16>,
      %51 = vector.extract_strided_slice %26 {offsets = [16, 0], sizes = [2, 128], strides = [1, 1]} : vector<32x128xf32> to vector<2x128xf32>
      %52 = arith.truncf %51 : vector<2x128xf32> to vector<2x128xbf16>
      %c0_33 = arith.constant 0 : index
      %c1024 = arith.constant 1024 : index
      %53 = vector.load %arg10[%c0_33, %c1024] : memref<2x2048xbf16, #tpu.memory_space<vmem>>, vector<2x128xbf16>
      tpu.vector_store %arg10[%c0_33, %c1024], %52 {strides = array<i32>} : memref<2x2048xbf16, #tpu.memory_space<vmem>>, vector<2x128xbf16>,
      %54 = vector.extract_strided_slice %26 {offsets = [18, 0], sizes = [2, 128], strides = [1, 1]} : vector<32x128xf32> to vector<2x128xf32>
      %55 = arith.truncf %54 : vector<2x128xf32> to vector<2x128xbf16>
      %c0_34 = arith.constant 0 : index
      %c1152 = arith.constant 1152 : index
      %56 = vector.load %arg10[%c0_34, %c1152] : memref<2x2048xbf16, #tpu.memory_space<vmem>>, vector<2x128xbf16>
      tpu.vector_store %arg10[%c0_34, %c1152], %55 {strides = array<i32>} : memref<2x2048xbf16, #tpu.memory_space<vmem>>, vector<2x128xbf16>,
      %57 = vector.extract_strided_slice %26 {offsets = [20, 0], sizes = [2, 128], strides = [1, 1]} : vector<32x128xf32> to vector<2x128xf32>
      %58 = arith.truncf %57 : vector<2x128xf32> to vector<2x128xbf16>
      %c0_35 = arith.constant 0 : index
      %c1280 = arith.constant 1280 : index
      %59 = vector.load %arg10[%c0_35, %c1280] : memref<2x2048xbf16, #tpu.memory_space<vmem>>, vector<2x128xbf16>
      tpu.vector_store %arg10[%c0_35, %c1280], %58 {strides = array<i32>} : memref<2x2048xbf16, #tpu.memory_space<vmem>>, vector<2x128xbf16>,
      %60 = vector.extract_strided_slice %26 {offsets = [22, 0], sizes = [2, 128], strides = [1, 1]} : vector<32x128xf32> to vector<2x128xf32>
      %61 = arith.truncf %60 : vector<2x128xf32> to vector<2x128xbf16>
      %c0_36 = arith.constant 0 : index
      %c1408 = arith.constant 1408 : index
      %62 = vector.load %arg10[%c0_36, %c1408] : memref<2x2048xbf16, #tpu.memory_space<vmem>>, vector<2x128xbf16>
      tpu.vector_store %arg10[%c0_36, %c1408], %61 {strides = array<i32>} : memref<2x2048xbf16, #tpu.memory_space<vmem>>, vector<2x128xbf16>,
      %63 = vector.extract_strided_slice %26 {offsets = [24, 0], sizes = [2, 128], strides = [1, 1]} : vector<32x128xf32> to vector<2x128xf32>
      %64 = arith.truncf %63 : vector<2x128xf32> to vector<2x128xbf16>
      %c0_37 = arith.constant 0 : index
      %c1536 = arith.constant 1536 : index
      %65 = vector.load %arg10[%c0_37, %c1536] : memref<2x2048xbf16, #tpu.memory_space<vmem>>, vector<2x128xbf16>
      tpu.vector_store %arg10[%c0_37, %c1536], %64 {strides = array<i32>} : memref<2x2048xbf16, #tpu.memory_space<vmem>>, vector<2x128xbf16>,
      %66 = vector.extract_strided_slice %26 {offsets = [26, 0], sizes = [2, 128], strides = [1, 1]} : vector<32x128xf32> to vector<2x128xf32>
      %67 = arith.truncf %66 : vector<2x128xf32> to vector<2x128xbf16>
      %c0_38 = arith.constant 0 : index
      %c1664 = arith.constant 1664 : index
      %68 = vector.load %arg10[%c0_38, %c1664] : memref<2x2048xbf16, #tpu.memory_space<vmem>>, vector<2x128xbf16>
      tpu.vector_store %arg10[%c0_38, %c1664], %67 {strides = array<i32>} : memref<2x2048xbf16, #tpu.memory_space<vmem>>, vector<2x128xbf16>,
      %69 = vector.extract_strided_slice %26 {offsets = [28, 0], sizes = [2, 128], strides = [1, 1]} : vector<32x128xf32> to vector<2x128xf32>
      %70 = arith.truncf %69 : vector<2x128xf32> to vector<2x128xbf16>
      %c0_39 = arith.constant 0 : index
      %c1792 = arith.constant 1792 : index
      %71 = vector.load %arg10[%c0_39, %c1792] : memref<2x2048xbf16, #tpu.memory_space<vmem>>, vector<2x128xbf16>
      tpu.vector_store %arg10[%c0_39, %c1792], %70 {strides = array<i32>} : memref<2x2048xbf16, #tpu.memory_space<vmem>>, vector<2x128xbf16>,
      %72 = vector.extract_strided_slice %26 {offsets = [30, 0], sizes = [2, 128], strides = [1, 1]} : vector<32x128xf32> to vector<2x128xf32>
      %73 = arith.truncf %72 : vector<2x128xf32> to vector<2x128xbf16>
      %c0_40 = arith.constant 0 : index
      %c1920 = arith.constant 1920 : index
      %74 = vector.load %arg10[%c0_40, %c1920] : memref<2x2048xbf16, #tpu.memory_space<vmem>>, vector<2x128xbf16>
      tpu.vector_store %arg10[%c0_40, %c1920], %73 {strides = array<i32>} : memref<2x2048xbf16, #tpu.memory_space<vmem>>, vector<2x128xbf16>,
      %c0_41 = arith.constant 0 : index
      %c0_42 = arith.constant 0 : index
      %75 = vector.load %arg8[%c0_41, %c0_42] : memref<1x128xf32, #tpu.memory_space<vmem>>, vector<1x128xf32>
      %c0_i32_43 = arith.constant 0 : i32
      %76 = arith.cmpi eq, %arg0, %c0_i32_43 : i32
      %77 = arith.extui %76 : i1 to i32
      %78 = arith.sitofp %77 : i32 to f32
      %79 = vector.broadcast %78 : f32 to vector<1x128xf32>
      %80 = arith.mulf %75, %79 : vector<1x128xf32>
      %81 = vector.shape_cast %80 : vector<1x128xf32> to vector<1x128xf32>
      %82 = vector.broadcast %81 : vector<1x128xf32> to vector<2x128xf32>
      %c0_44 = arith.constant 0 : index
      %c0_45 = arith.constant 0 : index
      %c0_46 = arith.constant 0 : index
      %83 = vector.load %arg9[%c0_44, %c0_45, %c0_46] : memref<1x2x128xf32, #tpu.memory_space<vmem>>, vector<1x2x128xf32>
      %84 = vector.shape_cast %83 : vector<1x2x128xf32> to vector<2x128xf32>
      %85 = vector.shape_cast %82 : vector<2x128xf32> to vector<1x2x128xf32>
      tpu.vector_store %arg9[%c0_44, %c0_45, %c0_46], %85 {strides = array<i32>} : memref<1x2x128xf32, #tpu.memory_space<vmem>>, vector<1x2x128xf32>,
    } else {
    }
    %c0 = arith.constant 0 : index
    %c0_1 = arith.constant 0 : index
    %3 = vector.load %arg10[%c0, %c0_1] : memref<2x2048xbf16, #tpu.memory_space<vmem>>, vector<2x2048xbf16>
    %c0_2 = arith.constant 0 : index
    %c0_3 = arith.constant 0 : index
    %4 = vector.load %arg5[%c0_2, %c0_3] : memref<2048x512xbf16, #tpu.memory_space<vmem>>, vector<2048x512xbf16>
    %cst = arith.constant dense<0.000000e+00> : vector<2x512xf32>
    %5 = tpu.matmul %3, %4, %cst {dimension_numbers = #tpu.dot_dimension_numbers<[1], [0], [0], [1], [0, 0, 1, 1], [], []>} : vector<2x2048xbf16>, vector<2048x512xbf16>, vector<2x512xf32> -> vector<2x512xf32>
    %c0_4 = arith.constant 0 : index
    %c0_5 = arith.constant 0 : index
    %6 = vector.load %arg6[%c0_4, %c0_5] : memref<1x512xf32, #tpu.memory_space<vmem>>, vector<1x512xf32>
    %7 = vector.broadcast %6 : vector<1x512xf32> to vector<2x512xf32>
    %8 = arith.addf %5, %7 : vector<2x512xf32>
    %cst_6 = arith.constant 0.000000e+00 : f32
    %9 = vector.broadcast %cst_6 : f32 to vector<2x512xf32>
    %10 = arith.maximumf %8, %9 : vector<2x512xf32>
    %c0_7 = arith.constant 0 : index
    %c0_8 = arith.constant 0 : index
    %c0_9 = arith.constant 0 : index
    %11 = vector.load %arg9[%c0_7, %c0_8, %c0_9] : memref<1x2x128xf32, #tpu.memory_space<vmem>>, vector<1x2x128xf32>
    %12 = vector.shape_cast %11 : vector<1x2x128xf32> to vector<2x128xf32>
    %c0_10 = arith.constant 0 : index
    %c0_11 = arith.constant 0 : index
    %13 = vector.load %arg7[%c0_10, %c0_11] : memref<512x128xf32, #tpu.memory_space<vmem>>, vector<512x128xf32>
    %cst_12 = arith.constant dense<0.000000e+00> : vector<2x128xf32>
    %14 = tpu.matmul %10, %13, %cst_12 {dimension_numbers = #tpu.dot_dimension_numbers<[1], [0], [0], [1], [0, 0, 1, 1], [], []>} : vector<2x512xf32>, vector<512x128xf32>, vector<2x128xf32> -> vector<2x128xf32>
    %15 = arith.addf %12, %14 : vector<2x128xf32>
    %c0_13 = arith.constant 0 : index
    %c0_14 = arith.constant 0 : index
    %c0_15 = arith.constant 0 : index
    %16 = vector.load %arg9[%c0_13, %c0_14, %c0_15] : memref<1x2x128xf32, #tpu.memory_space<vmem>>, vector<1x2x128xf32>
    %17 = vector.shape_cast %16 : vector<1x2x128xf32> to vector<2x128xf32>
    %18 = vector.shape_cast %15 : vector<2x128xf32> to vector<1x2x128xf32>
    tpu.vector_store %arg9[%c0_13, %c0_14, %c0_15], %18 {strides = array<i32>} : memref<1x2x128xf32, #tpu.memory_space<vmem>>, vector<1x2x128xf32>,
    return
  }
  func.func @transform_0(%arg0: i32, %arg1: i32) -> (i32, i32) {
    %c0_i32 = arith.constant 0 : i32
    %c0_i32_0 = arith.constant 0 : i32
    %c0_i32_1 = arith.constant 0 : i32
    return %c0_i32, %c0_i32_0 : i32, i32
  }
  func.func @transform_1(%arg0: i32, %arg1: i32) -> (i32, i32) {
    %c0_i32 = arith.constant 0 : i32
    %c0_i32_0 = arith.constant 0 : i32
    %c0_i32_1 = arith.constant 0 : i32
    return %c0_i32, %c0_i32_0 : i32, i32
  }
  func.func @transform_2(%arg0: i32, %arg1: i32) -> (i32, i32) {
    %c0_i32 = arith.constant 0 : i32
    %c0_i32_0 = arith.constant 0 : i32
    %c0_i32_1 = arith.constant 0 : i32
    return %c0_i32, %c0_i32_0 : i32, i32
  }
  func.func @transform_3(%arg0: i32, %arg1: i32) -> (i32, i32) {
    %c1_i32 = arith.constant 1 : i32
    %0 = arith.muli %arg0, %c1_i32 : i32
    %1 = arith.addi %0, %arg1 : i32
    %c0_i32 = arith.constant 0 : i32
    %c0_i32_0 = arith.constant 0 : i32
    return %c0_i32, %1 : i32, i32
  }
  func.func @transform_4(%arg0: i32, %arg1: i32) -> (i32, i32) {
    %c1_i32 = arith.constant 1 : i32
    %0 = arith.muli %arg0, %c1_i32 : i32
    %1 = arith.addi %0, %arg1 : i32
    %c0_i32 = arith.constant 0 : i32
    %c0_i32_0 = arith.constant 0 : i32
    return %c0_i32, %1 : i32, i32
  }
  func.func @transform_5(%arg0: i32, %arg1: i32) -> (i32, i32) {
    %c1_i32 = arith.constant 1 : i32
    %0 = arith.muli %arg0, %c1_i32 : i32
    %1 = arith.addi %0, %arg1 : i32
    %c0_i32 = arith.constant 0 : i32
    %c0_i32_0 = arith.constant 0 : i32
    return %1, %c0_i32 : i32, i32
  }
  func.func @transform_6(%arg0: i32, %arg1: i32) -> (i32, i32) {
    %c0_i32 = arith.constant 0 : i32
    %c0_i32_0 = arith.constant 0 : i32
    %c0_i32_1 = arith.constant 0 : i32
    return %c0_i32, %c0_i32_0 : i32, i32
  }
  func.func @transform_7(%arg0: i32, %arg1: i32) -> (i32, i32, i32) {
    %c0_i32 = arith.constant 0 : i32
    %c0_i32_0 = arith.constant 0 : i32
    %c0_i32_1 = arith.constant 0 : i32
    return %arg0, %c0_i32, %c0_i32_0 : i32, i32, i32
  }
}

</mosaic_0001>

<bundles_post_ra>
// kernel: inception_aux_forward.1
= control target key start
LH: loop header
LB: loop body
LE: loop exit
PB: predicated region body
PF: predicated region fallthrough
CT: control target
= control target key end

     0   :  { %s9250_s0 = inlined_call_operand.vmem [shape: f32[32,4], index: 0, kind: input, shape index: {}]   ;;  %s9251_s1 = inlined_call_operand.hbm [shape: f32[4,128], index: 1, kind: input, shape index: {}]   ;;  %s9252_s2 = inlined_call_operand.hbm [shape: f32[1,128], index: 2, kind: input, shape index: {}]   ;;  %s9253_s3 = inlined_call_operand.hbm [shape: bf16[2048,1024], index: 3, kind: input, shape index: {}]   ;;  %s9254_s4 = inlined_call_operand.hbm [shape: f32[1,1024], index: 4, kind: input, shape index: {}]   ;;  %s9255_s5 = inlined_call_operand.hbm [shape: f32[1024,128], index: 5, kind: input, shape index: {}]   ;;  %s9256_s6 = inlined_call_operand.hbm [shape: f32[1,128], index: 6, kind: input, shape index: {}]   ;;  %s9257_s7 = inlined_call_operand.vmem [shape: f32[2,2,128], index: 7, kind: output, shape index: {}]  }
   0x1   :  { %9261 = sst [smem:[#allocation17_spill]] %s9251_s1 }
   0x2   :  { %9262 = sst [smem:[#allocation18_spill]] %s9253_s3 }
   0x3   :  { %9263 = sst [smem:[#allocation19_spill]] %s9257_s7 }
   0x4   :  { %12 = vsyncpa [#allocation4], 0 }
   0x5   :  { %13 = vsyncpa [#allocation6], 0  ;;  %s7846_s24 = smov 0   ;;  %s7848_s25 = smov 0  }
   0x6   :  { %s7850_s26 = smov 0   ;;  %s7852_s27 = smov 0  }
   0x7   :  { %s7854_s28 = smov 0   ;;  %s7856_s29 = smov 0  }
   0x8 LB: > { %9264 = sst [smem:[#allocation15_spill]] %s7788_s27  ;;  %s9258_s30 = sadd.s32 4294967295, %s7796_s29   ;;  %s7796_s29 = sphi %s7856_s29, %s19_s29   ;;  %s7792_s28 = sphi %s7854_s28, %s9282_s28   ;;  %s7788_s27 = sphi %s7852_s27, %s9281_s27   ;;  %s7784_s26 = sphi %s7850_s26, %s9280_s26   ;;  %s7780_s25 = sphi %s7848_s25, %s9279_s25   ;;  %s7776_s24 = sphi %s7846_s24, %s9278_s24  }
   0x9   : > { %s103_s8 = sadd.s32 1, %s7784_s26  ;;  %p110_p0 = scmp.ne.s32.totalorder %s7784_s26, %s7780_s25 }
   0xa   : > { %p111_p1 = scmp.eq.s32.totalorder %s7796_s29, 0  ;;  %p116_p2 = scmp.ne.s32.totalorder %s7780_s25, %s7776_s24 }
   0xb   : > { %p7882_p3 = scmp.eq.s32.totalorder %s9258_s30, 0  ;;  %p4836_p5 = scmp.ge.s32.totalorder %s7796_s29, 1 }
   0xc   : > { %p7886_p4 = por %p111_p1, %p110_p0  ;;  %p230_p7 = scmp.lt.s32.totalorder %s7796_s29, 3 }
   0xd   : > { %p7893_p6 = por %p7882_p3, %p116_p2  ;;  %s9268_s1 = sld [smem:[#allocation17_spill]] }
   0xe   : > { %p7901_p8 = pnand %p4836_p5, %p230_p7  ;;  %s7798_s16 = smov [#allocation3]  }
   0xf   : > { %s247_s17 = sshll.u32 %s7798_s16, 4  ;;  %p7467_p10 = scmp.lt.s32.totalorder %s7796_s29, 2  ;;  %s248_s17 = int_to_ptr.vmem [resolvable:$true] %s247_s17 }
  0x10   : > { %p7444_p9 = pneg %p7901_p8  ;;  %s31_s20 = sadd.s32 1, %s7792_s28 }
  0x11   : > { %p7916_p12 = pnand %p7467_p10, %p7886_p4  ;;  %p33_p13 = scmp.ge.s32.totalorder %s31_s20, 2 }
  0x12   : > { %p7910_p11 = pnand %p7444_p9, %p7882_p3  ;;  %s282_s21 = sand.u32 1, %s7796_s29  }
  0x13   : > { %s245_s14 = sshll.u32 %s9268_s1, 4  ;;  %s7925_s22 = sand.u32 1, %s7784_s26   ;;  %s246_s14 = int_to_ptr.hbm [resolvable:$true] %s245_s14 }
  0x14   : > { %7447 = dma.hbm_to_vmem [thread:$0]  (!%p7910_p11), %s246_s14, 64, %s248_s17, [#allocation4]  }
  0x15   : > { %s9284_s20 = smov (%p33_p13, %s31_s20), 0  ;;  %s4841_s23 = sshll.u32 %s7925_s22, 12 }
  0x16   : > { %9272 = sst [smem:[#allocation16_spill]] %s9284_s20  ;;  %s100_s24 = ssub.s32 %s7792_s28, %s9284_s20 }
  0x17   : > { %p101_p0 = scmp.eq.s32.totalorder %s100_s24, 0  ;;  %s6912_s10 = sshll.u32 %s7792_s28, 4 }
  0x18   : > { %s9273_s3 = sld [smem:[#allocation18_spill]]  ;;  %s286_s30 = scalar_lea.vmem [#allocation7], %s4841_s23 }
  0x19   : > { %s295_s14 = sshll.u32 %s286_s30, 4  ;;  %s7941_s7 = scalar_lea.sflag [#allocation4], %s282_s21  ;;  %s296_s14 = int_to_ptr.vmem [resolvable:$true] %s295_s14 }
  0x1a   : > { %s7939_s17 = scalar_select %p101_p0, %s7784_s26, %s103_s8  }
  0x1b   : > { %s7799_s24 = smov 512   ;;  %s7800_s20 = smov 256  }
  0x1c   : > { %s7801_s27 = smov 16   ;;  %s257_s30 = sshll.u32 %s9252_s2, 4  ;;  %s258_s30 = int_to_ptr.hbm [resolvable:$true] %s257_s30 }
  0x1d   : > { %s7802_s8 = smov [#allocation5]   ;;  %s4844_s13 = sshll.u32 %s7925_s22, 2 }
  0x1e   : > { %s292_s16 = scalar_lea.hbm %s9273_s3, %s6912_s10  ;;  %s259_s12 = sshll.u32 %s7802_s8, 4  ;;  %s260_s12 = int_to_ptr.vmem [resolvable:$true] %s259_s12 }
  0x1f   : > { %s293_s1 = sshll.u32 %s292_s16, 4  ;;  %s4845_s21 = sshll.u32 %s7792_s28, 2  ;;  %s294_s1 = int_to_ptr.hbm [resolvable:$true] %s293_s1 }
  0x20   : > { %7457 = dma.hbm_to_vmem [thread:$0]  (!%p7916_p12), %s294_s1, 65536, %s296_s14, %s7941_s7, %s7799_s24, %s7800_s20, %s7801_s27  }
  0x21   : > { %7450 = dma.hbm_to_vmem [thread:$0]  (!%p7910_p11), %s258_s30, 16, %s260_s12, [#allocation6]  }
  0x22   : > { %s314_s1 = scalar_lea.hbm %s9254_s4, %s4845_s21  ;;  %s309_s27 = scalar_lea.vmem [#allocation8], %s4844_s13 }
  0x23   : > { %s318_s20 = sshll.u32 %s309_s27, 4  ;;  %s316_s14 = sshll.u32 %s314_s1, 4  ;;  %s319_s20 = int_to_ptr.vmem [resolvable:$true] %s318_s20  ;;  %s317_s14 = int_to_ptr.hbm [resolvable:$true] %s316_s14 }
  0x24   : > { %s269_s23 = sshll.u32 %s9256_s6, 4  ;;  %s7803_s30 = smov [#allocation10]   ;;  %s270_s23 = int_to_ptr.hbm [resolvable:$true] %s269_s23 }
  0x25   : > { %7460 = dma.hbm_to_vmem [thread:$0]  (!%p7916_p12), %s317_s14, 64, %s319_s20, %s7941_s7  }
  0x26   : > { %s271_s8 = sshll.u32 %s7803_s30, 4  ;;  %s4846_s12 = sshll.u32 %s7925_s22, 9  ;;  %s272_s8 = int_to_ptr.vmem [resolvable:$true] %s271_s8 }
  0x27   : > { %7453 = dma.hbm_to_vmem [thread:$0]  (!%p7910_p11), %s270_s23, 16, %s272_s8, [#allocation6]  }
  0x28   : > { %s6913_s3 = sshll.u32 %s7792_s28, 9  ;;  %s329_s13 = scalar_lea.vmem [#allocation9], %s4846_s12 }
  0x29   : > { %s338_s21 = sshll.u32 %s329_s13, 4  ;;  %s335_s27 = scalar_lea.hbm %s9255_s5, %s6913_s3  ;;  %s339_s21 = int_to_ptr.vmem [resolvable:$true] %s338_s21 }
  0x2a   : > { %s336_s24 = sshll.u32 %s335_s27, 4  ;;  %s7804_s20 = smov 128   ;;  %s337_s24 = int_to_ptr.hbm [resolvable:$true] %s336_s24 }
  0x2b   : > { %s7805_s14 = smov 8   ;;  %350 = sbr.rel (%p7901_p8) target bundleno = 1028 (0x404), region = 48 }
  0x2c   : > { %7463 = dma.hbm_to_vmem [thread:$0]  (!%p7916_p12), %s337_s24, 8192, %s339_s21, %s7941_s7, %s7804_s20, %s7804_s20, %s7805_s14  }
  0x30   : > { %7759 = dma.done.wait (%p7882_p3), [#allocation4], 64  }
  0x31   : > { %7761 = vsyncadd (%p7882_p3), [#allocation4], 4294967232 }
  0x32   : > { %7763 = dma.done.wait (%p7882_p3), [#allocation6], 16  }
  0x33   : > { %7765 = vsyncadd (%p7882_p3), [#allocation6], 4294967280  ;;  %s9274_s18 = sadd.s32 4294967295, %s7796_s29   ;;  %s364_s19 = sand.u32 1, %s7780_s25  }
  0x34   : > { %s362_s7 = sand.u32 1, %s9274_s18   ;;  %s4852_s15 = sshll.u32 %s364_s19, 12 }
  0x35   : > { %s363_s22 = scalar_lea.sflag [#allocation4], %s362_s7  ;;  %s7985_s10 = scalar_lea.vmem [#allocation7], %s4852_s15 }
  0x36   : > { %7767 = dma.done.wait (%p7893_p6), %s363_s22, 73792  }
  0x37   : > { %7769 = vsyncadd (%p7893_p6), %s363_s22, 4294893504  ;;  %s4853_s23 = sshll.u32 %s364_s19, 2  ;;  %s4854_s30 = sshll.u32 %s364_s19, 9 }
  0x38   : > { %s7991_s8 = scalar_lea.vmem [#allocation8], %s4853_s23  ;;  %s7993_s12 = scalar_lea.vmem [#allocation9], %s4854_s30 }
  0x39   : > { %7771 = dma.done.wait (%p7882_p3), [#allocation6], 16  }
  0x3a   : > { %7773 = vsyncadd (%p7882_p3), [#allocation6], 4294967280  ;;  %vm468_vm0 = vcmask 1043456   ;;  %vm455_vm1 = vcmask 31744   ;;  %v450_v0 = vld [vmem:[#allocation3] sm:$0xf] }
  0x3b   : > { %v446_v1 = vld [vmem:[%s9250_s0] sm:$0xff]  ;;  %4857 = vmatpush.msk.msra.mxu0 %vm468_vm0, %v450_v0  ;;  %v447_v2 = vld [vmem:[%s9250_s0 + $0x8] sm:$0xff]  ;;  %v448_v3 = vld [vmem:[%s9250_s0 + $0x10] sm:$0xff]  ;;  %s9275_s24 = sld [smem:[#allocation15_spill]] }
  0x3c   : > { %4858 = vmatmul.msk.f32.vlgmr.msra.gmra.mxu0 %vm455_vm1, %v446_v1  ;;  %v449_v4 = vld [vmem:[%s9250_s0 + $0x18] sm:$0xff]  ;;  %v6944_v21 = vld [vmem:[%s7985_s10 + $0xec] sm:$0xf0]  ;;  %s9276_s15 = sld [smem:[#allocation19_spill]] }
  0x3d   : > { %v8011_v5 = vld [vmem:[#allocation5] ss:$0 sm:$0xff]  ;;  %v4976_v20 = vld [vmem:[%s7985_s10 + $0xe0] sm:$0xf]  ;;  %v6976_v24 = vld [vmem:[%s7985_s10 + $0x1ec] sm:$0xf0] }
  0x3e   : > { %v4977_v22 = vor.u32 %v6944_v21, %v4976_v20  ;;  %v5104_v23 = vld [vmem:[%s7985_s10 + $0x1e0] sm:$0xf]  ;;  %v7008_v27 = vld [vmem:[%s7985_s10 + $0x2ec] sm:$0xf0] }
  0x3f   : > { %v5232_v25 = vld [vmem:[%s7985_s10 + $0x2e0] sm:$0xf]  ;;  %v5105_v26 = vor.u32 %v6976_v24, %v5104_v23  ;;  %v7040_v30 = vld [vmem:[%s7985_s10 + $0x3ec] sm:$0xf0] }
  0x40   : > { %v5360_v28 = vld [vmem:[%s7985_s10 + $0x3e0] sm:$0xf]  ;;  %3707 = vmatpush.bf16.msra.mxu1 %v4977_v22  ;;  %v5233_v29 = vor.u32 %v7008_v27, %v5232_v25  ;;  %v6940_v33 = vld [vmem:[%s7985_s10 + $0xcc] sm:$0xf0] }
  0x41   : > { %3720 = vmatpush.bf16.msra.mxu2 %v5105_v26  ;;  %v5361_v31 = vor.u32 %v7040_v30, %v5360_v28  ;;  %v4960_v32 = vld [vmem:[%s7985_s10 + $0xc0] sm:$0xf]  ;;  %v6972_v36 = vld [vmem:[%s7985_s10 + $0x1cc] sm:$0xf0]  ;;  %p578_p1 = scmp.eq.s32.totalorder %s9275_s24, 0  ;;  %p438_p2 = scmp.lt.s32.totalorder %s9275_s24, 1 }
  0x42   : > { %v5088_v34 = vld [vmem:[%s7985_s10 + $0x1c0] sm:$0xf]  ;;  %3733 = vmatpush.bf16.msra.mxu3 %v5233_v29  ;;  %v4961_v35 = vor.u32 %v6940_v33, %v4960_v32  ;;  %v7004_v38 = vld [vmem:[%s7985_s10 + $0x2cc] sm:$0xf0] }
  0x43   : > { %v5216_v37 = vld [vmem:[%s7985_s10 + $0x2c0] sm:$0xf]  ;;  %3746 = vmatpush.bf16.msrb.mxu0 %v5361_v31  ;;  %v5089_v40 = vor.u32 %v6972_v36, %v5088_v34  ;;  %v7036_v43 = vld [vmem:[%s7985_s10 + $0x3cc] sm:$0xf0]  ;;  %s579_s20 = scalar_select %p578_p1, 1, 0 }
  0x44   : > { %4859 = vmatmul.msk.f32.gmra.mxu0 %vm455_vm1, %v447_v2  ;;  %v5217_v41 = vor.u32 %v7004_v38, %v5216_v37  ;;  %v5344_v42 = vld [vmem:[%s7985_s10 + $0x3c0] sm:$0xf]  ;;  %3708 = vmatpush.bf16.msra.mxu1 %v4961_v35  ;;  %v6936_v46 = vld [vmem:[%s7985_s10 + $0xac] sm:$0xf0]  ;;  %s9286_s24 = smov (!%p438_p2, %s9275_s24), 1 }
  0x45   : > { %v5345_v44 = vor.u32 %v7036_v43, %v5344_v42  ;;  %3721 = vmatpush.bf16.msra.mxu2 %v5089_v40  ;;  %v4944_v45 = vld [vmem:[%s7985_s10 + $0xa0] sm:$0xf]  ;;  %v6968_v49 = vld [vmem:[%s7985_s10 + $0x1ac] sm:$0xf0]  ;;  %s580_s14 = scvt.s32.f32 %s579_s20  ;;  %s4856_s18 = sshll.u32 %s9286_s24, 1 }
  0x46   : > { %3734 = vmatpush.bf16.msra.mxu3 %v5217_v41  ;;  %v4945_v47 = vor.u32 %v6936_v46, %v4944_v45  ;;  %v5072_v48 = vld [vmem:[%s7985_s10 + $0x1a0] sm:$0xf]  ;;  %v7000_v52 = vld [vmem:[%s7985_s10 + $0x2ac] sm:$0xf0]  ;;  %s441_s22 = scalar_lea.vmem %s9276_s15, %s4856_s18 }
  0x47   : > { %v5200_v50 = vld [vmem:[%s7985_s10 + $0x2a0] sm:$0xf]  ;;  %3747 = vmatpush.bf16.msrb.mxu0 %v5345_v44  ;;  %v5073_v51 = vor.u32 %v6968_v49, %v5072_v48  ;;  %v7032_v54 = vld [vmem:[%s7985_s10 + $0x3ac] sm:$0xf0] }
  0x48   : > { %v5328_v53 = vld [vmem:[%s7985_s10 + $0x3a0] sm:$0xf]  ;;  %3709 = vmatpush.bf16.msra.mxu1 %v4945_v47  ;;  %v5201_v55 = vor.u32 %v7000_v52, %v5200_v50  ;;  %v6932_v58 = vld [vmem:[%s7985_s10 + $0x8c] sm:$0xf0] }
  0x49   : > { %v5329_v56 = vor.u32 %v7032_v54, %v5328_v53  ;;  %3722 = vmatpush.bf16.msra.mxu2 %v5073_v51  ;;  %v4928_v57 = vld [vmem:[%s7985_s10 + $0x80] sm:$0xf]  ;;  %v6964_v61 = vld [vmem:[%s7985_s10 + $0x18c] sm:$0xf0] }
  0x4a   : > { %v5056_v59 = vld [vmem:[%s7985_s10 + $0x180] sm:$0xf]  ;;  %3735 = vmatpush.bf16.msra.mxu3 %v5201_v55  ;;  %v4929_v60 = vor.u32 %v6932_v58, %v4928_v57  ;;  %v6996_v63 = vld [vmem:[%s7985_s10 + $0x28c] sm:$0xf0] }
  0x4b   : > { %v5184_v62 = vld [vmem:[%s7985_s10 + $0x280] sm:$0xf]  ;;  %3748 = vmatpush.bf16.msrb.mxu0 %v5329_v56  ;;  %v5057_v0 = vor.u32 %v6964_v61, %v5056_v59  ;;  %v6924_v22 = vld [vmem:[%s7985_s10 + $0x4c] sm:$0xf0] }
  0x4c   : > { %4860 = vmatmul.msk.f32.gmra.mxu0 %vm455_vm1, %v448_v3  ;;  %v5185_v1 = vor.u32 %v6996_v63, %v5184_v62  ;;  %v5312_v2 = vld [vmem:[%s7985_s10 + $0x380] sm:$0xf]  ;;  %v7028_v3 = vld [vmem:[%s7985_s10 + $0x38c] sm:$0xf0]  ;;  %3710 = vmatpush.bf16.msra.mxu1 %v4929_v60 }
  0x4d   : > { %3723 = vmatpush.bf16.msra.mxu2 %v5057_v0  ;;  %v4896_v21 = vld [vmem:[%s7985_s10 + $0x40] sm:$0xf]  ;;  %v6956_v26 = vld [vmem:[%s7985_s10 + $0x14c] sm:$0xf0] }
  0x4e   : > { %3736 = vmatpush.bf16.msra.mxu3 %v5185_v1  ;;  %v5024_v23 = vld [vmem:[%s7985_s10 + $0x140] sm:$0xf]  ;;  %v4897_v25 = vor.u32 %v6924_v22, %v4896_v21  ;;  %v6988_v28 = vld [vmem:[%s7985_s10 + $0x24c] sm:$0xf0] }
  0x4f   : > { %v5152_v27 = vld [vmem:[%s7985_s10 + $0x240] sm:$0xf]  ;;  %v5025_v30 = vor.u32 %v6956_v26, %v5024_v23  ;;  %v7020_v33 = vld [vmem:[%s7985_s10 + $0x34c] sm:$0xf0] }
  0x50   : > { %v5153_v31 = vor.u32 %v6988_v28, %v5152_v27  ;;  %v5280_v32 = vld [vmem:[%s7985_s10 + $0x340] sm:$0xf]  ;;  %v6952_v41 = vld [vmem:[%s7985_s10 + $0x12c] sm:$0xf0] }
  0x51   : > { %v5281_v35 = vor.u32 %v7020_v33, %v5280_v32  ;;  %v4880_v37 = vld [vmem:[%s7985_s10 + $0x20] sm:$0xf]  ;;  %v6984_v43 = vld [vmem:[%s7985_s10 + $0x22c] sm:$0xf0] }
  0x52   : > { %v5008_v38 = vld [vmem:[%s7985_s10 + $0x120] sm:$0xf]  ;;  %v6916_v49 = vld [vmem:[%s7985_s10 + $0xc] sm:$0xf0] }
  0x53   : > { %v5136_v42 = vld [vmem:[%s7985_s10 + $0x220] sm:$0xf]  ;;  %v5009_v44 = vor.u32 %v6952_v41, %v5008_v38  ;;  %v6948_v52 = vld [vmem:[%s7985_s10 + $0x10c] sm:$0xf0] }
  0x54   : > { %4861 = vmatmul.msk.f32.gmra.mxu0 %vm455_vm1, %v449_v4  ;;  %v5137_v45 = vor.u32 %v6984_v43, %v5136_v42  ;;  %v5264_v46 = vld [vmem:[%s7985_s10 + $0x320] sm:$0xf]  ;;  %v6980_v55 = vld [vmem:[%s7985_s10 + $0x20c] sm:$0xf0] }
  0x55   : > { %v4864_v48 = vld [vmem:[%s7985_s10] sm:$0xf]  ;;  %v7012_v57 = vld [vmem:[%s7985_s10 + $0x30c] sm:$0xf0] }
  0x56   : > { %v4865_v50 = vor.u32 %v6916_v49, %v4864_v48  ;;  %v4992_v51 = vld [vmem:[%s7985_s10 + $0x100] sm:$0xf]  ;;  %v7072_v61 = vld [vmem:[%s7985_s10 + $0x4ec] sm:$0xf0] }
  0x57   : > { %v5120_v53 = vld [vmem:[%s7985_s10 + $0x200] sm:$0xf]  ;;  %v4993_v54 = vor.u32 %v6948_v52, %v4992_v51  ;;  %v7104_v1 = vld [vmem:[%s7985_s10 + $0x5ec] sm:$0xf0] }
  0x58   : > { %v5248_v56 = vld [vmem:[%s7985_s10 + $0x300] sm:$0xf]  ;;  %v5121_v58 = vor.u32 %v6980_v55, %v5120_v53  ;;  %v7164_v22 = vld [vmem:[%s7985_s10 + $0x7cc] sm:$0xf0] }
  0x59   : > { %v5249_v59 = vor.u32 %v7012_v57, %v5248_v56  ;;  %v5488_v60 = vld [vmem:[%s7985_s10 + $0x4e0] sm:$0xf]  ;;  %v7096_v28 = vld [vmem:[%s7985_s10 + $0x5ac] sm:$0xf0] }
  0x5a   : > { %v5616_v62 = vld [vmem:[%s7985_s10 + $0x5e0] sm:$0xf]  ;;  %v5489_v0 = vor.u32 %v7072_v61, %v5488_v60  ;;  %v7160_v33 = vld [vmem:[%s7985_s10 + $0x7ac] sm:$0xf0] }
  0x5b   : > { %v5456_v23 = vld [vmem:[%s7985_s10 + $0x4a0] sm:$0xf]  ;;  %v7124_v43 = vld [vmem:[%s7985_s10 + $0x68c] sm:$0xf0] }
  0x5c   : > { %v5584_v27 = vld [vmem:[%s7985_s10 + $0x5a0] sm:$0xf]  ;;  %v7056_v48 = vld [vmem:[%s7985_s10 + $0x46c] sm:$0xf0] }
  0x5d   : > { %v5840_v32 = vld [vmem:[%s7985_s10 + $0x7a0] sm:$0xf]  ;;  %v7088_v51 = vld [vmem:[%s7985_s10 + $0x56c] sm:$0xf0] }
  0x5e   : > { %v5568_v38 = vld [vmem:[%s7985_s10 + $0x580] sm:$0xf]  ;;  %v7120_v53 = vld [vmem:[%s7985_s10 + $0x66c] sm:$0xf0] }
  0x5f   : > { %v5696_v42 = vld [vmem:[%s7985_s10 + $0x680] sm:$0xf]  ;;  %v7152_v56 = vld [vmem:[%s7985_s10 + $0x76c] sm:$0xf0] }
  0x60   : > { %v5552_v49 = vld [vmem:[%s7985_s10 + $0x560] sm:$0xf] }
  0x61   : > { %v5680_v52 = vld [vmem:[%s7985_s10 + $0x660] sm:$0xf]  ;;  %v5553_v57 = vor.u32 %v7088_v51, %v5552_v49  ;;  %v7228_v49 = vld [vmem:[%s7985_s10 + $0x9cc] sm:$0xf0] }
  0x62   : > { %v5808_v55 = vld [vmem:[%s7985_s10 + $0x760] sm:$0xf]  ;;  %v5681_v60 = vor.u32 %v7120_v53, %v5680_v52 }
  0x63   : > { %v5536_v61 = vld [vmem:[%s7985_s10 + $0x540] sm:$0xf] }
  0x64   : > { %v6240_v53 = vld [vmem:[%s7985_s10 + $0xac0] sm:$0xf] }
  0xb9   : > { %v489_v6 = vpop.f32.mrf.mxu0 }
  0xba   : > { %v490_v7 = vadd.f32 %v8011_v5, %v489_v6  ;;  %v5313_v6 = vor.u32 %v7028_v3, %v5312_v2  ;;  %v5744_v2 = vld [vmem:[%s7985_s10 + $0x6e0] sm:$0xf]  ;;  %v5617_v3 = vor.u32 %v7104_v1, %v5616_v62  ;;  %v7084_v62 = vld [vmem:[%s7985_s10 + $0x54c] sm:$0xf0] }
  0xbb   : > { %v7116_v1 = vld [vmem:[%s7985_s10 + $0x64c] sm:$0xf0] }
  0xbc   : > { %v501_v8 = vmax.f32 %v490_v7, 0.0  ;;  %v4912_v7 = vld [vmem:[%s7985_s10 + $0x60] sm:$0xf]  ;;  %3749 = vmatpush.bf16.msrb.mxu0 %v5313_v6 }
  0xbd   : > { %v5872_v6 = vld [vmem:[%s7985_s10 + $0x7e0] sm:$0xf] }
  0xbe   : > { %v505_v9 = vpack.c.bf16 %v501_v8, %v501_v8  ;;  %v6928_v8 = vld [vmem:[%s7985_s10 + $0x6c] sm:$0xf0] }
  0xc0   : > { %506 = vst [vmem:[#allocation2] sm:$0x1] %v505_v9 }
  0xc1   : > { %508 = vst [vmem:[#allocation1] sm:$0xff] %v505_v9  ;;  %v492_v10 = vpop.f32.mrf.mxu0 }
  0xc2   : > { %v493_v11 = vadd.f32 %v8011_v5, %v492_v10  ;;  %v5040_v10 = vld [vmem:[%s7985_s10 + $0x160] sm:$0xf] }
  0xc4   : > { %v502_v12 = vmax.f32 %v493_v11, 0.0  ;;  %v6960_v11 = vld [vmem:[%s7985_s10 + $0x16c] sm:$0xf0] }
  0xc6   : > { %v8015_v13 = vpack.c.bf16 %v502_v12, %v502_v12  ;;  %v5041_v12 = vor.u32 %v6960_v11, %v5040_v10  ;;  %v7068_v11 = vld [vmem:[%s7985_s10 + $0x4cc] sm:$0xf0] }
  0xc8   : > { %v510_v14 = vld [vmem:[#allocation1 + $0x1] ss:$4 sm:$0xff]  ;;  %524 = vst [vmem:[#allocation2 + $0x4] sm:$0x1] %v8015_v13  ;;  %3724 = vmatpush.bf16.msra.mxu2 %v5041_v12 }
  0xc9   : > { %513 = vst [vmem:[#allocation1] sm:$0xff] %v505_v9  ;;  %v495_v15 = vpop.f32.mrf.mxu0  ;;  %v5600_v12 = vld [vmem:[%s7985_s10 + $0x5c0] sm:$0xf] }
  0xca   : > { %512 = vst [vmem:[#allocation2 + $0x1] sm:$0x1] %v510_v14  ;;  %v496_v16 = vadd.f32 %v8011_v5, %v495_v15  ;;  %v5168_v14 = vld [vmem:[%s7985_s10 + $0x260] sm:$0xf]  ;;  %v6992_v15 = vld [vmem:[%s7985_s10 + $0x26c] sm:$0xf0] }
  0xcc   : > { %v503_v18 = vmax.f32 %v496_v16, 0.0  ;;  %v5296_v16 = vld [vmem:[%s7985_s10 + $0x360] sm:$0xf]  ;;  %3725 = vmatpush.bf16.msra.mxu2 %v5025_v30  ;;  %v5585_v30 = vor.u32 %v7096_v28, %v5584_v27  ;;  %v7108_v28 = vld [vmem:[%s7985_s10 + $0x60c] sm:$0xf0] }
  0xcd   : > { %v5632_v27 = vld [vmem:[%s7985_s10 + $0x600] sm:$0xf] }
  0xce   : > { %v8019_v19 = vpack.c.bf16 %v503_v18, %v503_v18  ;;  %v7024_v18 = vld [vmem:[%s7985_s10 + $0x36c] sm:$0xf0] }
  0xcf   : > { %v5297_v20 = vor.u32 %v7024_v18, %v5296_v16  ;;  %v7132_v18 = vld [vmem:[%s7985_s10 + $0x6cc] sm:$0xf0] }
  0xd0   : > { %v515_v17 = vld [vmem:[#allocation1 + $0x2] ss:$4 sm:$0xff]  ;;  %542 = vst [vmem:[#allocation2 + $0x8] sm:$0x1] %v8019_v19  ;;  %3726 = vmatpush.bf16.msra.mxu2 %v5009_v44 }
  0xd1   : > { %518 = vst [vmem:[#allocation1] sm:$0xff] %v505_v9  ;;  %v4913_v9 = vor.u32 %v6928_v8, %v4912_v7  ;;  %3750 = vmatpush.bf16.msrb.mxu0 %v5297_v20  ;;  %v498_v24 = vpop.f32.mrf.mxu0  ;;  %v7168_v8 = vld [vmem:[%s7985_s10 + $0x7ec] sm:$0xf0]  ;;  %v5856_v20 = vld [vmem:[%s7985_s10 + $0x7c0] sm:$0xf] }
  0xd2   : > { %517 = vst [vmem:[#allocation2 + $0x2] sm:$0x1] %v515_v17  ;;  %v5169_v17 = vor.u32 %v6992_v15, %v5168_v14  ;;  %v499_v29 = vadd.f32 %v8011_v5, %v498_v24  ;;  %v6920_v5 = vld [vmem:[%s7985_s10 + $0x2c] sm:$0xf0]  ;;  %v5873_v10 = vor.u32 %v7168_v8, %v5872_v6  ;;  %v5392_v8 = vld [vmem:[%s7985_s10 + $0x420] sm:$0xf] }
  0xd3   : > { %3711 = vmatpush.bf16.msra.mxu1 %v4913_v9  ;;  %v4881_v40 = vor.u32 %v6920_v5, %v4880_v37  ;;  %v5472_v9 = vld [vmem:[%s7985_s10 + $0x4c0] sm:$0xf]  ;;  %v7100_v14 = vld [vmem:[%s7985_s10 + $0x5cc] sm:$0xf0]  ;;  %v5841_v5 = vor.u32 %v7160_v33, %v5840_v32 }
  0xd4   : > { %3737 = vmatpush.bf16.msra.mxu3 %v5169_v17  ;;  %v504_v36 = vmax.f32 %v499_v29, 0.0  ;;  %3727 = vmatpush.bf16.msra.mxu2 %v4993_v54  ;;  %v5473_v15 = vor.u32 %v7068_v11, %v5472_v9  ;;  %v5601_v16 = vor.u32 %v7100_v14, %v5600_v12  ;;  %v5728_v17 = vld [vmem:[%s7985_s10 + $0x6c0] sm:$0xf]  ;;  %v7064_v24 = vld [vmem:[%s7985_s10 + $0x4ac] sm:$0xf0] }
  0xd5   : > { %3751 = vmatpush.bf16.msrb.mxu0 %v5281_v35  ;;  %v5729_v21 = vor.u32 %v7132_v18, %v5728_v17  ;;  %v5457_v26 = vor.u32 %v7064_v24, %v5456_v23  ;;  %v5712_v29 = vld [vmem:[%s7985_s10 + $0x6a0] sm:$0xf]  ;;  %v7148_v6 = vld [vmem:[%s7985_s10 + $0x74c] sm:$0xf0] }
  0xd6   : > { %v5440_v35 = vld [vmem:[%s7985_s10 + $0x480] sm:$0xf]  ;;  %v7048_v9 = vld [vmem:[%s7985_s10 + $0x42c] sm:$0xf0] }
  0xd7   : > { %3712 = vmatpush.bf16.msra.mxu1 %v4897_v25  ;;  %v5857_v25 = vor.u32 %v7164_v22, %v5856_v20  ;;  %v5520_v11 = vld [vmem:[%s7985_s10 + $0x520] sm:$0xf]  ;;  %v7080_v12 = vld [vmem:[%s7985_s10 + $0x52c] sm:$0xf0]  ;;  %v5393_v17 = vor.u32 %v7048_v9, %v5392_v8 }
  0xd8   : > { %v520_v39 = vld [vmem:[#allocation1 + $0x3] ss:$4 sm:$0xff]  ;;  %3738 = vmatpush.bf16.msra.mxu3 %v5153_v31  ;;  %3772 = vmatpush.bf16.msrb.mxu2 %v5617_v3 }
  0xd9   : > { %522 = vst [vmem:[#allocation2 + $0x3] sm:$0x1] %v520_v39  ;;  %v8077_v39 = vpack.c.bf16 %v504_v36, %v504_v36  ;;  %v7128_v31 = vld [vmem:[%s7985_s10 + $0x6ac] sm:$0xf0]  ;;  %v5776_v18 = vld [vmem:[%s7985_s10 + $0x720] sm:$0xf] }
  0xda   : > { %526 = vst [vmem:[#allocation1] sm:$0xff] %v8015_v13  ;;  %v7060_v36 = vld [vmem:[%s7985_s10 + $0x48c] sm:$0xf0]  ;;  %v5504_v24 = vld [vmem:[%s7985_s10 + $0x500] sm:$0xf] }
  0xdb   : > { %560 = vst [vmem:[#allocation2 + $0xc] sm:$0x1] %v8077_v39  ;;  %3713 = vmatpush.bf16.msra.mxu1 %v4881_v40  ;;  %v7092_v40 = vld [vmem:[%s7985_s10 + $0x58c] sm:$0xf0]  ;;  %v5441_v41 = vor.u32 %v7060_v36, %v5440_v35 }
  0xdc   : > { %3739 = vmatpush.bf16.msra.mxu3 %v5137_v45  ;;  %3773 = vmatpush.bf16.msrb.mxu2 %v5601_v16  ;;  %v5569_v44 = vor.u32 %v7092_v40, %v5568_v38  ;;  %v5824_v45 = vld [vmem:[%s7985_s10 + $0x780] sm:$0xf]  ;;  %v7112_v16 = vld [vmem:[%s7985_s10 + $0x62c] sm:$0xf0] }
  0xdd   : > { %v7144_v20 = vld [vmem:[%s7985_s10 + $0x72c] sm:$0xf0]  ;;  %v6000_v40 = vld [vmem:[%s7985_s10 + $0x8e0] sm:$0xf] }
  0xde   : > { %v7044_v22 = vld [vmem:[%s7985_s10 + $0x40c] sm:$0xf0] }
  0xdf   : > { %3714 = vmatpush.bf16.msra.mxu1 %v4865_v50 }
  0xe0   : > { %3740 = vmatpush.bf16.msra.mxu3 %v5121_v58  ;;  %3774 = vmatpush.bf16.msrb.mxu2 %v5585_v30  ;;  %v5408_v58 = vld [vmem:[%s7985_s10 + $0x440] sm:$0xf] }
  0xe1   : > { %v528_v4 = vld [vmem:[#allocation1 + $0x1] ss:$4 sm:$0xff] }
  0xe2   : > { %530 = vst [vmem:[#allocation2 + $0x5] sm:$0x1] %v528_v4  ;;  %v7136_v4 = vld [vmem:[%s7985_s10 + $0x6ec] sm:$0xf0]  ;;  %v5760_v30 = vld [vmem:[%s7985_s10 + $0x700] sm:$0xf] }
  0xe3   : > { %531 = vst [vmem:[#allocation1] sm:$0xff] %v8015_v13  ;;  %3759 = vmatpush.bf16.msrb.mxu1 %v5489_v0  ;;  %v5745_v7 = vor.u32 %v7136_v4, %v5744_v2  ;;  %v5664_v0 = vld [vmem:[%s7985_s10 + $0x640] sm:$0xf] }
  0xe4   : > { %3775 = vmatpush.bf16.msrb.mxu2 %v5569_v44  ;;  %v5792_v4 = vld [vmem:[%s7985_s10 + $0x740] sm:$0xf] }
  0xe5   : > { %3785 = vmatpush.bf16.msrb.mxu3 %v5745_v7  ;;  %v5537_v7 = vor.u32 %v7084_v62, %v5536_v61  ;;  %v5793_v14 = vor.u32 %v7148_v6, %v5792_v4  ;;  %v6256_v44 = vld [vmem:[%s7985_s10 + $0xae0] sm:$0xf] }
  0xe6   : > { %v5968_v6 = vld [vmem:[%s7985_s10 + $0x8a0] sm:$0xf] }
  0xe7   : > { %3760 = vmatpush.bf16.msrb.mxu1 %v5473_v15  ;;  %v5648_v15 = vld [vmem:[%s7985_s10 + $0x620] sm:$0xf] }
  0xe8   : > { %3776 = vmatpush.bf16.msrb.mxu2 %v5553_v57  ;;  %v5649_v23 = vor.u32 %v7112_v16, %v5648_v15  ;;  %v6352_v15 = vld [vmem:[%s7985_s10 + $0xba0] sm:$0xf]  ;;  %v7288_v16 = vld [vmem:[%s7985_s10 + $0xbac] sm:$0xf0] }
  0xe9   : > { %3786 = vmatpush.bf16.msrb.mxu3 %v5729_v21  ;;  %v5376_v21 = vld [vmem:[%s7985_s10 + $0x400] sm:$0xf] }
  0xea   : > { %v533_v34 = vld [vmem:[#allocation1 + $0x2] ss:$4 sm:$0xff] }
  0xeb   : > { %535 = vst [vmem:[#allocation2 + $0x6] sm:$0x1] %v533_v34  ;;  %v5713_v34 = vor.u32 %v7128_v31, %v5712_v29  ;;  %3761 = vmatpush.bf16.msrb.mxu1 %v5457_v26  ;;  %v5777_v26 = vor.u32 %v7144_v20, %v5776_v18  ;;  %v5377_v29 = vor.u32 %v7044_v22, %v5376_v21  ;;  %v7140_v31 = vld [vmem:[%s7985_s10 + $0x70c] sm:$0xf0]  ;;  %v5952_v20 = vld [vmem:[%s7985_s10 + $0x880] sm:$0xf] }
  0xec   : > { %536 = vst [vmem:[#allocation1] sm:$0xff] %v8015_v13  ;;  %v7016_v13 = vld [vmem:[%s7985_s10 + $0x32c] sm:$0xf0]  ;;  %3777 = vmatpush.bf16.msrb.mxu2 %v5537_v7  ;;  %v5761_v35 = vor.u32 %v7140_v31, %v5760_v30  ;;  %v6353_v22 = vor.u32 %v7288_v16, %v6352_v15  ;;  %v5936_v31 = vld [vmem:[%s7985_s10 + $0x860] sm:$0xf] }
  0xed   : > { %v5265_v47 = vor.u32 %v7016_v13, %v5264_v46  ;;  %v7156_v46 = vld [vmem:[%s7985_s10 + $0x78c] sm:$0xf0]  ;;  %3787 = vmatpush.bf16.msrb.mxu3 %v5713_v34  ;;  %v5697_v13 = vor.u32 %v7124_v43, %v5696_v42  ;;  %v5633_v34 = vor.u32 %v7108_v28, %v5632_v27  ;;  %v6128_v42 = vld [vmem:[%s7985_s10 + $0x9e0] sm:$0xf] }
  0xee   : > { %v5825_v50 = vor.u32 %v7156_v46, %v5824_v45  ;;  %v7232_v43 = vld [vmem:[%s7985_s10 + $0x9ec] sm:$0xf0]  ;;  %v6384_v46 = vld [vmem:[%s7985_s10 + $0xbe0] sm:$0xf] }
  0xef   : > { %3752 = vmatpush.bf16.msrb.mxu0 %v5265_v47  ;;  %v5424_v47 = vld [vmem:[%s7985_s10 + $0x460] sm:$0xf]  ;;  %3762 = vmatpush.bf16.msrb.mxu1 %v5441_v41  ;;  %v7200_v41 = vld [vmem:[%s7985_s10 + $0x8ec] sm:$0xf0]  ;;  %v6129_v52 = vor.u32 %v7232_v43, %v6128_v42 }
  0xf0   : > { %v5425_v54 = vor.u32 %v7056_v48, %v5424_v47  ;;  %v7264_v45 = vld [vmem:[%s7985_s10 + $0xaec] sm:$0xf0]  ;;  %v5984_v47 = vld [vmem:[%s7985_s10 + $0x8c0] sm:$0xf]  ;;  %v6001_v51 = vor.u32 %v7200_v41, %v6000_v40 }
  0xf1   : > { %3788 = vmatpush.bf16.msrb.mxu3 %v5697_v13  ;;  %v7296_v13 = vld [vmem:[%s7985_s10 + $0xbec] sm:$0xf0]  ;;  %v6336_v27 = vld [vmem:[%s7985_s10 + $0xb80] sm:$0xf] }
  0xf2   : > { %v7196_v48 = vld [vmem:[%s7985_s10 + $0x8cc] sm:$0xf0]  ;;  %v6385_v61 = vor.u32 %v7296_v13, %v6384_v46  ;;  %v5920_v43 = vld [vmem:[%s7985_s10 + $0x840] sm:$0xf] }
  0xf3   : > { %v538_v63 = vld [vmem:[#allocation1 + $0x3] ss:$4 sm:$0xff]  ;;  %3753 = vmatpush.bf16.msrb.mxu0 %v5249_v59  ;;  %3763 = vmatpush.bf16.msrb.mxu1 %v5425_v54 }
  0xf4   : > { %540 = vst [vmem:[#allocation2 + $0x7] sm:$0x1] %v538_v63  ;;  %v7052_v59 = vld [vmem:[%s7985_s10 + $0x44c] sm:$0xf0]  ;;  %v5809_v63 = vor.u32 %v7152_v56, %v5808_v55  ;;  %v6368_v55 = vld [vmem:[%s7985_s10 + $0xbc0] sm:$0xf] }
  0xf5   : > { %544 = vst [vmem:[#allocation1] sm:$0xff] %v8019_v19  ;;  %v5409_v3 = vor.u32 %v7052_v59, %v5408_v58  ;;  %3789 = vmatpush.bf16.msrb.mxu3 %v5681_v60  ;;  %v7260_v54 = vld [vmem:[%s7985_s10 + $0xacc] sm:$0xf0]  ;;  %v6257_v60 = vor.u32 %v7264_v45, %v6256_v44  ;;  %v6048_v13 = vld [vmem:[%s7985_s10 + $0x940] sm:$0xf] }
  0xf6   : > { %v7292_v56 = vld [vmem:[%s7985_s10 + $0xbcc] sm:$0xf0]  ;;  %v6241_v8 = vor.u32 %v7260_v54, %v6240_v53  ;;  %v5904_v53 = vld [vmem:[%s7985_s10 + $0x820] sm:$0xf] }
  0xf7   : > { %3798 = vmatpush.bf16.msra.mxu0 %v5873_v10  ;;  %v5665_v10 = vor.u32 %v7116_v1, %v5664_v0  ;;  %3764 = vmatpush.bf16.msrb.mxu1 %v5409_v3  ;;  %v5985_v3 = vor.u32 %v7196_v48, %v5984_v47  ;;  %v7192_v7 = vld [vmem:[%s7985_s10 + $0x8ac] sm:$0xf0]  ;;  %v6369_v9 = vor.u32 %v7292_v56, %v6368_v55  ;;  %v6176_v48 = vld [vmem:[%s7985_s10 + $0xa40] sm:$0xf] }
  0xf8   : > { %v7284_v28 = vld [vmem:[%s7985_s10 + $0xb8c] sm:$0xf0] }
  0xf9   : > { %3790 = vmatpush.bf16.msrb.mxu3 %v5665_v10  ;;  %v6096_v10 = vld [vmem:[%s7985_s10 + $0x9a0] sm:$0xf]  ;;  %v7280_v40 = vld [vmem:[%s7985_s10 + $0xb6c] sm:$0xf0] }
  0xfa   : > { %v7180_v44 = vld [vmem:[%s7985_s10 + $0x84c] sm:$0xf0] }
  0xfb   : > { %3799 = vmatpush.bf16.msra.mxu0 %v5857_v25  ;;  %v7076_v25 = vld [vmem:[%s7985_s10 + $0x50c] sm:$0xf0]  ;;  %3765 = vmatpush.bf16.msrb.mxu1 %v5393_v17  ;;  %v5969_v17 = vor.u32 %v7192_v7, %v5968_v6  ;;  %v6288_v6 = vld [vmem:[%s7985_s10 + $0xb20] sm:$0xf] }
  0xfc   : > { %v546_v37 = vld [vmem:[#allocation1 + $0x1] ss:$4 sm:$0xff]  ;;  %v5505_v33 = vor.u32 %v7076_v25, %v5504_v24 }
  0xfd   : > { %548 = vst [vmem:[#allocation2 + $0x9] sm:$0x1] %v546_v37  ;;  %3791 = vmatpush.bf16.msrb.mxu3 %v5649_v23  ;;  %v587_v38 = vld [vmem:[#allocation2] sm:$0xff]  ;;  %v6080_v23 = vld [vmem:[%s7985_s10 + $0x980] sm:$0xf] }
  0xfe   : > { %549 = vst [vmem:[#allocation1] sm:$0xff] %v8019_v19  ;;  %v7220_v24 = vld [vmem:[%s7985_s10 + $0x98c] sm:$0xf0]  ;;  %v6208_v25 = vld [vmem:[%s7985_s10 + $0xa80] sm:$0xf] }
  0xff   : > { %3800 = vmatpush.bf16.msra.mxu0 %v5841_v5  ;;  %3766 = vmatpush.bf16.msrb.mxu1 %v5377_v29  ;;  %v6081_v30 = vor.u32 %v7220_v24, %v6080_v23  ;;  %v7212_v47 = vld [vmem:[%s7985_s10 + $0x94c] sm:$0xf0]  ;;  %v6640_v23 = vld [vmem:[%s7985_s10 + $0xde0] sm:$0xf] }
 0x100   : > { %v7176_v54 = vld [vmem:[%s7985_s10 + $0x82c] sm:$0xf0] }
 0x101   : > { %3792 = vmatpush.bf16.msrb.mxu3 %v5633_v34  ;;  %v6337_v34 = vor.u32 %v7284_v28, %v6336_v27  ;;  %v7272_v7 = vld [vmem:[%s7985_s10 + $0xb2c] sm:$0xf0] }
 0x102   : > { %v6289_v16 = vor.u32 %v7272_v7, %v6288_v6  ;;  %v7360_v24 = vld [vmem:[%s7985_s10 + $0xdec] sm:$0xf0]  ;;  %v6464_v6 = vld [vmem:[%s7985_s10 + $0xc80] sm:$0xf] }
 0x103   : > { %3801 = vmatpush.bf16.msra.mxu0 %v5825_v50  ;;  %v7392_v28 = vld [vmem:[%s7985_s10 + $0xeec] sm:$0xf0] }
 0x104   : > { %v7316_v7 = vld [vmem:[%s7985_s10 + $0xc8c] sm:$0xf0] }
 0x105   : > { %v551_v2 = vld [vmem:[#allocation1 + $0x2] ss:$4 sm:$0xff] }
 0x106   : > { %553 = vst [vmem:[#allocation2 + $0xa] sm:$0x1] %v551_v2 }
 0x107   : > { %554 = vst [vmem:[#allocation1] sm:$0xff] %v8019_v19  ;;  %3802 = vmatpush.bf16.msra.mxu0 %v5809_v63  ;;  %v5521_v19 = vor.u32 %v7080_v12, %v5520_v11  ;;  %v7224_v11 = vld [vmem:[%s7985_s10 + $0x9ac] sm:$0xf0]  ;;  %v6224_v12 = vld [vmem:[%s7985_s10 + $0xaa0] sm:$0xf] }
 0x108   : > { %v6097_v18 = vor.u32 %v7224_v11, %v6096_v10  ;;  %v7172_v11 = vld [vmem:[%s7985_s10 + $0x80c] sm:$0xf0] }
 0x109   : > { %3778 = vmatpush.bf16.msrb.mxu2 %v5521_v19  ;;  %v7188_v19 = vld [vmem:[%s7985_s10 + $0x88c] sm:$0xf0] }
 0x10a   : > { %v5953_v29 = vor.u32 %v7188_v19, %v5952_v20  ;;  %v6272_v20 = vld [vmem:[%s7985_s10 + $0xb00] sm:$0xf]  ;;  %v7268_v19 = vld [vmem:[%s7985_s10 + $0xb0c] sm:$0xf0] }
 0x10b   : > { %3803 = vmatpush.bf16.msra.mxu0 %v5793_v14  ;;  %v7256_v14 = vld [vmem:[%s7985_s10 + $0xaac] sm:$0xf0] }
 0x10c   : > { %v6225_v21 = vor.u32 %v7256_v14, %v6224_v12  ;;  %v6016_v12 = vld [vmem:[%s7985_s10 + $0x900] sm:$0xf]  ;;  %v7204_v14 = vld [vmem:[%s7985_s10 + $0x90c] sm:$0xf0] }
 0x10d   : > { %3779 = vmatpush.bf16.msrb.mxu2 %v5505_v33  ;;  %v6017_v27 = vor.u32 %v7204_v14, %v6016_v12  ;;  %v6720_v12 = vld [vmem:[%s7985_s10 + $0xe80] sm:$0xf]  ;;  %v7380_v14 = vld [vmem:[%s7985_s10 + $0xe8c] sm:$0xf0] }
 0x10e   : > { %v556_v32 = vld [vmem:[#allocation1 + $0x3] ss:$4 sm:$0xff] }
 0x10f   : > { %558 = vst [vmem:[#allocation2 + $0xb] sm:$0x1] %v556_v32  ;;  %3804 = vmatpush.bf16.msra.mxu0 %v5777_v26  ;;  %v7252_v26 = vld [vmem:[%s7985_s10 + $0xa8c] sm:$0xf0] }
 0x110   : > { %562 = vst [vmem:[#allocation1] sm:$0xff] %v8077_v39  ;;  %v7184_v32 = vld [vmem:[%s7985_s10 + $0x86c] sm:$0xf0]  ;;  %v6209_v33 = vor.u32 %v7252_v26, %v6208_v25  ;;  %v6768_v25 = vld [vmem:[%s7985_s10 + $0xee0] sm:$0xf] }
 0x111   : > { %v5937_v41 = vor.u32 %v7184_v32, %v5936_v31  ;;  %v6273_v32 = vor.u32 %v7268_v19, %v6272_v20  ;;  %v6448_v20 = vld [vmem:[%s7985_s10 + $0xc60] sm:$0xf]  ;;  %v7312_v19 = vld [vmem:[%s7985_s10 + $0xc6c] sm:$0xf0] }
 0x113   : > { %3805 = vmatpush.bf16.msra.mxu0 %v5761_v35  ;;  %v6064_v35 = vld [vmem:[%s7985_s10 + $0x960] sm:$0xf] }
 0x117   : > { %v564_v36 = vld [vmem:[#allocation1 + $0x1] ss:$4 sm:$0xff] }
 0x118   : > { %566 = vst [vmem:[#allocation2 + $0xd] sm:$0x1] %v564_v36  ;;  %v7216_v36 = vld [vmem:[%s7985_s10 + $0x96c] sm:$0xf0] }
 0x119   : > { %567 = vst [vmem:[#allocation1] sm:$0xff] %v8077_v39  ;;  %v6065_v42 = vor.u32 %v7216_v36, %v6064_v35  ;;  %v6496_v35 = vld [vmem:[%s7985_s10 + $0xcc0] sm:$0xf]  ;;  %v7324_v36 = vld [vmem:[%s7985_s10 + $0xccc] sm:$0xf0] }
 0x120   : > { %v569_v37 = vld [vmem:[#allocation1 + $0x2] ss:$4 sm:$0xff] }
 0x121   : > { %571 = vst [vmem:[#allocation2 + $0xe] sm:$0x1] %v569_v37  ;;  %v6192_v37 = vld [vmem:[%s7985_s10 + $0xa60] sm:$0xf] }
 0x122   : > { %572 = vst [vmem:[#allocation1] sm:$0xff] %v8077_v39  ;;  %v6112_v39 = vld [vmem:[%s7985_s10 + $0x9c0] sm:$0xf] }
 0x123   : > { %v6113_v4 = vor.u32 %v7228_v49, %v6112_v39  ;;  %v7244_v39 = vld [vmem:[%s7985_s10 + $0xa4c] sm:$0xf0]  ;;  %v6304_v49 = vld [vmem:[%s7985_s10 + $0xb40] sm:$0xf] }
 0x124   : > { %v6177_v55 = vor.u32 %v7244_v39, %v6176_v48  ;;  %v7352_v39 = vld [vmem:[%s7985_s10 + $0xdac] sm:$0xf0] }
 0x129   : > { %v574_v5 = vld [vmem:[#allocation1 + $0x3] ss:$4 sm:$0xff] }
 0x12a   : > { %576 = vst [vmem:[#allocation2 + $0xf] sm:$0x1] %v574_v5  ;;  %v7248_v5 = vld [vmem:[%s7985_s10 + $0xa6c] sm:$0xf0] }
 0x12b   : > { %1112 = vst [vmem:[#allocation1] ss:$9 sm:$0xff] %v587_v38  ;;  %v6320_v38 = vld [vmem:[%s7985_s10 + $0xb60] sm:$0xf]  ;;  %v6193_v45 = vor.u32 %v7248_v5, %v6192_v37  ;;  %v6769_v37 = vor.u32 %v7392_v28, %v6768_v25  ;;  %v7408_v28 = vld [vmem:[%s7985_s10 + $0xf6c] sm:$0xf0] }
 0x12c   : > { %v6321_v46 = vor.u32 %v7280_v40, %v6320_v38  ;;  %v6624_v38 = vld [vmem:[%s7985_s10 + $0xdc0] sm:$0xf]  ;;  %v7356_v40 = vld [vmem:[%s7985_s10 + $0xdcc] sm:$0xf0] }
 0x12d   : > { %v6625_v48 = vor.u32 %v7356_v40, %v6624_v38  ;;  %v6704_v25 = vld [vmem:[%s7985_s10 + $0xe60] sm:$0xf]  ;;  %v7404_v40 = vld [vmem:[%s7985_s10 + $0xf4c] sm:$0xf0] }
 0x12e   : > { %v6816_v38 = vld [vmem:[%s7985_s10 + $0xf40] sm:$0xf] }
 0x131   : > { %v588_v50 = vld [vmem:[#allocation2 + $0x8] sm:$0xff] }
 0x132   : > { %v8179_v57 = vld [vmem:[#allocation1] sm:$0xff]  ;;  %v8181_v58 = vld [vmem:[#allocation1 + $0x9] sm:$0xff]  ;;  %v8183_v59 = vld [vmem:[#allocation1 + $0x12] sm:$0xff] }
 0x133   : > { %3715 = vmatmul.bf16.vlgmr.msra.gmra.mxu1 %v8179_v57  ;;  %3728 = vmatmul.bf16.vlgmr.msra.gmra.mxu2 %v8181_v58  ;;  %v8187_v62 = vld [vmem:[#allocation1 + $0x1b] sm:$0xff]  ;;  %v8189_v63 = vld [vmem:[#allocation1 + $0x24] sm:$0xff]  ;;  %v8191_v0 = vld [vmem:[#allocation1 + $0x2d] sm:$0xff] }
 0x134   : > { %3741 = vmatmul.bf16.vlgmr.msra.gmra.mxu3 %v8183_v59  ;;  %3754 = vmatmul.bf16.vlgmr.msrb.gmra.mxu0 %v8187_v62  ;;  %v8195_v1 = vld [vmem:[#allocation1 + $0x36] sm:$0xff]  ;;  %v8197_v2 = vld [vmem:[#allocation1 + $0x3f] sm:$0xff] }
 0x135   : > { %3811 = vmatpush.bf16.msra.mxu1 %v6001_v51  ;;  %3824 = vmatpush.bf16.msra.mxu2 %v6129_v52  ;;  %1122 = vst [vmem:[#allocation1] ss:$9 sm:$0xff] %v588_v50  ;;  %v7276_v50 = vld [vmem:[%s7985_s10 + $0xb4c] sm:$0xf0]  ;;  %v5921_v51 = vor.u32 %v7180_v44, %v5920_v43  ;;  %v6049_v52 = vor.u32 %v7212_v47, %v6048_v13  ;;  %v6880_v43 = vld [vmem:[%s7985_s10 + $0xfc0] sm:$0xf] }
 0x136   : > { %3837 = vmatpush.bf16.msra.mxu3 %v6257_v60  ;;  %3850 = vmatpush.bf16.msrb.mxu0 %v6385_v61  ;;  %v6305_v56 = vor.u32 %v7276_v50, %v6304_v49  ;;  %v6032_v60 = vld [vmem:[%s7985_s10 + $0x920] sm:$0xf]  ;;  %v7208_v61 = vld [vmem:[%s7985_s10 + $0x92c] sm:$0xf0]  ;;  %v6497_v47 = vor.u32 %v7324_v36, %v6496_v35 }
 0x137   : > { %v6033_v10 = vor.u32 %v7208_v61, %v6032_v60  ;;  %v7420_v44 = vld [vmem:[%s7985_s10 + $0xfcc] sm:$0xf0]  ;;  %v6608_v13 = vld [vmem:[%s7985_s10 + $0xda0] sm:$0xf] }
 0x138   : > { %v6736_v49 = vld [vmem:[%s7985_s10 + $0xea0] sm:$0xf]  ;;  %v7384_v50 = vld [vmem:[%s7985_s10 + $0xeac] sm:$0xf0] }
 0x139   : > { %3812 = vmatpush.bf16.msra.mxu1 %v5985_v3  ;;  %3825 = vmatpush.bf16.msra.mxu2 %v6113_v4  ;;  %v6160_v3 = vld [vmem:[%s7985_s10 + $0xa20] sm:$0xf]  ;;  %v7240_v4 = vld [vmem:[%s7985_s10 + $0xa2c] sm:$0xf0] }
 0x13a   : > { %3838 = vmatpush.bf16.msra.mxu3 %v6241_v8  ;;  %3851 = vmatpush.bf16.msrb.mxu0 %v6369_v9  ;;  %v5888_v8 = vld [vmem:[%s7985_s10 + $0x800] sm:$0xf]  ;;  %v5905_v9 = vor.u32 %v7176_v54, %v5904_v53  ;;  %v6161_v15 = vor.u32 %v7240_v4, %v6160_v3  ;;  %v6881_v54 = vor.u32 %v7420_v44, %v6880_v43  ;;  %v7416_v61 = vld [vmem:[%s7985_s10 + $0xfac] sm:$0xf0] }
 0x13b   : > { %v5889_v26 = vor.u32 %v7172_v11, %v5888_v8  ;;  %v6609_v4 = vor.u32 %v7352_v39, %v6608_v13  ;;  %v6737_v8 = vor.u32 %v7384_v50, %v6736_v49  ;;  %v7348_v11 = vld [vmem:[%s7985_s10 + $0xd8c] sm:$0xf0]  ;;  %v6560_v35 = vld [vmem:[%s7985_s10 + $0xd40] sm:$0xf] }
 0x13c   : > { %v1126_v60 = vld [vmem:[#allocation1 + $0x1b] sm:$0xff]  ;;  %v7340_v36 = vld [vmem:[%s7985_s10 + $0xd4c] sm:$0xf0] }
 0x13d   : > { %3813 = vmatpush.bf16.msra.mxu1 %v5969_v17  ;;  %3826 = vmatpush.bf16.msra.mxu2 %v6097_v18  ;;  %v6144_v17 = vld [vmem:[%s7985_s10 + $0xa00] sm:$0xf]  ;;  %v7236_v18 = vld [vmem:[%s7985_s10 + $0xa0c] sm:$0xf0] }
 0x13e   : > { %3839 = vmatpush.bf16.msra.mxu3 %v6225_v21  ;;  %3852 = vmatpush.bf16.msrb.mxu0 %v6353_v22  ;;  %v6512_v21 = vld [vmem:[%s7985_s10 + $0xce0] sm:$0xf]  ;;  %v7328_v22 = vld [vmem:[%s7985_s10 + $0xcec] sm:$0xf0]  ;;  %v6145_v31 = vor.u32 %v7236_v18, %v6144_v17  ;;  %v6465_v17 = vor.u32 %v7316_v7, %v6464_v6 }
 0x13f   : > { %v6416_v43 = vld [vmem:[%s7985_s10 + $0xc20] sm:$0xf]  ;;  %v7304_v44 = vld [vmem:[%s7985_s10 + $0xc2c] sm:$0xf0] }
 0x140   : > { %v6544_v13 = vld [vmem:[%s7985_s10 + $0xd20] sm:$0xf]  ;;  %v7368_v39 = vld [vmem:[%s7985_s10 + $0xe2c] sm:$0xf0] }
 0x141   : > { %3814 = vmatpush.bf16.msra.mxu1 %v5953_v29  ;;  %3827 = vmatpush.bf16.msra.mxu2 %v6081_v30  ;;  %v6896_v29 = vld [vmem:[%s7985_s10 + $0xfe0] sm:$0xf]  ;;  %v7424_v30 = vld [vmem:[%s7985_s10 + $0xfec] sm:$0xf0] }
 0x142   : > { %3840 = vmatpush.bf16.msra.mxu3 %v6209_v33  ;;  %3853 = vmatpush.bf16.msrb.mxu0 %v6337_v34  ;;  %v6513_v33 = vor.u32 %v7328_v22, %v6512_v21  ;;  %v6641_v34 = vor.u32 %v7360_v24, %v6640_v23  ;;  %v6897_v5 = vor.u32 %v7424_v30, %v6896_v29  ;;  %v6576_v23 = vld [vmem:[%s7985_s10 + $0xd60] sm:$0xf]  ;;  %v7344_v24 = vld [vmem:[%s7985_s10 + $0xd6c] sm:$0xf0] }
 0x143   : > { %3767 = vmatmul.bf16.vlgmr.msrb.gmra.mxu1 %v8189_v63  ;;  %3780 = vmatmul.bf16.vlgmr.msrb.gmra.mxu2 %v8191_v0  ;;  %v6721_v21 = vor.u32 %v7380_v14, %v6720_v12  ;;  %v6449_v29 = vor.u32 %v7312_v19, %v6448_v20  ;;  %v6577_v30 = vor.u32 %v7344_v24, %v6576_v23  ;;  %v6800_v49 = vld [vmem:[%s7985_s10 + $0xf20] sm:$0xf]  ;;  %v7400_v50 = vld [vmem:[%s7985_s10 + $0xf2c] sm:$0xf0]  ;;  %v7006_v12 = vld [vmem:[%s7985_s10 + $0x2e4] sm:$0xf] }
 0x144   : > { %3793 = vmatmul.bf16.vlgmr.msrb.gmra.mxu3 %v8195_v1  ;;  %3806 = vmatmul.bf16.vlgmr.msra.gmra.mxu0 %v8197_v2  ;;  %v6784_v6 = vld [vmem:[%s7985_s10 + $0xf00] sm:$0xf]  ;;  %v7396_v7 = vld [vmem:[%s7985_s10 + $0xf0c] sm:$0xf0]  ;;  %v6938_v23 = vld [vmem:[%s7985_s10 + $0xc4] sm:$0xf] }
 0x145   : > { %3815 = vmatpush.bf16.msra.mxu1 %v5937_v41  ;;  %3828 = vmatpush.bf16.msra.mxu2 %v6065_v42  ;;  %v6752_v41 = vld [vmem:[%s7985_s10 + $0xec0] sm:$0xf]  ;;  %v7388_v42 = vld [vmem:[%s7985_s10 + $0xecc] sm:$0xf0]  ;;  %v6785_v19 = vor.u32 %v7396_v7, %v6784_v6  ;;  %v4962_v24 = vld [vmem:[%s7985_s10 + $0xd0] sm:$0xf0] }
 0x146   : > { %3841 = vmatpush.bf16.msra.mxu3 %v6193_v45  ;;  %3854 = vmatpush.bf16.msrb.mxu0 %v6321_v46  ;;  %v6480_v45 = vld [vmem:[%s7985_s10 + $0xca0] sm:$0xf]  ;;  %v7320_v46 = vld [vmem:[%s7985_s10 + $0xcac] sm:$0xf0]  ;;  %v6753_v53 = vor.u32 %v7388_v42, %v6752_v41  ;;  %v6561_v42 = vor.u32 %v7340_v36, %v6560_v35  ;;  %v1129_v35 = vld [vmem:[#allocation1 + $0x36] sm:$0xff] }
 0x147   : > { %v6481_v3 = vor.u32 %v7320_v46, %v6480_v45  ;;  %v6817_v46 = vor.u32 %v7404_v40, %v6816_v38  ;;  %v1130_v36 = vld [vmem:[#allocation1 + $0x3f] sm:$0xff]  ;;  %v4946_v40 = vld [vmem:[%s7985_s10 + $0xb0] sm:$0xf0] }
 0x148   : > { %v6934_v38 = vld [vmem:[%s7985_s10 + $0xa4] sm:$0xf]  ;;  %v4914_v7 = vld [vmem:[%s7985_s10 + $0x70] sm:$0xf0] }
 0x149   : > { %3816 = vmatpush.bf16.msra.mxu1 %v5921_v51  ;;  %3829 = vmatpush.bf16.msra.mxu2 %v6049_v52  ;;  %v1123_v51 = vld [vmem:[#allocation1] sm:$0xff]  ;;  %v1124_v52 = vld [vmem:[#allocation1 + $0x9] sm:$0xff] }
 0x14a   : > { %3842 = vmatpush.bf16.msra.mxu3 %v6177_v55  ;;  %3855 = vmatpush.bf16.msrb.mxu0 %v6305_v56  ;;  %v6864_v55 = vld [vmem:[%s7985_s10 + $0xfa0] sm:$0xf]  ;;  %v1125_v56 = vld [vmem:[#allocation1 + $0x12] sm:$0xff]  ;;  %v6926_v6 = vld [vmem:[%s7985_s10 + $0x64] sm:$0xf] }
 0x14d   : > { %3817 = vmatpush.bf16.msra.mxu1 %v5905_v9  ;;  %3830 = vmatpush.bf16.msra.mxu2 %v6033_v10  ;;  %v6865_v9 = vor.u32 %v7416_v61, %v6864_v55  ;;  %v6592_v10 = vld [vmem:[%s7985_s10 + $0xd80] sm:$0xf]  ;;  %v6801_v61 = vor.u32 %v7400_v50, %v6800_v49  ;;  %v6930_v49 = vld [vmem:[%s7985_s10 + $0x84] sm:$0xf]  ;;  %v4930_v50 = vld [vmem:[%s7985_s10 + $0x90] sm:$0xf0] }
 0x14e   : > { %3843 = vmatpush.bf16.msra.mxu3 %v6161_v15  ;;  %3856 = vmatpush.bf16.msrb.mxu0 %v6289_v16  ;;  %v6848_v15 = vld [vmem:[%s7985_s10 + $0xf80] sm:$0xf]  ;;  %v7412_v16 = vld [vmem:[%s7985_s10 + $0xf8c] sm:$0xf0]  ;;  %v6593_v18 = vor.u32 %v7348_v11, %v6592_v10  ;;  %v6974_v10 = vld [vmem:[%s7985_s10 + $0x1e4] sm:$0xf] }
 0x14f   : > { %v6849_v22 = vor.u32 %v7412_v16, %v6848_v15  ;;  %v6528_v55 = vld [vmem:[%s7985_s10 + $0xd00] sm:$0xf]  ;;  %v5106_v11 = vld [vmem:[%s7985_s10 + $0x1f0] sm:$0xf0] }
 0x150   : > { %v5234_v16 = vld [vmem:[%s7985_s10 + $0x2f0] sm:$0xf0] }
 0x151   : > { %3818 = vmatpush.bf16.msra.mxu1 %v5889_v26  ;;  %3831 = vmatpush.bf16.msra.mxu2 %v6017_v27  ;;  %v7376_v26 = vld [vmem:[%s7985_s10 + $0xe6c] sm:$0xf0]  ;;  %v6832_v27 = vld [vmem:[%s7985_s10 + $0xf60] sm:$0xf] }
 0x152   : > { %3844 = vmatpush.bf16.msra.mxu3 %v6145_v31  ;;  %3857 = vmatpush.bf16.msrb.mxu0 %v6273_v32  ;;  %v6432_v31 = vld [vmem:[%s7985_s10 + $0xc40] sm:$0xf]  ;;  %v7308_v32 = vld [vmem:[%s7985_s10 + $0xc4c] sm:$0xf0] }
 0x153   : > { %v6433_v41 = vor.u32 %v7308_v32, %v6432_v31  ;;  %v7034_v31 = vld [vmem:[%s7985_s10 + $0x3c4] sm:$0xf]  ;;  %v5346_v32 = vld [vmem:[%s7985_s10 + $0x3d0] sm:$0xf0] }
 0x154   : > { %3819 = vmatmul.bf16.vlgmr.msra.gmra.mxu1 %v1123_v51  ;;  %3832 = vmatmul.bf16.vlgmr.msra.gmra.mxu2 %v1124_v52  ;;  %v6400_v51 = vld [vmem:[%s7985_s10 + $0xc00] sm:$0xf]  ;;  %v6417_v52 = vor.u32 %v7304_v44, %v6416_v43  ;;  %v6966_v43 = vld [vmem:[%s7985_s10 + $0x1a4] sm:$0xf]  ;;  %v5074_v44 = vld [vmem:[%s7985_s10 + $0x1b0] sm:$0xf0] }
 0x155   : > { %3863 = vmatpush.bf16.msrb.mxu1 %v6513_v33  ;;  %3876 = vmatpush.bf16.msrb.mxu2 %v6641_v34  ;;  %v6705_v33 = vor.u32 %v7376_v26, %v6704_v25  ;;  %v6833_v34 = vor.u32 %v7408_v28, %v6832_v27  ;;  %v5237_v25 = vor.u32 %v7006_v12, %v5234_v16  ;;  %v6970_v27 = vld [vmem:[%s7985_s10 + $0x1c4] sm:$0xf]  ;;  %v5090_v28 = vld [vmem:[%s7985_s10 + $0x1d0] sm:$0xf0] }
 0x156   : > { %3889 = vmatpush.bf16.msrb.mxu3 %v6769_v37  ;;  %3902 = vmatpush.bf16.msra.mxu0 %v6897_v5  ;;  %v6688_v37 = vld [vmem:[%s7985_s10 + $0xe40] sm:$0xf]  ;;  %v7372_v5 = vld [vmem:[%s7985_s10 + $0xe4c] sm:$0xf0]  ;;  %v6990_v12 = vld [vmem:[%s7985_s10 + $0x264] sm:$0xf] }
 0x157   : > { %3845 = vmatmul.bf16.vlgmr.msra.gmra.mxu3 %v1125_v56  ;;  %3858 = vmatmul.bf16.vlgmr.msrb.gmra.mxu0 %v1126_v60  ;;  %v6689_v45 = vor.u32 %v7372_v5, %v6688_v37  ;;  %v7332_v56 = vld [vmem:[%s7985_s10 + $0xd0c] sm:$0xf0]  ;;  %v4965_v37 = vor.u32 %v6938_v23, %v4962_v24  ;;  %v5093_v5 = vor.u32 %v6970_v27, %v5090_v28  ;;  %v5298_v16 = vld [vmem:[%s7985_s10 + $0x370] sm:$0xf0]  ;;  %v6954_v23 = vld [vmem:[%s7985_s10 + $0x144] sm:$0xf] }
 0x158   : > { %v6529_v15 = vor.u32 %v7332_v56, %v6528_v55  ;;  %v6994_v55 = vld [vmem:[%s7985_s10 + $0x284] sm:$0xf]  ;;  %v5186_v56 = vld [vmem:[%s7985_s10 + $0x290] sm:$0xf0] }
 0x159   : > { %3864 = vmatpush.bf16.msrb.mxu1 %v6497_v47  ;;  %3877 = vmatpush.bf16.msrb.mxu2 %v6625_v48  ;;  %v7336_v47 = vld [vmem:[%s7985_s10 + $0xd2c] sm:$0xf0]  ;;  %v6672_v48 = vld [vmem:[%s7985_s10 + $0xe20] sm:$0xf]  ;;  %v5026_v24 = vld [vmem:[%s7985_s10 + $0x150] sm:$0xf0] }
 0x15a   : > { %3890 = vmatpush.bf16.msrb.mxu3 %v6753_v53  ;;  %3903 = vmatpush.bf16.msra.mxu0 %v6881_v54  ;;  %v6545_v53 = vor.u32 %v7336_v47, %v6544_v13  ;;  %v7300_v54 = vld [vmem:[%s7985_s10 + $0xc0c] sm:$0xf0]  ;;  %v6673_v60 = vor.u32 %v7368_v39, %v6672_v48  ;;  %v7030_v13 = vld [vmem:[%s7985_s10 + $0x3a4] sm:$0xf]  ;;  %v5330_v47 = vld [vmem:[%s7985_s10 + $0x3b0] sm:$0xf0]  ;;  %v4949_v48 = vor.u32 %v6934_v38, %v4946_v40 }
 0x15b   : > { %v6401_v14 = vor.u32 %v7300_v54, %v6400_v51  ;;  %v5077_v39 = vor.u32 %v6966_v43, %v5074_v44  ;;  %v5058_v54 = vld [vmem:[%s7985_s10 + $0x190] sm:$0xf0]  ;;  %v7018_v27 = vld [vmem:[%s7985_s10 + $0x344] sm:$0xf] }
 0x15c   : > { %v5282_v28 = vld [vmem:[%s7985_s10 + $0x350] sm:$0xf0]  ;;  %v7014_v38 = vld [vmem:[%s7985_s10 + $0x324] sm:$0xf] }
 0x15d   : > { %3865 = vmatpush.bf16.msrb.mxu1 %v6481_v3  ;;  %3878 = vmatpush.bf16.msrb.mxu2 %v6609_v4  ;;  %v6656_v3 = vld [vmem:[%s7985_s10 + $0xe00] sm:$0xf]  ;;  %v7364_v4 = vld [vmem:[%s7985_s10 + $0xe0c] sm:$0xf0]  ;;  %v5266_v40 = vld [vmem:[%s7985_s10 + $0x330] sm:$0xf0] }
 0x15e   : > { %3891 = vmatpush.bf16.msrb.mxu3 %v6737_v8  ;;  %3904 = vmatpush.bf16.msra.mxu0 %v6865_v9  ;;  %v6942_v8 = vld [vmem:[%s7985_s10 + $0xe4] sm:$0xf]  ;;  %v4978_v9 = vld [vmem:[%s7985_s10 + $0xf0] sm:$0xf0]  ;;  %v6657_v20 = vor.u32 %v7364_v4, %v6656_v3  ;;  %v4933_v3 = vor.u32 %v6930_v49, %v4930_v50 }
 0x15f   : > { %v4866_v44 = vld [vmem:[%s7985_s10 + $0x10] sm:$0xf0]  ;;  %v7010_v49 = vld [vmem:[%s7985_s10 + $0x304] sm:$0xf] }
 0x160   : > { %v5250_v50 = vld [vmem:[%s7985_s10 + $0x310] sm:$0xf0] }
 0x161   : > { %3866 = vmatpush.bf16.msrb.mxu1 %v6465_v17  ;;  %3879 = vmatpush.bf16.msrb.mxu2 %v6593_v18  ;;  %v7038_v17 = vld [vmem:[%s7985_s10 + $0x3e4] sm:$0xf]  ;;  %v5362_v18 = vld [vmem:[%s7985_s10 + $0x3f0] sm:$0xf0] }
 0x162   : > { %3892 = vmatpush.bf16.msrb.mxu3 %v6721_v21  ;;  %3905 = vmatpush.bf16.msra.mxu0 %v6849_v22  ;;  %v4981_v21 = vor.u32 %v6942_v8, %v4978_v9  ;;  %v5109_v22 = vor.u32 %v6974_v10, %v5106_v11  ;;  %v5365_v26 = vor.u32 %v7038_v17, %v5362_v18  ;;  %v6958_v10 = vld [vmem:[%s7985_s10 + $0x164] sm:$0xf]  ;;  %v5042_v11 = vld [vmem:[%s7985_s10 + $0x170] sm:$0xf0] }
 0x163   : > { %v5189_v8 = vor.u32 %v6994_v55, %v5186_v56  ;;  %v4917_v17 = vor.u32 %v6926_v6, %v4914_v7  ;;  %v5045_v18 = vor.u32 %v6958_v10, %v5042_v11  ;;  %v7134_v55 = vld [vmem:[%s7985_s10 + $0x6e4] sm:$0xf]  ;;  %v5253_v7 = vor.u32 %v7010_v49, %v5250_v50  ;;  %v5474_v11 = vld [vmem:[%s7985_s10 + $0x4d0] sm:$0xf0] }
 0x164   : > { %v7066_v10 = vld [vmem:[%s7985_s10 + $0x4c4] sm:$0xf]  ;;  %v5554_v50 = vld [vmem:[%s7985_s10 + $0x570] sm:$0xf0] }
 0x165   : > { %3867 = vmatpush.bf16.msrb.mxu1 %v6449_v29  ;;  %3880 = vmatpush.bf16.msrb.mxu2 %v6577_v30  ;;  %v7002_v29 = vld [vmem:[%s7985_s10 + $0x2c4] sm:$0xf]  ;;  %v5218_v30 = vld [vmem:[%s7985_s10 + $0x2d0] sm:$0xf0] }
 0x166   : > { %3893 = vmatpush.bf16.msrb.mxu3 %v6705_v33  ;;  %3906 = vmatpush.bf16.msra.mxu0 %v6833_v34  ;;  %v1127_v33 = vld [vmem:[#allocation1 + $0x24] sm:$0xff]  ;;  %v1128_v34 = vld [vmem:[#allocation1 + $0x2d] sm:$0xff] }
 0x167   : > { %v7086_v49 = vld [vmem:[%s7985_s10 + $0x564] sm:$0xf] }
 0x169   : > { %3868 = vmatpush.bf16.msrb.mxu1 %v6433_v41  ;;  %3881 = vmatpush.bf16.msrb.mxu2 %v6561_v42  ;;  %v5221_v41 = vor.u32 %v7002_v29, %v5218_v30  ;;  %v5349_v42 = vor.u32 %v7034_v31, %v5346_v32  ;;  %v5029_v30 = vor.u32 %v6954_v23, %v5026_v24  ;;  %v6918_v31 = vld [vmem:[%s7985_s10 + $0x24] sm:$0xf]  ;;  %v4882_v32 = vld [vmem:[%s7985_s10 + $0x30] sm:$0xf0] }
 0x16a   : > { %3894 = vmatpush.bf16.msrb.mxu3 %v6689_v45  ;;  %3907 = vmatpush.bf16.msra.mxu0 %v6817_v46  ;;  %v6998_v45 = vld [vmem:[%s7985_s10 + $0x2a4] sm:$0xf]  ;;  %v5202_v46 = vld [vmem:[%s7985_s10 + $0x2b0] sm:$0xf0] }
 0x16b   : > { %v5205_v51 = vor.u32 %v6998_v45, %v5202_v46  ;;  %v6946_v45 = vld [vmem:[%s7985_s10 + $0x104] sm:$0xf]  ;;  %v4994_v46 = vld [vmem:[%s7985_s10 + $0x110] sm:$0xf0] }
 0x16c   : > { %v7062_v23 = vld [vmem:[%s7985_s10 + $0x4a4] sm:$0xf]  ;;  %v5458_v24 = vld [vmem:[%s7985_s10 + $0x4b0] sm:$0xf0] }
 0x16d   : > { %3869 = vmatpush.bf16.msrb.mxu1 %v6417_v52  ;;  %3882 = vmatpush.bf16.msrb.mxu2 %v6545_v53  ;;  %v5333_v52 = vor.u32 %v7030_v13, %v5330_v47  ;;  %v6962_v53 = vld [vmem:[%s7985_s10 + $0x184] sm:$0xf]  ;;  %v5269_v47 = vor.u32 %v7014_v38, %v5266_v40  ;;  %v5570_v40 = vld [vmem:[%s7985_s10 + $0x590] sm:$0xf0] }
 0x16e   : > { %3895 = vmatpush.bf16.msrb.mxu3 %v6673_v60  ;;  %3908 = vmatpush.bf16.msra.mxu0 %v6801_v61  ;;  %v7026_v60 = vld [vmem:[%s7985_s10 + $0x384] sm:$0xf]  ;;  %v5314_v61 = vld [vmem:[%s7985_s10 + $0x390] sm:$0xf0]  ;;  %v5061_v4 = vor.u32 %v6962_v53, %v5058_v54 }
 0x16f   : > { %v5317_v9 = vor.u32 %v7026_v60, %v5314_v61  ;;  %v7102_v53 = vld [vmem:[%s7985_s10 + $0x5e4] sm:$0xf]  ;;  %v5618_v54 = vld [vmem:[%s7985_s10 + $0x5f0] sm:$0xf0]  ;;  %v4997_v60 = vor.u32 %v6946_v45, %v4994_v46 }
 0x170   : > { %v5746_v61 = vld [vmem:[%s7985_s10 + $0x6f0] sm:$0xf0]  ;;  %v7090_v38 = vld [vmem:[%s7985_s10 + $0x584] sm:$0xf] }
 0x171   : > { %3870 = vmatpush.bf16.msrb.mxu1 %v6401_v14  ;;  %3883 = vmatpush.bf16.msrb.mxu2 %v6529_v15  ;;  %v5170_v14 = vld [vmem:[%s7985_s10 + $0x270] sm:$0xf0]  ;;  %v7022_v15 = vld [vmem:[%s7985_s10 + $0x364] sm:$0xf]  ;;  %v5573_v46 = vor.u32 %v7090_v38, %v5570_v40 }
 0x172   : > { %3896 = vmatpush.bf16.msrb.mxu3 %v6657_v20  ;;  %3909 = vmatpush.bf16.msra.mxu0 %v6785_v19  ;;  %v6922_v20 = vld [vmem:[%s7985_s10 + $0x44] sm:$0xf]  ;;  %v4898_v19 = vld [vmem:[%s7985_s10 + $0x50] sm:$0xf0] }
 0x173   : > { %v4901_v29 = vor.u32 %v6922_v20, %v4898_v19  ;;  %v7162_v20 = vld [vmem:[%s7985_s10 + $0x7c4] sm:$0xf]  ;;  %v5858_v19 = vld [vmem:[%s7985_s10 + $0x7d0] sm:$0xf0] }
 0x174   : > { %3871 = vmatmul.bf16.vlgmr.msrb.gmra.mxu1 %v1127_v33  ;;  %3884 = vmatmul.bf16.vlgmr.msrb.gmra.mxu2 %v1128_v34  ;;  %v5285_v34 = vor.u32 %v7018_v27, %v5282_v28  ;;  %v7094_v27 = vld [vmem:[%s7985_s10 + $0x5a4] sm:$0xf]  ;;  %v5586_v28 = vld [vmem:[%s7985_s10 + $0x5b0] sm:$0xf0] }
 0x175   : > { %3915 = vmatpush.bf16.msra.mxu1 %v4981_v21  ;;  %3928 = vmatpush.bf16.msra.mxu2 %v5109_v22  ;;  %v5173_v21 = vor.u32 %v6990_v12, %v5170_v14  ;;  %v5301_v22 = vor.u32 %v7022_v15, %v5298_v16  ;;  %v5749_v12 = vor.u32 %v7134_v55, %v5746_v61  ;;  %v7098_v15 = vld [vmem:[%s7985_s10 + $0x5c4] sm:$0xf]  ;;  %v5602_v16 = vld [vmem:[%s7985_s10 + $0x5d0] sm:$0xf0] }
 0x176   : > { %3941 = vmatpush.bf16.msra.mxu3 %v5237_v25  ;;  %3954 = vmatpush.bf16.msrb.mxu0 %v5365_v26  ;;  %v6986_v25 = vld [vmem:[%s7985_s10 + $0x244] sm:$0xf]  ;;  %v5154_v26 = vld [vmem:[%s7985_s10 + $0x250] sm:$0xf0] }
 0x177   : > { %3897 = vmatmul.bf16.vlgmr.msrb.gmra.mxu3 %v1129_v35  ;;  %3910 = vmatmul.bf16.vlgmr.msra.gmra.mxu0 %v1130_v36  ;;  %v5157_v33 = vor.u32 %v6986_v25, %v5154_v26  ;;  %v6950_v35 = vld [vmem:[%s7985_s10 + $0x124] sm:$0xf]  ;;  %v5010_v36 = vld [vmem:[%s7985_s10 + $0x130] sm:$0xf0]  ;;  %v5861_v26 = vor.u32 %v7162_v20, %v5858_v19 }
 0x178   : > { %v5013_v43 = vor.u32 %v6950_v35, %v5010_v36  ;;  %v7058_v35 = vld [vmem:[%s7985_s10 + $0x484] sm:$0xf]  ;;  %v5442_v36 = vld [vmem:[%s7985_s10 + $0x490] sm:$0xf0] }
 0x179   : > { %3916 = vmatpush.bf16.msra.mxu1 %v4965_v37  ;;  %3929 = vmatpush.bf16.msra.mxu2 %v5093_v5  ;;  %v6982_v37 = vld [vmem:[%s7985_s10 + $0x224] sm:$0xf]  ;;  %v5138_v5 = vld [vmem:[%s7985_s10 + $0x230] sm:$0xf0]  ;;  %v5445_v45 = vor.u32 %v7058_v35, %v5442_v36 }
 0x17a   : > { %3942 = vmatpush.bf16.msra.mxu3 %v5221_v41  ;;  %3955 = vmatpush.bf16.msrb.mxu0 %v5349_v42  ;;  %v6914_v41 = vld [vmem:[%s7985_s10 + $0x4] sm:$0xf]  ;;  %v4885_v42 = vor.u32 %v6918_v31, %v4882_v32  ;;  %v5141_v13 = vor.u32 %v6982_v37, %v5138_v5  ;;  %v5842_v32 = vld [vmem:[%s7985_s10 + $0x7b0] sm:$0xf0] }
 0x17b   : > { %v4869_v56 = vor.u32 %v6914_v41, %v4866_v44  ;;  %v7158_v31 = vld [vmem:[%s7985_s10 + $0x7a4] sm:$0xf]  ;;  %v5826_v44 = vld [vmem:[%s7985_s10 + $0x790] sm:$0xf0] }
 0x17c   : > { %v5845_v5 = vor.u32 %v7158_v31, %v5842_v32  ;;  %v7122_v41 = vld [vmem:[%s7985_s10 + $0x684] sm:$0xf]  ;;  %v5410_v61 = vld [vmem:[%s7985_s10 + $0x450] sm:$0xf0] }
 0x17d   : > { %3917 = vmatpush.bf16.msra.mxu1 %v4949_v48  ;;  %3930 = vmatpush.bf16.msra.mxu2 %v5077_v39  ;;  %v6978_v48 = vld [vmem:[%s7985_s10 + $0x204] sm:$0xf]  ;;  %v5122_v39 = vld [vmem:[%s7985_s10 + $0x210] sm:$0xf0] }
 0x17e   : > { %3943 = vmatpush.bf16.msra.mxu3 %v5205_v51  ;;  %3956 = vmatpush.bf16.msrb.mxu0 %v5333_v52  ;;  %v7070_v51 = vld [vmem:[%s7985_s10 + $0x4e4] sm:$0xf]  ;;  %v5490_v52 = vld [vmem:[%s7985_s10 + $0x4f0] sm:$0xf0]  ;;  %v5125_v6 = vor.u32 %v6978_v48, %v5122_v39 }
 0x17f   : > { %v7078_v20 = vld [vmem:[%s7985_s10 + $0x524] sm:$0xf]  ;;  %v5522_v19 = vld [vmem:[%s7985_s10 + $0x530] sm:$0xf0] }
 0x180   : > { %v7138_v35 = vld [vmem:[%s7985_s10 + $0x704] sm:$0xf]  ;;  %v5762_v36 = vld [vmem:[%s7985_s10 + $0x710] sm:$0xf0] }
 0x181   : > { %3918 = vmatpush.bf16.msra.mxu1 %v4933_v3  ;;  %3931 = vmatpush.bf16.msra.mxu2 %v5061_v4  ;;  %v7166_v3 = vld [vmem:[%s7985_s10 + $0x7e4] sm:$0xf]  ;;  %v5874_v4 = vld [vmem:[%s7985_s10 + $0x7f0] sm:$0xf0] }
 0x182   : > { %3944 = vmatpush.bf16.msra.mxu3 %v5189_v8  ;;  %3957 = vmatpush.bf16.msrb.mxu0 %v5317_v9  ;;  %v5493_v8 = vor.u32 %v7070_v51, %v5490_v52  ;;  %v5621_v9 = vor.u32 %v7102_v53, %v5618_v54  ;;  %v5877_v14 = vor.u32 %v7166_v3, %v5874_v4  ;;  %v7118_v51 = vld [vmem:[%s7985_s10 + $0x664] sm:$0xf]  ;;  %v5682_v52 = vld [vmem:[%s7985_s10 + $0x670] sm:$0xf0] }
 0x183   : > { %v7150_v53 = vld [vmem:[%s7985_s10 + $0x764] sm:$0xf]  ;;  %v5810_v54 = vld [vmem:[%s7985_s10 + $0x770] sm:$0xf0]  ;;  %v5685_v3 = vor.u32 %v7118_v51, %v5682_v52 }
 0x184   : > { %v5813_v4 = vor.u32 %v7150_v53, %v5810_v54  ;;  %v7230_v38 = vld [vmem:[%s7985_s10 + $0x9e4] sm:$0xf]  ;;  %v6130_v40 = vld [vmem:[%s7985_s10 + $0x9f0] sm:$0xf0] }
 0x185   : > { %3919 = vmatpush.bf16.msra.mxu1 %v4917_v17  ;;  %3932 = vmatpush.bf16.msra.mxu2 %v5045_v18  ;;  %v7130_v17 = vld [vmem:[%s7985_s10 + $0x6c4] sm:$0xf]  ;;  %v5730_v18 = vld [vmem:[%s7985_s10 + $0x6d0] sm:$0xf0] }
 0x186   : > { %3945 = vmatpush.bf16.msra.mxu3 %v5173_v21  ;;  %3958 = vmatpush.bf16.msrb.mxu0 %v5301_v22  ;;  %v5477_v21 = vor.u32 %v7066_v10, %v5474_v11  ;;  %v5605_v22 = vor.u32 %v7098_v15, %v5602_v16  ;;  %v5733_v25 = vor.u32 %v7130_v17, %v5730_v18  ;;  %v7146_v10 = vld [vmem:[%s7985_s10 + $0x744] sm:$0xf]  ;;  %v5794_v11 = vld [vmem:[%s7985_s10 + $0x750] sm:$0xf0] }
 0x187   : > { %v7046_v15 = vld [vmem:[%s7985_s10 + $0x424] sm:$0xf]  ;;  %v5394_v16 = vld [vmem:[%s7985_s10 + $0x430] sm:$0xf0]  ;;  %v5797_v18 = vor.u32 %v7146_v10, %v5794_v11 }
 0x188   : > { %v7226_v53 = vld [vmem:[%s7985_s10 + $0x9c4] sm:$0xf]  ;;  %v6114_v54 = vld [vmem:[%s7985_s10 + $0x9d0] sm:$0xf0] }
 0x189   : > { %3920 = vmatpush.bf16.msra.mxu1 %v4901_v29  ;;  %3933 = vmatpush.bf16.msra.mxu2 %v5029_v30  ;;  %v7126_v29 = vld [vmem:[%s7985_s10 + $0x6a4] sm:$0xf]  ;;  %v5714_v30 = vld [vmem:[%s7985_s10 + $0x6b0] sm:$0xf0] }
 0x18a   : > { %3946 = vmatpush.bf16.msra.mxu3 %v5157_v33  ;;  %3959 = vmatpush.bf16.msrb.mxu0 %v5285_v34  ;;  %v5461_v33 = vor.u32 %v7062_v23, %v5458_v24  ;;  %v5589_v34 = vor.u32 %v7094_v27, %v5586_v28  ;;  %v5717_v37 = vor.u32 %v7126_v29, %v5714_v30  ;;  %v7142_v23 = vld [vmem:[%s7985_s10 + $0x724] sm:$0xf]  ;;  %v5778_v24 = vld [vmem:[%s7985_s10 + $0x730] sm:$0xf0] }
 0x18b   : > { %v5525_v27 = vor.u32 %v7078_v20, %v5522_v19  ;;  %v5378_v28 = vld [vmem:[%s7985_s10 + $0x410] sm:$0xf0]  ;;  %v7074_v29 = vld [vmem:[%s7985_s10 + $0x504] sm:$0xf]  ;;  %v5781_v32 = vor.u32 %v7142_v23, %v5778_v24 }
 0x18c   : > { %v5506_v30 = vld [vmem:[%s7985_s10 + $0x510] sm:$0xf0]  ;;  %v7186_v23 = vld [vmem:[%s7985_s10 + $0x884] sm:$0xf] }
 0x18d   : > { %3921 = vmatpush.bf16.msra.mxu1 %v4885_v42  ;;  %3934 = vmatpush.bf16.msra.mxu2 %v5013_v43  ;;  %v5698_v42 = vld [vmem:[%s7985_s10 + $0x690] sm:$0xf0]  ;;  %v7154_v43 = vld [vmem:[%s7985_s10 + $0x784] sm:$0xf] }
 0x18e   : > { %3947 = vmatpush.bf16.msra.mxu3 %v5141_v13  ;;  %3960 = vmatpush.bf16.msrb.mxu0 %v5269_v47  ;;  %v7054_v13 = vld [vmem:[%s7985_s10 + $0x464] sm:$0xf]  ;;  %v5426_v47 = vld [vmem:[%s7985_s10 + $0x470] sm:$0xf0]  ;;  %v5701_v48 = vor.u32 %v7122_v41, %v5698_v42  ;;  %v5829_v39 = vor.u32 %v7154_v43, %v5826_v44  ;;  %v5509_v43 = vor.u32 %v7074_v29, %v5506_v30 }
 0x18f   : > { %v5429_v55 = vor.u32 %v7054_v13, %v5426_v47  ;;  %v7262_v41 = vld [vmem:[%s7985_s10 + $0xae4] sm:$0xf]  ;;  %v6258_v44 = vld [vmem:[%s7985_s10 + $0xaf0] sm:$0xf0]  ;;  %v5765_v47 = vor.u32 %v7138_v35, %v5762_v36 }
 0x190   : > { %v6261_v51 = vor.u32 %v7262_v41, %v6258_v44  ;;  %v6098_v11 = vld [vmem:[%s7985_s10 + $0x9b0] sm:$0xf0]  ;;  %v7250_v29 = vld [vmem:[%s7985_s10 + $0xa84] sm:$0xf] }
 0x191   : > { %3922 = vmatpush.bf16.msra.mxu1 %v4869_v56  ;;  %3935 = vmatpush.bf16.msra.mxu2 %v4997_v60  ;;  %v5557_v56 = vor.u32 %v7086_v49, %v5554_v50  ;;  %v7050_v60 = vld [vmem:[%s7985_s10 + $0x444] sm:$0xf]  ;;  %v5986_v50 = vld [vmem:[%s7985_s10 + $0x8d0] sm:$0xf0] }
 0x192   : > { %3948 = vmatpush.bf16.msra.mxu3 %v5125_v6  ;;  %3961 = vmatpush.bf16.msrb.mxu0 %v5253_v7  ;;  %v7082_v6 = vld [vmem:[%s7985_s10 + $0x544] sm:$0xf]  ;;  %v5538_v7 = vld [vmem:[%s7985_s10 + $0x550] sm:$0xf0] }
 0x193   : > { %v7194_v49 = vld [vmem:[%s7985_s10 + $0x8c4] sm:$0xf]  ;;  %v5954_v24 = vld [vmem:[%s7985_s10 + $0x890] sm:$0xf0] }
 0x194   : > { %3923 = vmatmul.bf16.vlgmr.msra.gmra.mxu1 %v8179_v57  ;;  %3936 = vmatmul.bf16.vlgmr.msra.gmra.mxu2 %v8181_v58  ;;  %v6210_v30 = vld [vmem:[%s7985_s10 + $0xa90] sm:$0xf0]  ;;  %v7182_v36 = vld [vmem:[%s7985_s10 + $0x864] sm:$0xf] }
 0x195   : > { %3967 = vmatpush.bf16.msrb.mxu1 %v5493_v8  ;;  %3980 = vmatpush.bf16.msrb.mxu2 %v5621_v9  ;;  %v7114_v8 = vld [vmem:[%s7985_s10 + $0x644] sm:$0xf]  ;;  %v5666_v9 = vld [vmem:[%s7985_s10 + $0x650] sm:$0xf0] }
 0x196   : > { %3993 = vmatpush.bf16.msrb.mxu3 %v5749_v12  ;;  %4006 = vmatpush.bf16.msra.mxu0 %v5877_v14  ;;  %v5413_v12 = vor.u32 %v7050_v60, %v5410_v61  ;;  %v5541_v14 = vor.u32 %v7082_v6, %v5538_v7  ;;  %v5669_v17 = vor.u32 %v7114_v8, %v5666_v9  ;;  %v7290_v60 = vld [vmem:[%s7985_s10 + $0xbc4] sm:$0xf]  ;;  %v6370_v61 = vld [vmem:[%s7985_s10 + $0xbd0] sm:$0xf0] }
 0x197   : > { %3949 = vmatmul.bf16.vlgmr.msra.gmra.mxu3 %v8183_v59  ;;  %3962 = vmatmul.bf16.vlgmr.msrb.gmra.mxu0 %v8187_v62  ;;  %v7190_v6 = vld [vmem:[%s7985_s10 + $0x8a4] sm:$0xf]  ;;  %v5970_v7 = vld [vmem:[%s7985_s10 + $0x8b0] sm:$0xf0]  ;;  %v6373_v10 = vor.u32 %v7290_v60, %v6370_v61 }
 0x198   : > { %v7222_v8 = vld [vmem:[%s7985_s10 + $0x9a4] sm:$0xf]  ;;  %v5973_v20 = vor.u32 %v7190_v6, %v5970_v7  ;;  %v6050_v60 = vld [vmem:[%s7985_s10 + $0x950] sm:$0xf0] }
 0x199   : > { %3968 = vmatpush.bf16.msrb.mxu1 %v5477_v21  ;;  %3981 = vmatpush.bf16.msrb.mxu2 %v5605_v22  ;;  %v7110_v21 = vld [vmem:[%s7985_s10 + $0x624] sm:$0xf]  ;;  %v5650_v22 = vld [vmem:[%s7985_s10 + $0x630] sm:$0xf0]  ;;  %v6101_v19 = vor.u32 %v7222_v8, %v6098_v11 }
 0x19a   : > { %3994 = vmatpush.bf16.msrb.mxu3 %v5733_v25  ;;  %4007 = vmatpush.bf16.msra.mxu0 %v5861_v26  ;;  %v7042_v25 = vld [vmem:[%s7985_s10 + $0x404] sm:$0xf]  ;;  %v5397_v26 = vor.u32 %v7046_v15, %v5394_v16  ;;  %v5653_v31 = vor.u32 %v7110_v21, %v5650_v22  ;;  %v6226_v15 = vld [vmem:[%s7985_s10 + $0xab0] sm:$0xf0] }
 0x19b   : > { %v5381_v42 = vor.u32 %v7042_v25, %v5378_v28  ;;  %v7286_v16 = vld [vmem:[%s7985_s10 + $0xba4] sm:$0xf]  ;;  %v6082_v28 = vld [vmem:[%s7985_s10 + $0x990] sm:$0xf0] }
 0x19c   : > { %v7214_v41 = vld [vmem:[%s7985_s10 + $0x964] sm:$0xf]  ;;  %v6306_v6 = vld [vmem:[%s7985_s10 + $0xb50] sm:$0xf0] }
 0x19d   : > { %3969 = vmatpush.bf16.msrb.mxu1 %v5461_v33  ;;  %3982 = vmatpush.bf16.msrb.mxu2 %v5589_v34  ;;  %v7106_v33 = vld [vmem:[%s7985_s10 + $0x604] sm:$0xf]  ;;  %v5634_v34 = vld [vmem:[%s7985_s10 + $0x610] sm:$0xf0] }
 0x19e   : > { %3995 = vmatpush.bf16.msrb.mxu3 %v5717_v37  ;;  %4008 = vmatpush.bf16.msra.mxu0 %v5845_v5  ;;  %v7198_v37 = vld [vmem:[%s7985_s10 + $0x8e4] sm:$0xf]  ;;  %v6002_v5 = vld [vmem:[%s7985_s10 + $0x8f0] sm:$0xf0]  ;;  %v5637_v13 = vor.u32 %v7106_v33, %v5634_v34  ;;  %v5957_v34 = vor.u32 %v7186_v23, %v5954_v24 }
 0x19f   : > { %v7242_v61 = vld [vmem:[%s7985_s10 + $0xa44] sm:$0xf]  ;;  %v5906_v11 = vld [vmem:[%s7985_s10 + $0x830] sm:$0xf0] }
 0x1a0   : > { %v7170_v24 = vld [vmem:[%s7985_s10 + $0x804] sm:$0xf] }
 0x1a1   : > { %3970 = vmatpush.bf16.msrb.mxu1 %v5445_v45  ;;  %3983 = vmatpush.bf16.msrb.mxu2 %v5573_v46  ;;  %v7294_v45 = vld [vmem:[%s7985_s10 + $0xbe4] sm:$0xf]  ;;  %v6386_v46 = vld [vmem:[%s7985_s10 + $0xbf0] sm:$0xf0] }
 0x1a2   : > { %3996 = vmatpush.bf16.msrb.mxu3 %v5701_v48  ;;  %4009 = vmatpush.bf16.msra.mxu0 %v5829_v39  ;;  %v6005_v48 = vor.u32 %v7198_v37, %v6002_v5  ;;  %v6133_v39 = vor.u32 %v7230_v38, %v6130_v40  ;;  %v6389_v52 = vor.u32 %v7294_v45, %v6386_v46  ;;  %v5938_v37 = vld [vmem:[%s7985_s10 + $0x870] sm:$0xf0] }
 0x1a3   : > { %v6213_v5 = vor.u32 %v7250_v29, %v6210_v30  ;;  %v6194_v46 = vld [vmem:[%s7985_s10 + $0xa70] sm:$0xf0]  ;;  %v7202_v30 = vld [vmem:[%s7985_s10 + $0x904] sm:$0xf] }
 0x1a4   : > { %v5890_v29 = vld [vmem:[%s7985_s10 + $0x810] sm:$0xf0] }
 0x1a5   : > { %3971 = vmatpush.bf16.msrb.mxu1 %v5429_v55  ;;  %3984 = vmatpush.bf16.msrb.mxu2 %v5557_v56  ;;  %v7258_v55 = vld [vmem:[%s7985_s10 + $0xac4] sm:$0xf]  ;;  %v6242_v56 = vld [vmem:[%s7985_s10 + $0xad0] sm:$0xf0] }
 0x1a6   : > { %3997 = vmatpush.bf16.msrb.mxu3 %v5685_v3  ;;  %4010 = vmatpush.bf16.msra.mxu0 %v5813_v4  ;;  %v5989_v3 = vor.u32 %v7194_v49, %v5986_v50  ;;  %v6117_v4 = vor.u32 %v7226_v53, %v6114_v54  ;;  %v6245_v9 = vor.u32 %v7258_v55, %v6242_v56  ;;  %v5922_v53 = vld [vmem:[%s7985_s10 + $0x850] sm:$0xf0]  ;;  %v7210_v56 = vld [vmem:[%s7985_s10 + $0x944] sm:$0xf] }
 0x1a7   : > { %v5941_v49 = vor.u32 %v7182_v36, %v5938_v37  ;;  %v7266_v36 = vld [vmem:[%s7985_s10 + $0xb04] sm:$0xf]  ;;  %v6274_v37 = vld [vmem:[%s7985_s10 + $0xb10] sm:$0xf0] }
 0x1a9   : > { %3972 = vmatpush.bf16.msrb.mxu1 %v5413_v12  ;;  %3985 = vmatpush.bf16.msrb.mxu2 %v5541_v14  ;;  %v7254_v12 = vld [vmem:[%s7985_s10 + $0xaa4] sm:$0xf] }
 0x1aa   : > { %3998 = vmatpush.bf16.msrb.mxu3 %v5669_v17  ;;  %4011 = vmatpush.bf16.msra.mxu0 %v5797_v18  ;;  %v1101_v14 = vld [vmem:[%s7991_s8] sm:$0xf]  ;;  %v6354_v17 = vld [vmem:[%s7985_s10 + $0xbb0] sm:$0xf0]  ;;  %v6229_v25 = vor.u32 %v7254_v12, %v6226_v15 }
 0x1ab   : > { %v1103_v21 = vperm.slane %v1101_v14, 0 }
 0x1ad   : > { %3973 = vmatpush.bf16.msrb.mxu1 %v5397_v26  ;;  %3986 = vmatpush.bf16.msrb.mxu2 %v5525_v27  ;;  %v6357_v26 = vor.u32 %v7286_v16, %v6354_v17  ;;  %v7218_v27 = vld [vmem:[%s7985_s10 + $0x984] sm:$0xf]  ;;  %v6034_v17 = vld [vmem:[%s7985_s10 + $0x930] sm:$0xf0] }
 0x1ae   : > { %3999 = vmatpush.bf16.msrb.mxu3 %v5653_v31  ;;  %4012 = vmatpush.bf16.msra.mxu0 %v5781_v32  ;;  %v7282_v31 = vld [vmem:[%s7985_s10 + $0xb84] sm:$0xf]  ;;  %v6338_v32 = vld [vmem:[%s7985_s10 + $0xb90] sm:$0xf0]  ;;  %v6085_v35 = vor.u32 %v7218_v27, %v6082_v28 }
 0x1af   : > { %v6341_v38 = vor.u32 %v7282_v31, %v6338_v32  ;;  %v7206_v16 = vld [vmem:[%s7985_s10 + $0x924] sm:$0xf]  ;;  %v6018_v31 = vld [vmem:[%s7985_s10 + $0x910] sm:$0xf0] }
 0x1b0   : > { %v3716_v18 = vpop.f32.mrf.mxu1 }
 0x1b1   : > { %3974 = vmatpush.bf16.msrb.mxu1 %v5381_v42  ;;  %3987 = vmatpush.bf16.msrb.mxu2 %v5509_v43  ;;  %v3755_v22 = vpop.f32.mrf.mxu0  ;;  %v3717_v33 = vadd.f32 %v3716_v18, %v1103_v21  ;;  %v6066_v42 = vld [vmem:[%s7985_s10 + $0x970] sm:$0xf0]  ;;  %v7246_v43 = vld [vmem:[%s7985_s10 + $0xa64] sm:$0xf] }
 0x1b2   : > { %4000 = vmatpush.bf16.msrb.mxu3 %v5637_v13  ;;  %4013 = vmatpush.bf16.msra.mxu0 %v5765_v47  ;;  %v7278_v13 = vld [vmem:[%s7985_s10 + $0xb64] sm:$0xf]  ;;  %v6322_v47 = vld [vmem:[%s7985_s10 + $0xb70] sm:$0xf0]  ;;  %v6069_v50 = vor.u32 %v7214_v41, %v6066_v42  ;;  %v6197_v54 = vor.u32 %v7246_v43, %v6194_v46  ;;  %v5893_v43 = vor.u32 %v7170_v24, %v5890_v29 }
 0x1b3   : > { %v6325_v55 = vor.u32 %v7278_v13, %v6322_v47  ;;  %v7238_v18 = vld [vmem:[%s7985_s10 + $0xa24] sm:$0xf]  ;;  %v6642_v41 = vld [vmem:[%s7985_s10 + $0xdf0] sm:$0xf0] }
 0x1b4   : > { %3975 = vmatmul.bf16.vlgmr.msrb.gmra.mxu1 %v8189_v63  ;;  %3988 = vmatmul.bf16.vlgmr.msrb.gmra.mxu2 %v8191_v0  ;;  %v7270_v21 = vld [vmem:[%s7985_s10 + $0xb24] sm:$0xf]  ;;  %v6898_v13 = vld [vmem:[%s7985_s10 + $0xff0] sm:$0xf0] }
 0x1b5   : > { %4019 = vmatpush.bf16.msra.mxu1 %v6005_v48  ;;  %4032 = vmatpush.bf16.msra.mxu2 %v6133_v39  ;;  %v7390_v42 = vld [vmem:[%s7985_s10 + $0xee4] sm:$0xf]  ;;  %v6738_v24 = vld [vmem:[%s7985_s10 + $0xeb0] sm:$0xf0] }
 0x1b6   : > { %4045 = vmatpush.bf16.msra.mxu3 %v6261_v51  ;;  %4058 = vmatpush.bf16.msrb.mxu0 %v6389_v52  ;;  %v3729_v40 = vpop.f32.mrf.mxu2  ;;  %v7178_v52 = vld [vmem:[%s7985_s10 + $0x844] sm:$0xf] }
 0x1b7   : > { %4001 = vmatmul.bf16.vlgmr.msrb.gmra.mxu3 %v8195_v1  ;;  %4014 = vmatmul.bf16.vlgmr.msra.gmra.mxu0 %v8197_v2  ;;  %v3730_v44 = vadd.f32 %v3729_v40, %v3717_v33  ;;  %v3742_v45 = vpop.f32.mrf.mxu3  ;;  %v5925_v8 = vor.u32 %v7178_v52, %v5922_v53  ;;  %v7358_v40 = vld [vmem:[%s7985_s10 + $0xde4] sm:$0xf] }
 0x1b8   : > { %v3718_v48 = vpop.f32.mrf.mxu1  ;;  %v7422_v46 = vld [vmem:[%s7985_s10 + $0xfe4] sm:$0xf] }
 0x1b9   : > { %4020 = vmatpush.bf16.msra.mxu1 %v5989_v3  ;;  %4033 = vmatpush.bf16.msra.mxu2 %v6117_v4  ;;  %v3743_v39 = vadd.f32 %v3742_v45, %v3730_v44  ;;  %v3757_v51 = vpop.f32.mrf.mxu0  ;;  %v6178_v3 = vld [vmem:[%s7985_s10 + $0xa50] sm:$0xf0]  ;;  %v7274_v4 = vld [vmem:[%s7985_s10 + $0xb44] sm:$0xf]  ;;  %v6021_v44 = vor.u32 %v7202_v30, %v6018_v31  ;;  %v6277_v48 = vor.u32 %v7266_v36, %v6274_v37 }
 0x1ba   : > { %4046 = vmatpush.bf16.msra.mxu3 %v6245_v9  ;;  %4059 = vmatpush.bf16.msrb.mxu0 %v6373_v10  ;;  %v6053_v9 = vor.u32 %v7210_v56, %v6050_v60  ;;  %v7174_v10 = vld [vmem:[%s7985_s10 + $0x824] sm:$0xf]  ;;  %v6181_v12 = vor.u32 %v7242_v61, %v6178_v3  ;;  %v6309_v14 = vor.u32 %v7274_v4, %v6306_v6  ;;  %v6770_v45 = vld [vmem:[%s7985_s10 + $0xef0] sm:$0xf0] }
 0x1bb   : > { %v3756_v7 = vadd.f32 %v3755_v22, %v3743_v39  ;;  %v6290_v22 = vld [vmem:[%s7985_s10 + $0xb30] sm:$0xf0]  ;;  %v7322_v53 = vld [vmem:[%s7985_s10 + $0xcc4] sm:$0xf]  ;;  %v6901_v56 = vor.u32 %v7422_v46, %v6898_v13 }
 0x1bc   : > { %v6293_v33 = vor.u32 %v7270_v21, %v6290_v22  ;;  %v7354_v61 = vld [vmem:[%s7985_s10 + $0xdc4] sm:$0xf]  ;;  %v6626_v3 = vld [vmem:[%s7985_s10 + $0xdd0] sm:$0xf0] }
 0x1bd   : > { %4021 = vmatpush.bf16.msra.mxu1 %v5973_v20  ;;  %4034 = vmatpush.bf16.msra.mxu2 %v6101_v19  ;;  %v6162_v19 = vld [vmem:[%s7985_s10 + $0xa30] sm:$0xf0]  ;;  %v7386_v4 = vld [vmem:[%s7985_s10 + $0xec4] sm:$0xf] }
 0x1be   : > { %4047 = vmatpush.bf16.msra.mxu3 %v6229_v25  ;;  %4060 = vmatpush.bf16.msrb.mxu0 %v6357_v26  ;;  %v3731_v15 = vpop.f32.mrf.mxu2  ;;  %v5909_v25 = vor.u32 %v7174_v10, %v5906_v11  ;;  %v6037_v26 = vor.u32 %v7206_v16, %v6034_v17  ;;  %v6165_v32 = vor.u32 %v7238_v18, %v6162_v19  ;;  %v6882_v10 = vld [vmem:[%s7985_s10 + $0xfd0] sm:$0xf0]  ;;  %v7382_v21 = vld [vmem:[%s7985_s10 + $0xea4] sm:$0xf] }
 0x1bf   : > { %v3744_v20 = vpop.f32.mrf.mxu3  ;;  %v6482_v15 = vld [vmem:[%s7985_s10 + $0xcb0] sm:$0xf0]  ;;  %v7528_v22 = vld [vmem:[#allocation1] sm:$0xff] }
 0x1c0   : > { %v3768_v23 = vpop.f32.mrf.mxu1  ;;  %v7350_v20 = vld [vmem:[%s7985_s10 + $0xda4] sm:$0xf]  ;;  %v6610_v19 = vld [vmem:[%s7985_s10 + $0xdb0] sm:$0xf0] }
 0x1c1   : > { %4022 = vmatpush.bf16.msra.mxu1 %v5957_v34  ;;  %4035 = vmatpush.bf16.msra.mxu2 %v6085_v35  ;;  %v3769_v27 = vadd.f32 %v3768_v23, %v3756_v7  ;;  %v3807_v28 = vpop.f32.mrf.mxu0  ;;  %v7234_v34 = vld [vmem:[%s7985_s10 + $0xa04] sm:$0xf]  ;;  %v6146_v35 = vld [vmem:[%s7985_s10 + $0xa10] sm:$0xf0]  ;;  %v7529_v23 = vld [vmem:[#allocation1 + $0x9] sm:$0xff]  ;;  %v6613_v31 = vor.u32 %v7350_v20, %v6610_v19 }
 0x1c2   : > { %4048 = vmatpush.bf16.msra.mxu3 %v6213_v5  ;;  %4061 = vmatpush.bf16.msrb.mxu0 %v6341_v38  ;;  %v7326_v5 = vld [vmem:[%s7985_s10 + $0xce4] sm:$0xf]  ;;  %v6514_v38 = vld [vmem:[%s7985_s10 + $0xcf0] sm:$0xf0]  ;;  %v6149_v47 = vor.u32 %v7234_v34, %v6146_v35  ;;  %v6741_v35 = vor.u32 %v7382_v21, %v6738_v24 }
 0x1c3   : > { %v6466_v34 = vld [vmem:[%s7985_s10 + $0xc90] sm:$0xf0]  ;;  %v7346_v37 = vld [vmem:[%s7985_s10 + $0xd84] sm:$0xf] }
 0x1c5   : > { %4023 = vmatpush.bf16.msra.mxu1 %v5941_v49  ;;  %4036 = vmatpush.bf16.msra.mxu2 %v6069_v50  ;;  %v6517_v49 = vor.u32 %v7326_v5, %v6514_v38  ;;  %v6645_v50 = vor.u32 %v7358_v40, %v6642_v41  ;;  %v6594_v5 = vld [vmem:[%s7985_s10 + $0xd90] sm:$0xf0]  ;;  %v7378_v38 = vld [vmem:[%s7985_s10 + $0xe84] sm:$0xf] }
 0x1c6   : > { %4049 = vmatpush.bf16.msra.mxu3 %v6197_v54  ;;  %4062 = vmatpush.bf16.msrb.mxu0 %v6325_v55  ;;  %v3781_v39 = vpop.f32.mrf.mxu2  ;;  %v6498_v54 = vld [vmem:[%s7985_s10 + $0xcd0] sm:$0xf0]  ;;  %v6773_v55 = vor.u32 %v7390_v42, %v6770_v45  ;;  %v7410_v41 = vld [vmem:[%s7985_s10 + $0xf84] sm:$0xf]  ;;  %v6597_v13 = vor.u32 %v7346_v37, %v6594_v5 }
 0x1c7   : > { %v3782_v51 = vadd.f32 %v3781_v39, %v3769_v27  ;;  %v3794_v52 = vpop.f32.mrf.mxu3  ;;  %v6501_v11 = vor.u32 %v7322_v53, %v6498_v54  ;;  %v7530_v27 = vld [vmem:[#allocation1 + $0x12] sm:$0xff]  ;;  %v7406_v54 = vld [vmem:[%s7985_s10 + $0xf64] sm:$0xf] }
 0x1c8   : > { %v3770_v60 = vpop.f32.mrf.mxu1  ;;  %v6722_v40 = vld [vmem:[%s7985_s10 + $0xe90] sm:$0xf0]  ;;  %v7330_v37 = vld [vmem:[%s7985_s10 + $0xd04] sm:$0xf] }
 0x1c9   : > { %4024 = vmatpush.bf16.msra.mxu1 %v5925_v8  ;;  %4037 = vmatpush.bf16.msra.mxu2 %v6053_v9  ;;  %v3795_v6 = vadd.f32 %v3794_v52, %v3782_v51  ;;  %v3809_v7 = vpop.f32.mrf.mxu0  ;;  %v6754_v8 = vld [vmem:[%s7985_s10 + $0xed0] sm:$0xf0]  ;;  %v7418_v9 = vld [vmem:[%s7985_s10 + $0xfc4] sm:$0xf]  ;;  %v6725_v39 = vor.u32 %v7378_v38, %v6722_v40 }
 0x1ca   : > { %4050 = vmatpush.bf16.msra.mxu3 %v6181_v12  ;;  %4063 = vmatpush.bf16.msrb.mxu0 %v6309_v14  ;;  %v6629_v12 = vor.u32 %v7354_v61, %v6626_v3  ;;  %v7318_v14 = vld [vmem:[%s7985_s10 + $0xca4] sm:$0xf]  ;;  %v6757_v17 = vor.u32 %v7386_v4, %v6754_v8  ;;  %v6885_v18 = vor.u32 %v7418_v9, %v6882_v10  ;;  %v6850_v42 = vld [vmem:[%s7985_s10 + $0xf90] sm:$0xf0] }
 0x1cb   : > { %v3808_v16 = vadd.f32 %v3807_v28, %v3795_v6  ;;  %v7531_v28 = vld [vmem:[#allocation1 + $0x1b] sm:$0xff]  ;;  %v6485_v30 = vor.u32 %v7318_v14, %v6482_v15  ;;  %v6578_v51 = vld [vmem:[%s7985_s10 + $0xd70] sm:$0xf0] }
 0x1cc   : > { %v7374_v52 = vld [vmem:[%s7985_s10 + $0xe64] sm:$0xf]  ;;  %v6706_v53 = vld [vmem:[%s7985_s10 + $0xe70] sm:$0xf0] }
 0x1cd   : > { %4025 = vmatpush.bf16.msra.mxu1 %v5909_v25  ;;  %4038 = vmatpush.bf16.msra.mxu2 %v6037_v26  ;;  %v7414_v25 = vld [vmem:[%s7985_s10 + $0xfa4] sm:$0xf]  ;;  %v6866_v26 = vld [vmem:[%s7985_s10 + $0xfb0] sm:$0xf0]  ;;  %v6709_v4 = vor.u32 %v7374_v52, %v6706_v53  ;;  %v7009_v52 = vld [vmem:[%s7985_s10 + $0x2f4] sm:$0xf0] }
 0x1ce   : > { %4051 = vmatpush.bf16.msra.mxu3 %v6165_v32  ;;  %4064 = vmatpush.bf16.msrb.mxu0 %v6293_v33  ;;  %v3783_v29 = vpop.f32.mrf.mxu2  ;;  %v7314_v33 = vld [vmem:[%s7985_s10 + $0xc84] sm:$0xf]  ;;  %v6869_v36 = vor.u32 %v7414_v25, %v6866_v26  ;;  %v6434_v3 = vld [vmem:[%s7985_s10 + $0xc50] sm:$0xf0]  ;;  %v5368_v53 = vld [vmem:[%s7985_s10 + $0x3e8] sm:$0xf] }
 0x1cf   : > { %v3796_v32 = vpop.f32.mrf.mxu3  ;;  %v6469_v46 = vor.u32 %v7314_v33, %v6466_v34  ;;  %v7306_v61 = vld [vmem:[%s7985_s10 + $0xc44] sm:$0xf]  ;;  %v6562_v9 = vld [vmem:[%s7985_s10 + $0xd50] sm:$0xf0] }
 0x1d0   : > { %v7338_v8 = vld [vmem:[%s7985_s10 + $0xd44] sm:$0xf]  ;;  %v6690_v14 = vld [vmem:[%s7985_s10 + $0xe50] sm:$0xf0]  ;;  %v6437_v19 = vor.u32 %v7306_v61, %v6434_v3  ;;  %v4968_v3 = vld [vmem:[%s7985_s10 + $0xc8] sm:$0xf] }
 0x1d1   : > { %4026 = vmatpush.bf16.msra.mxu1 %v5893_v43  ;;  %4039 = vmatpush.bf16.msra.mxu2 %v6021_v44  ;;  %v3820_v43 = vpop.f32.mrf.mxu1  ;;  %v7370_v10 = vld [vmem:[%s7985_s10 + $0xe44] sm:$0xf]  ;;  %v6565_v21 = vor.u32 %v7338_v8, %v6562_v9  ;;  %v6674_v29 = vld [vmem:[%s7985_s10 + $0xe30] sm:$0xf0]  ;;  %v5096_v8 = vld [vmem:[%s7985_s10 + $0x1c8] sm:$0xf] }
 0x1d2   : > { %4052 = vmatpush.bf16.msra.mxu3 %v6149_v47  ;;  %4065 = vmatpush.bf16.msrb.mxu0 %v6277_v48  ;;  %v3821_v44 = vadd.f32 %v3820_v43, %v3808_v16  ;;  %v7310_v47 = vld [vmem:[%s7985_s10 + $0xc64] sm:$0xf]  ;;  %v6450_v48 = vld [vmem:[%s7985_s10 + $0xc70] sm:$0xf0]  ;;  %v6693_v24 = vor.u32 %v7370_v10, %v6690_v14  ;;  %v6973_v9 = vld [vmem:[%s7985_s10 + $0x1d4] sm:$0xf0] }
 0x1d3   : > { %v7402_v15 = vld [vmem:[%s7985_s10 + $0xf44] sm:$0xf]  ;;  %v6818_v16 = vld [vmem:[%s7985_s10 + $0xf50] sm:$0xf0]  ;;  %v5224_v10 = vld [vmem:[%s7985_s10 + $0x2c8] sm:$0xf] }
 0x1d4   : > { %4027 = vmatmul.bf16.vlgmr.msra.gmra.mxu1 %v7528_v22  ;;  %4040 = vmatmul.bf16.vlgmr.msra.gmra.mxu2 %v7529_v23  ;;  %v3859_v45 = vpop.f32.mrf.mxu0  ;;  %v7302_v22 = vld [vmem:[%s7985_s10 + $0xc24] sm:$0xf]  ;;  %v6418_v23 = vld [vmem:[%s7985_s10 + $0xc30] sm:$0xf0]  ;;  %v6821_v25 = vor.u32 %v7402_v15, %v6818_v16  ;;  %v7037_v14 = vld [vmem:[%s7985_s10 + $0x3d4] sm:$0xf0]  ;;  %v5097_v16 = vor.u32 %v6973_v9, %v5096_v8 }
 0x1d5   : > { %4071 = vmatpush.bf16.msrb.mxu1 %v6517_v49  ;;  %4084 = vmatpush.bf16.msrb.mxu2 %v6645_v50  ;;  %v6853_v49 = vor.u32 %v7410_v41, %v6850_v42  ;;  %v7342_v50 = vld [vmem:[%s7985_s10 + $0xd64] sm:$0xf]  ;;  %v6421_v34 = vor.u32 %v7302_v22, %v6418_v23  ;;  %v6530_v5 = vld [vmem:[%s7985_s10 + $0xd10] sm:$0xf0]  ;;  %v6969_v22 = vld [vmem:[%s7985_s10 + $0x1b4] sm:$0xf0] }
 0x1d6   : > { %4097 = vmatpush.bf16.msrb.mxu3 %v6773_v55  ;;  %4110 = vmatpush.bf16.msra.mxu0 %v6901_v56  ;;  %v6834_v55 = vld [vmem:[%s7985_s10 + $0xf70] sm:$0xf0]  ;;  %v6453_v56 = vor.u32 %v7310_v47, %v6450_v48  ;;  %v6581_v60 = vor.u32 %v7342_v50, %v6578_v51  ;;  %v7334_v26 = vld [vmem:[%s7985_s10 + $0xd24] sm:$0xf]  ;;  %v6945_v47 = vld [vmem:[%s7985_s10 + $0xf4] sm:$0xf0]  ;;  %v6533_v51 = vor.u32 %v7330_v37, %v6530_v5 }
 0x1d7   : > { %4053 = vmatmul.bf16.vlgmr.msra.gmra.mxu3 %v7530_v27  ;;  %4066 = vmatmul.bf16.vlgmr.msrb.gmra.mxu0 %v7531_v28  ;;  %v6837_v6 = vor.u32 %v7406_v54, %v6834_v55  ;;  %v3833_v7 = vpop.f32.mrf.mxu2  ;;  %v6546_v27 = vld [vmem:[%s7985_s10 + $0xd30] sm:$0xf0]  ;;  %v7366_v28 = vld [vmem:[%s7985_s10 + $0xe24] sm:$0xf]  ;;  %v5112_v48 = vld [vmem:[%s7985_s10 + $0x1e8] sm:$0xf] }
 0x1d8   : > { %v7298_v33 = vld [vmem:[%s7985_s10 + $0xc04] sm:$0xf]  ;;  %v6677_v38 = vor.u32 %v7366_v28, %v6674_v29  ;;  %v6658_v43 = vld [vmem:[%s7985_s10 + $0xe10] sm:$0xf0]  ;;  %v7041_v54 = vld [vmem:[%s7985_s10 + $0x3f4] sm:$0xf0] }
 0x1d9   : > { %4072 = vmatpush.bf16.msrb.mxu1 %v6501_v11  ;;  %4085 = vmatpush.bf16.msrb.mxu2 %v6629_v12  ;;  %v3834_v11 = vadd.f32 %v3833_v7, %v3821_v44  ;;  %v7362_v42 = vld [vmem:[%s7985_s10 + $0xe04] sm:$0xf]  ;;  %v5369_v7 = vor.u32 %v7041_v54, %v5368_v53  ;;  %v5208_v23 = vld [vmem:[%s7985_s10 + $0x2a8] sm:$0xf]  ;;  %v7033_v28 = vld [vmem:[%s7985_s10 + $0x3b4] sm:$0xf0] }
 0x1da   : > { %4098 = vmatpush.bf16.msrb.mxu3 %v6757_v17  ;;  %4111 = vmatpush.bf16.msra.mxu0 %v6885_v18  ;;  %v3846_v12 = vpop.f32.mrf.mxu3  ;;  %v3822_v17 = vpop.f32.mrf.mxu1  ;;  %v7394_v44 = vld [vmem:[%s7985_s10 + $0xf04] sm:$0xf]  ;;  %v6661_v55 = vor.u32 %v7362_v42, %v6658_v43  ;;  %v7534_v29 = vld [vmem:[#allocation1 + $0x36] sm:$0xff]  ;;  %v5064_v5 = vld [vmem:[%s7985_s10 + $0x188] sm:$0xf] }
 0x1db   : > { %v3847_v18 = vadd.f32 %v3846_v12, %v3834_v11  ;;  %v7005_v11 = vld [vmem:[%s7985_s10 + $0x2d4] sm:$0xf0]  ;;  %v5352_v12 = vld [vmem:[%s7985_s10 + $0x3c8] sm:$0xf] }
 0x1dc   : > { %v3861_v20 = vpop.f32.mrf.mxu0  ;;  %v4952_v17 = vld [vmem:[%s7985_s10 + $0xa8] sm:$0xf]  ;;  %v7029_v43 = vld [vmem:[%s7985_s10 + $0x394] sm:$0xf0] }
 0x1dd   : > { %4073 = vmatpush.bf16.msrb.mxu1 %v6485_v30  ;;  %4086 = vmatpush.bf16.msrb.mxu2 %v6613_v31  ;;  %v7398_v30 = vld [vmem:[%s7985_s10 + $0xf24] sm:$0xf]  ;;  %v6802_v31 = vld [vmem:[%s7985_s10 + $0xf30] sm:$0xf0]  ;;  %v8572_v32 = vadd.f32 %v3859_v45, %v3847_v18  ;;  %v6937_v18 = vld [vmem:[%s7985_s10 + $0xb4] sm:$0xf0]  ;;  %v5225_v20 = vor.u32 %v7005_v11, %v5224_v10 }
 0x1de   : > { %4099 = vmatpush.bf16.msrb.mxu3 %v6741_v35  ;;  %4112 = vmatpush.bf16.msra.mxu0 %v6869_v36  ;;  %v6549_v35 = vor.u32 %v7334_v26, %v6546_v27  ;;  %v6402_v36 = vld [vmem:[%s7985_s10 + $0xc10] sm:$0xf0]  ;;  %v6805_v40 = vor.u32 %v7398_v30, %v6802_v31  ;;  %v7001_v26 = vld [vmem:[%s7985_s10 + $0x2b4] sm:$0xf0]  ;;  %v5336_v27 = vld [vmem:[%s7985_s10 + $0x3a8] sm:$0xf]  ;;  %v4953_v31 = vor.u32 %v6937_v18, %v4952_v17 }
 0x1df   : > { %v3835_v41 = vpop.f32.mrf.mxu2  ;;  %v6405_v50 = vor.u32 %v7298_v33, %v6402_v36  ;;  %v7535_v30 = vld [vmem:[#allocation1 + $0x3f] sm:$0xff]  ;;  %v5209_v36 = vor.u32 %v7001_v26, %v5208_v23  ;;  %v5337_v37 = vor.u32 %v7033_v28, %v5336_v27  ;;  %v6993_v54 = vld [vmem:[%s7985_s10 + $0x274] sm:$0xf0] }
 0x1e0   : > { %v6997_v41 = vld [vmem:[%s7985_s10 + $0x294] sm:$0xf0]  ;;  %v5320_v42 = vld [vmem:[%s7985_s10 + $0x388] sm:$0xf] }
 0x1e1   : > { %4074 = vmatpush.bf16.msrb.mxu1 %v6469_v46  ;;  %4087 = vmatpush.bf16.msrb.mxu2 %v6597_v13  ;;  %v6786_v46 = vld [vmem:[%s7985_s10 + $0xf10] sm:$0xf0]  ;;  %v4984_v13 = vld [vmem:[%s7985_s10 + $0xe8] sm:$0xf]  ;;  %v6957_v9 = vld [vmem:[%s7985_s10 + $0x154] sm:$0xf0] }
 0x1e2   : > { %4100 = vmatpush.bf16.msrb.mxu3 %v6725_v39  ;;  %4113 = vmatpush.bf16.msra.mxu0 %v6853_v49  ;;  %v3848_v45 = vpop.f32.mrf.mxu3  ;;  %v6977_v39 = vld [vmem:[%s7985_s10 + $0x1f4] sm:$0xf0]  ;;  %v5240_v49 = vld [vmem:[%s7985_s10 + $0x2e8] sm:$0xf] }
 0x1e3   : > { %v5113_v61 = vor.u32 %v6977_v39, %v5112_v48  ;;  %v4920_v48 = vld [vmem:[%s7985_s10 + $0x68] sm:$0xf]  ;;  %v6929_v39 = vld [vmem:[%s7985_s10 + $0x74] sm:$0xf0] }
 0x1e4   : > { %v5176_v53 = vld [vmem:[%s7985_s10 + $0x268] sm:$0xf]  ;;  %v6921_v23 = vld [vmem:[%s7985_s10 + $0x34] sm:$0xf0] }
 0x1e5   : > { %4075 = vmatpush.bf16.msrb.mxu1 %v6453_v56  ;;  %4088 = vmatpush.bf16.msrb.mxu2 %v6581_v60  ;;  %v6789_v56 = vor.u32 %v7394_v44, %v6786_v46  ;;  %v4985_v60 = vor.u32 %v6945_v47, %v4984_v13  ;;  %v5032_v8 = vld [vmem:[%s7985_s10 + $0x148] sm:$0xf]  ;;  %v6953_v27 = vld [vmem:[%s7985_s10 + $0x134] sm:$0xf0] }
 0x1e6   : > { %4101 = vmatpush.bf16.msrb.mxu3 %v6709_v4  ;;  %4114 = vmatpush.bf16.msra.mxu0 %v6837_v6  ;;  %v6941_v4 = vld [vmem:[%s7985_s10 + $0xd4] sm:$0xf0]  ;;  %v5241_v6 = vor.u32 %v7009_v52, %v5240_v49  ;;  %v5160_v10 = vld [vmem:[%s7985_s10 + $0x248] sm:$0xf] }
 0x1e7   : > { %v4969_v15 = vor.u32 %v6941_v4, %v4968_v3  ;;  %v6961_v52 = vld [vmem:[%s7985_s10 + $0x174] sm:$0xf0]  ;;  %v5177_v4 = vor.u32 %v6993_v54, %v5176_v53  ;;  %v5016_v26 = vld [vmem:[%s7985_s10 + $0x128] sm:$0xf] }
 0x1e8   : > { %v6925_v3 = vld [vmem:[%s7985_s10 + $0x54] sm:$0xf0]  ;;  %v5144_v28 = vld [vmem:[%s7985_s10 + $0x228] sm:$0xf] }
 0x1e9   : > { %4076 = vmatpush.bf16.msrb.mxu1 %v6437_v19  ;;  %4089 = vmatpush.bf16.msrb.mxu2 %v6565_v21  ;;  %v5353_v19 = vor.u32 %v7037_v14, %v5352_v12  ;;  %v5080_v21 = vld [vmem:[%s7985_s10 + $0x1a8] sm:$0xf]  ;;  %v6989_v14 = vld [vmem:[%s7985_s10 + $0x254] sm:$0xf0] }
 0x1ea   : > { %4102 = vmatpush.bf16.msrb.mxu3 %v6693_v24  ;;  %4115 = vmatpush.bf16.msra.mxu0 %v6821_v25  ;;  %v7532_v24 = vld [vmem:[#allocation1 + $0x24] sm:$0xff]  ;;  %v7533_v25 = vld [vmem:[#allocation1 + $0x2d] sm:$0xff]  ;;  %v5081_v33 = vor.u32 %v6969_v22, %v5080_v21  ;;  %v5033_v21 = vor.u32 %v6957_v9, %v5032_v8  ;;  %v7137_v53 = vld [vmem:[%s7985_s10 + $0x6f4] sm:$0xf0] }
 0x1eb   : > { %v4888_v22 = vld [vmem:[%s7985_s10 + $0x28] sm:$0xf]  ;;  %v7101_v9 = vld [vmem:[%s7985_s10 + $0x5d4] sm:$0xf0] }
 0x1ec   : > { %v5880_v54 = vld [vmem:[%s7985_s10 + $0x7e8] sm:$0xf] }
 0x1ed   : > { %4077 = vmatpush.bf16.msrb.mxu1 %v6421_v34  ;;  %4090 = vmatpush.bf16.msrb.mxu2 %v6549_v35  ;;  %v4936_v34 = vld [vmem:[%s7985_s10 + $0x88] sm:$0xf]  ;;  %v6933_v35 = vld [vmem:[%s7985_s10 + $0x94] sm:$0xf0] }
 0x1ee   : > { %4103 = vmatpush.bf16.msrb.mxu3 %v6677_v38  ;;  %4116 = vmatpush.bf16.msra.mxu0 %v6805_v40  ;;  %v6965_v38 = vld [vmem:[%s7985_s10 + $0x194] sm:$0xf0]  ;;  %v5192_v40 = vld [vmem:[%s7985_s10 + $0x288] sm:$0xf]  ;;  %v4937_v13 = vor.u32 %v6933_v35, %v4936_v34  ;;  %v4889_v35 = vor.u32 %v6921_v23, %v4888_v22 }
 0x1ef   : > { %v5065_v47 = vor.u32 %v6965_v38, %v5064_v5  ;;  %v5193_v49 = vor.u32 %v6997_v41, %v5192_v40  ;;  %v4872_v34 = vld [vmem:[%s7985_s10 + $0x8] sm:$0xf]  ;;  %v6949_v38 = vld [vmem:[%s7985_s10 + $0x114] sm:$0xf0] }
 0x1f0   : > { %v5000_v5 = vld [vmem:[%s7985_s10 + $0x108] sm:$0xf]  ;;  %v7097_v22 = vld [vmem:[%s7985_s10 + $0x5b4] sm:$0xf0] }
 0x1f1   : > { %4078 = vmatpush.bf16.msrb.mxu1 %v6405_v50  ;;  %4091 = vmatpush.bf16.msrb.mxu2 %v6533_v51  ;;  %v3872_v44 = vpop.f32.mrf.mxu1  ;;  %v5321_v50 = vor.u32 %v7029_v43, %v5320_v42  ;;  %v5048_v51 = vld [vmem:[%s7985_s10 + $0x168] sm:$0xf] }
 0x1f2   : > { %4104 = vmatpush.bf16.msrb.mxu3 %v6661_v55  ;;  %4117 = vmatpush.bf16.msra.mxu0 %v6789_v56  ;;  %v3873_v45 = vadd.f32 %v3872_v44, %v8572_v32  ;;  %v5304_v55 = vld [vmem:[%s7985_s10 + $0x368] sm:$0xf]  ;;  %v7025_v32 = vld [vmem:[%s7985_s10 + $0x374] sm:$0xf0]  ;;  %v4921_v56 = vor.u32 %v6929_v39, %v4920_v48 }
 0x1f3   : > { %v5128_v43 = vld [vmem:[%s7985_s10 + $0x208] sm:$0xf]  ;;  %v6981_v44 = vld [vmem:[%s7985_s10 + $0x214] sm:$0xf0] }
 0x1f4   : > { %4079 = vmatmul.bf16.vlgmr.msrb.gmra.mxu1 %v7532_v24  ;;  %4092 = vmatmul.bf16.vlgmr.msrb.gmra.mxu2 %v7533_v25  ;;  %v3911_v46 = vpop.f32.mrf.mxu0  ;;  %v5161_v24 = vor.u32 %v6989_v14, %v5160_v10  ;;  %v7073_v48 = vld [vmem:[%s7985_s10 + $0x4f4] sm:$0xf0]  ;;  %v5624_v39 = vld [vmem:[%s7985_s10 + $0x5e8] sm:$0xf] }
 0x1f5   : > { %4123 = vmatpush.bf16.msra.mxu1 %v4985_v60  ;;  %4136 = vmatpush.bf16.msra.mxu2 %v5113_v61  ;;  %v5049_v60 = vor.u32 %v6961_v52, %v5048_v51  ;;  %v4904_v61 = vld [vmem:[%s7985_s10 + $0x48] sm:$0xf]  ;;  %v5001_v52 = vor.u32 %v6949_v38, %v5000_v5  ;;  %v7165_v14 = vld [vmem:[%s7985_s10 + $0x7d4] sm:$0xf0] }
 0x1f6   : > { %4149 = vmatpush.bf16.msra.mxu3 %v5241_v6  ;;  %4162 = vmatpush.bf16.msrb.mxu0 %v5369_v7  ;;  %v5305_v6 = vor.u32 %v7025_v32, %v5304_v55  ;;  %v7169_v55 = vld [vmem:[%s7985_s10 + $0x7f4] sm:$0xf0]  ;;  %v5129_v32 = vor.u32 %v6981_v44, %v5128_v43  ;;  %v5608_v8 = vld [vmem:[%s7985_s10 + $0x5c8] sm:$0xf] }
 0x1f7   : > { %4105 = vmatmul.bf16.vlgmr.msrb.gmra.mxu3 %v7534_v29  ;;  %4118 = vmatmul.bf16.vlgmr.msra.gmra.mxu0 %v7535_v30  ;;  %v3885_v7 = vpop.f32.mrf.mxu2  ;;  %v6985_v30 = vld [vmem:[%s7985_s10 + $0x234] sm:$0xf0]  ;;  %v5736_v10 = vld [vmem:[%s7985_s10 + $0x6c8] sm:$0xf] }
 0x1f8   : > { %v3886_v11 = vadd.f32 %v3885_v7, %v3873_v45  ;;  %v5145_v40 = vor.u32 %v6985_v30, %v5144_v28  ;;  %v5256_v45 = vld [vmem:[%s7985_s10 + $0x308] sm:$0xf]  ;;  %v5881_v7 = vor.u32 %v7169_v55, %v5880_v54  ;;  %v7125_v5 = vld [vmem:[%s7985_s10 + $0x694] sm:$0xf0] }
 0x1f9   : > { %4124 = vmatpush.bf16.msra.mxu1 %v4969_v15  ;;  %4137 = vmatpush.bf16.msra.mxu2 %v5097_v16  ;;  %v5288_v15 = vld [vmem:[%s7985_s10 + $0x348] sm:$0xf]  ;;  %v7021_v16 = vld [vmem:[%s7985_s10 + $0x354] sm:$0xf0]  ;;  %v3874_v17 = vpop.f32.mrf.mxu1 }
 0x1fa   : > { %4150 = vmatpush.bf16.msra.mxu3 %v5225_v20  ;;  %4163 = vmatpush.bf16.msrb.mxu0 %v5353_v19  ;;  %v3898_v12 = vpop.f32.mrf.mxu3  ;;  %v4905_v19 = vor.u32 %v6925_v3, %v4904_v61  ;;  %v5289_v25 = vor.u32 %v7021_v16, %v5288_v15  ;;  %v5480_v3 = vld [vmem:[%s7985_s10 + $0x4c8] sm:$0xf]  ;;  %v5609_v16 = vor.u32 %v7101_v9, %v5608_v8  ;;  %v7117_v8 = vld [vmem:[%s7985_s10 + $0x654] sm:$0xf0] }
 0x1fb   : > { %v3899_v18 = vadd.f32 %v3898_v12, %v3886_v11  ;;  %v7133_v11 = vld [vmem:[%s7985_s10 + $0x6d4] sm:$0xf0]  ;;  %v5864_v12 = vld [vmem:[%s7985_s10 + $0x7c8] sm:$0xf] }
 0x1fc   : > { %v3913_v20 = vpop.f32.mrf.mxu0  ;;  %v5464_v17 = vld [vmem:[%s7985_s10 + $0x4a8] sm:$0xf] }
 0x1fd   : > { %4125 = vmatpush.bf16.msra.mxu1 %v4953_v31  ;;  %4138 = vmatpush.bf16.msra.mxu2 %v5081_v33  ;;  %v8636_v29 = vadd.f32 %v3911_v46, %v3899_v18  ;;  %v5272_v31 = vld [vmem:[%s7985_s10 + $0x328] sm:$0xf]  ;;  %v7017_v33 = vld [vmem:[%s7985_s10 + $0x334] sm:$0xf0]  ;;  %v5737_v20 = vor.u32 %v7133_v11, %v5736_v10 }
 0x1fe   : > { %4151 = vmatpush.bf16.msra.mxu3 %v5209_v36  ;;  %4164 = vmatpush.bf16.msrb.mxu0 %v5337_v37  ;;  %v5017_v36 = vor.u32 %v6953_v27, %v5016_v26  ;;  %v6917_v37 = vld [vmem:[%s7985_s10 + $0x14] sm:$0xf0]  ;;  %v5273_v41 = vor.u32 %v7017_v33, %v5272_v31  ;;  %v5720_v23 = vld [vmem:[%s7985_s10 + $0x6a8] sm:$0xf] }
 0x1ff   : > { %v3887_v42 = vpop.f32.mrf.mxu2  ;;  %v4873_v51 = vor.u32 %v6917_v37, %v4872_v34  ;;  %v7065_v18 = vld [vmem:[%s7985_s10 + $0x4b4] sm:$0xf0]  ;;  %v5448_v30 = vld [vmem:[%s7985_s10 + $0x488] sm:$0xf] }
 0x200   : > { %v7161_v26 = vld [vmem:[%s7985_s10 + $0x7b4] sm:$0xf0]  ;;  %v5465_v27 = vor.u32 %v7065_v18, %v5464_v17  ;;  %v5704_v37 = vld [vmem:[%s7985_s10 + $0x688] sm:$0xf] }
 0x201   : > { %4126 = vmatpush.bf16.msra.mxu1 %v4937_v13  ;;  %4139 = vmatpush.bf16.msra.mxu2 %v5065_v47  ;;  %v7013_v13 = vld [vmem:[%s7985_s10 + $0x314] sm:$0xf0]  ;;  %v5496_v47 = vld [vmem:[%s7985_s10 + $0x4e8] sm:$0xf] }
 0x202   : > { %4152 = vmatpush.bf16.msra.mxu3 %v5193_v49  ;;  %4165 = vmatpush.bf16.msrb.mxu0 %v5321_v50  ;;  %v3900_v46 = vpop.f32.mrf.mxu3  ;;  %v7105_v49 = vld [vmem:[%s7985_s10 + $0x5f4] sm:$0xf0]  ;;  %v5752_v50 = vld [vmem:[%s7985_s10 + $0x6e8] sm:$0xf] }
 0x203   : > { %v5625_v61 = vor.u32 %v7105_v49, %v5624_v39  ;;  %v7061_v31 = vld [vmem:[%s7985_s10 + $0x494] sm:$0xf0]  ;;  %v5832_v38 = vld [vmem:[%s7985_s10 + $0x788] sm:$0xf] }
 0x204   : > { %v5449_v43 = vor.u32 %v7061_v31, %v5448_v30  ;;  %v7057_v46 = vld [vmem:[%s7985_s10 + $0x474] sm:$0xf0]  ;;  %v5688_v49 = vld [vmem:[%s7985_s10 + $0x668] sm:$0xf] }
 0x205   : > { %4127 = vmatpush.bf16.msra.mxu1 %v4921_v56  ;;  %4140 = vmatpush.bf16.msra.mxu2 %v5049_v60  ;;  %v5257_v56 = vor.u32 %v7013_v13, %v5256_v45  ;;  %v5497_v60 = vor.u32 %v7073_v48, %v5496_v47  ;;  %v5432_v45 = vld [vmem:[%s7985_s10 + $0x468] sm:$0xf]  ;;  %v5705_v13 = vor.u32 %v7125_v5, %v5704_v37  ;;  %v7089_v39 = vld [vmem:[%s7985_s10 + $0x574] sm:$0xf0] }
 0x206   : > { %4153 = vmatpush.bf16.msra.mxu3 %v5177_v4  ;;  %4166 = vmatpush.bf16.msrb.mxu0 %v5305_v6  ;;  %v7069_v4 = vld [vmem:[%s7985_s10 + $0x4d4] sm:$0xf0]  ;;  %v5753_v6 = vor.u32 %v7137_v53, %v5752_v50  ;;  %v5560_v48 = vld [vmem:[%s7985_s10 + $0x568] sm:$0xf]  ;;  %v5433_v53 = vor.u32 %v7057_v46, %v5432_v45 }
 0x207   : > { %v5481_v15 = vor.u32 %v7069_v4, %v5480_v3  ;;  %v7121_v50 = vld [vmem:[%s7985_s10 + $0x674] sm:$0xf0]  ;;  %v5561_v54 = vor.u32 %v7089_v39, %v5560_v48  ;;  %v5416_v55 = vld [vmem:[%s7985_s10 + $0x448] sm:$0xf] }
 0x208   : > { %v5544_v3 = vld [vmem:[%s7985_s10 + $0x548] sm:$0xf]  ;;  %v7085_v4 = vld [vmem:[%s7985_s10 + $0x554] sm:$0xf0] }
 0x209   : > { %4128 = vmatpush.bf16.msra.mxu1 %v4905_v19  ;;  %4141 = vmatpush.bf16.msra.mxu2 %v5033_v21  ;;  %v5865_v19 = vor.u32 %v7165_v14, %v5864_v12  ;;  %v5592_v21 = vld [vmem:[%s7985_s10 + $0x5a8] sm:$0xf]  ;;  %v7149_v10 = vld [vmem:[%s7985_s10 + $0x754] sm:$0xf0] }
 0x20a   : > { %4154 = vmatpush.bf16.msra.mxu3 %v5161_v24  ;;  %4167 = vmatpush.bf16.msrb.mxu0 %v5289_v25  ;;  %v7129_v24 = vld [vmem:[%s7985_s10 + $0x6b4] sm:$0xf0]  ;;  %v5848_v25 = vld [vmem:[%s7985_s10 + $0x7a8] sm:$0xf]  ;;  %v5593_v28 = vor.u32 %v7097_v22, %v5592_v21 }
 0x20b   : > { %v5721_v33 = vor.u32 %v7129_v24, %v5720_v23  ;;  %v5849_v34 = vor.u32 %v7161_v26, %v5848_v25  ;;  %v5800_v9 = vld [vmem:[%s7985_s10 + $0x748] sm:$0xf]  ;;  %v7049_v17 = vld [vmem:[%s7985_s10 + $0x434] sm:$0xf0] }
 0x20c   : > { %v7081_v21 = vld [vmem:[%s7985_s10 + $0x534] sm:$0xf0]  ;;  %v5656_v22 = vld [vmem:[%s7985_s10 + $0x628] sm:$0xf] }
 0x20d   : > { %4129 = vmatpush.bf16.msra.mxu1 %v4889_v35  ;;  %4142 = vmatpush.bf16.msra.mxu2 %v5017_v36  ;;  %v5576_v35 = vld [vmem:[%s7985_s10 + $0x588] sm:$0xf]  ;;  %v7093_v36 = vld [vmem:[%s7985_s10 + $0x594] sm:$0xf0] }
 0x20e   : > { %4155 = vmatpush.bf16.msra.mxu3 %v5145_v40  ;;  %4168 = vmatpush.bf16.msrb.mxu0 %v5273_v41  ;;  %v7157_v40 = vld [vmem:[%s7985_s10 + $0x794] sm:$0xf0]  ;;  %v5577_v44 = vor.u32 %v7093_v36, %v5576_v35  ;;  %v5784_v24 = vld [vmem:[%s7985_s10 + $0x728] sm:$0xf] }
 0x20f   : > { %v5833_v47 = vor.u32 %v7157_v40, %v5832_v38  ;;  %v7113_v23 = vld [vmem:[%s7985_s10 + $0x634] sm:$0xf0]  ;;  %v5384_v26 = vld [vmem:[%s7985_s10 + $0x408] sm:$0xf] }
 0x210   : > { %v7145_v25 = vld [vmem:[%s7985_s10 + $0x734] sm:$0xf0]  ;;  %v5512_v31 = vld [vmem:[%s7985_s10 + $0x508] sm:$0xf] }
 0x211   : > { %4130 = vmatpush.bf16.msra.mxu1 %v4873_v51  ;;  %4143 = vmatpush.bf16.msra.mxu2 %v5001_v52  ;;  %v8685_v41 = vpop.f32.mrf.mxu1  ;;  %v5816_v51 = vld [vmem:[%s7985_s10 + $0x768] sm:$0xf]  ;;  %v7153_v52 = vld [vmem:[%s7985_s10 + $0x774] sm:$0xf0]  ;;  %v5785_v35 = vor.u32 %v7145_v25, %v5784_v24 }
 0x212   : > { %4156 = vmatpush.bf16.msra.mxu3 %v5129_v32  ;;  %4169 = vmatpush.bf16.msrb.mxu0 %v5257_v56  ;;  %v7053_v32 = vld [vmem:[%s7985_s10 + $0x454] sm:$0xf0]  ;;  %v5689_v56 = vor.u32 %v7121_v50, %v5688_v49  ;;  %v5640_v37 = vld [vmem:[%s7985_s10 + $0x608] sm:$0xf] }
 0x213   : > { %v5417_v14 = vor.u32 %v7053_v32, %v5416_v55  ;;  %v7045_v30 = vld [vmem:[%s7985_s10 + $0x414] sm:$0xf0]  ;;  %v5768_v38 = vld [vmem:[%s7985_s10 + $0x708] sm:$0xf] }
 0x214   : > { %4131 = vmatmul.bf16.vlgmr.msra.gmra.mxu1 %v8179_v57  ;;  %4144 = vmatmul.bf16.vlgmr.msra.gmra.mxu2 %v8181_v58  ;;  %v8687_v42 = vpop.f32.mrf.mxu0  ;;  %v7109_v5 = vld [vmem:[%s7985_s10 + $0x614] sm:$0xf0]  ;;  %v6136_v46 = vld [vmem:[%s7985_s10 + $0x9e8] sm:$0xf]  ;;  %v5385_v48 = vor.u32 %v7045_v30, %v5384_v26 }
 0x215   : > { %4175 = vmatpush.bf16.msrb.mxu1 %v5497_v60  ;;  %4188 = vmatpush.bf16.msrb.mxu2 %v5625_v61  ;;  %v5817_v60 = vor.u32 %v7153_v52, %v5816_v51  ;;  %v7201_v45 = vld [vmem:[%s7985_s10 + $0x8f4] sm:$0xf0]  ;;  %v6392_v50 = vld [vmem:[%s7985_s10 + $0xbe8] sm:$0xf]  ;;  %v5641_v52 = vor.u32 %v7109_v5, %v5640_v37 }
 0x216   : > { %4201 = vmatpush.bf16.msrb.mxu3 %v5753_v6  ;;  %4214 = vmatpush.bf16.msra.mxu0 %v5881_v7  ;;  %v5672_v6 = vld [vmem:[%s7985_s10 + $0x648] sm:$0xf]  ;;  %v7265_v49 = vld [vmem:[%s7985_s10 + $0xaf4] sm:$0xf0] }
 0x217   : > { %4157 = vmatmul.bf16.vlgmr.msra.gmra.mxu3 %v8183_v59  ;;  %4170 = vmatmul.bf16.vlgmr.msrb.gmra.mxu0 %v8187_v62  ;;  %v8699_v61 = vpop.f32.mrf.mxu2  ;;  %v5673_v18 = vor.u32 %v7117_v8, %v5672_v6  ;;  %v7297_v51 = vld [vmem:[%s7985_s10 + $0xbf4] sm:$0xf0]  ;;  %v6120_v8 = vld [vmem:[%s7985_s10 + $0x9c8] sm:$0xf] }
 0x218   : > { %v6393_v6 = vor.u32 %v7297_v51, %v6392_v50  ;;  %v6232_v24 = vld [vmem:[%s7985_s10 + $0xaa8] sm:$0xf]  ;;  %v7257_v25 = vld [vmem:[%s7985_s10 + $0xab4] sm:$0xf0] }
 0x219   : > { %4176 = vmatpush.bf16.msrb.mxu1 %v5481_v15  ;;  %4189 = vmatpush.bf16.msrb.mxu2 %v5609_v16  ;;  %v3926_v11 = vpop.f32.mrf.mxu1  ;;  %v5545_v15 = vor.u32 %v7085_v4, %v5544_v3  ;;  %v5400_v16 = vld [vmem:[%s7985_s10 + $0x428] sm:$0xf]  ;;  %v7197_v3 = vld [vmem:[%s7985_s10 + $0x8d4] sm:$0xf0] }
 0x21a   : > { %4202 = vmatpush.bf16.msrb.mxu3 %v5737_v20  ;;  %4215 = vmatpush.bf16.msra.mxu0 %v5865_v19  ;;  %v8704_v7 = vpop.f32.mrf.mxu3  ;;  %v5801_v20 = vor.u32 %v7149_v10, %v5800_v9  ;;  %v5528_v19 = vld [vmem:[%s7985_s10 + $0x528] sm:$0xf]  ;;  %v7229_v9 = vld [vmem:[%s7985_s10 + $0x9d4] sm:$0xf0] }
 0x21b   : > { %v6248_v10 = vld [vmem:[%s7985_s10 + $0xac8] sm:$0xf]  ;;  %v7261_v11 = vld [vmem:[%s7985_s10 + $0xad4] sm:$0xf0] }
 0x21c   : > { %v3965_v12 = vpop.f32.mrf.mxu0  ;;  %v6360_v26 = vld [vmem:[%s7985_s10 + $0xba8] sm:$0xf]  ;;  %v7217_v50 = vld [vmem:[%s7985_s10 + $0x974] sm:$0xf0] }
 0x21d   : > { %4177 = vmatpush.bf16.msrb.mxu1 %v5465_v27  ;;  %4190 = vmatpush.bf16.msrb.mxu2 %v5593_v28  ;;  %v5401_v27 = vor.u32 %v7049_v17, %v5400_v16  ;;  %v5529_v28 = vor.u32 %v7081_v21, %v5528_v19  ;;  %v6376_v12 = vld [vmem:[%s7985_s10 + $0xbc8] sm:$0xf]  ;;  %v6121_v17 = vor.u32 %v7229_v9, %v6120_v8 }
 0x21e   : > { %4203 = vmatpush.bf16.msrb.mxu3 %v5721_v33  ;;  %4216 = vmatpush.bf16.msra.mxu0 %v5849_v34  ;;  %v7077_v33 = vld [vmem:[%s7985_s10 + $0x514] sm:$0xf0]  ;;  %v5657_v34 = vor.u32 %v7113_v23, %v5656_v22  ;;  %v6249_v19 = vor.u32 %v7261_v11, %v6248_v10  ;;  %v6104_v22 = vld [vmem:[%s7985_s10 + $0x9a8] sm:$0xf] }
 0x21f   : > { %v3939_v36 = vpop.f32.mrf.mxu2  ;;  %v5513_v39 = vor.u32 %v7077_v33, %v5512_v31  ;;  %v7225_v23 = vld [vmem:[%s7985_s10 + $0x9b4] sm:$0xf0]  ;;  %v5960_v30 = vld [vmem:[%s7985_s10 + $0x888] sm:$0xf]  ;;  %v6233_v33 = vor.u32 %v7257_v25, %v6232_v24 }
 0x220   : > { %v7189_v31 = vld [vmem:[%s7985_s10 + $0x894] sm:$0xf0]  ;;  %v6216_v37 = vld [vmem:[%s7985_s10 + $0xa88] sm:$0xf] }
 0x221   : > { %4178 = vmatpush.bf16.msrb.mxu1 %v5449_v43  ;;  %4191 = vmatpush.bf16.msrb.mxu2 %v5577_v44  ;;  %v7141_v43 = vld [vmem:[%s7985_s10 + $0x714] sm:$0xf0]  ;;  %v6008_v44 = vld [vmem:[%s7985_s10 + $0x8e8] sm:$0xf] }
 0x222   : > { %4204 = vmatpush.bf16.msrb.mxu3 %v5705_v13  ;;  %4217 = vmatpush.bf16.msra.mxu0 %v5833_v47  ;;  %v3952_v40 = vpop.f32.mrf.mxu3  ;;  %v7233_v13 = vld [vmem:[%s7985_s10 + $0x9f4] sm:$0xf0]  ;;  %v6264_v47 = vld [vmem:[%s7985_s10 + $0xae8] sm:$0xf]  ;;  %v6009_v32 = vor.u32 %v7201_v45, %v6008_v44 }
 0x223   : > { %v6265_v4 = vor.u32 %v7265_v49, %v6264_v47  ;;  %v7221_v36 = vld [vmem:[%s7985_s10 + $0x994] sm:$0xf0]  ;;  %v6344_v40 = vld [vmem:[%s7985_s10 + $0xb88] sm:$0xf] }
 0x224   : > { %v5944_v47 = vld [vmem:[%s7985_s10 + $0x868] sm:$0xf]  ;;  %v7213_v11 = vld [vmem:[%s7985_s10 + $0x954] sm:$0xf0] }
 0x225   : > { %4179 = vmatpush.bf16.msrb.mxu1 %v5433_v53  ;;  %4192 = vmatpush.bf16.msrb.mxu2 %v5561_v54  ;;  %v5769_v53 = vor.u32 %v7141_v43, %v5768_v38  ;;  %v8734_v54 = vld [vmem:[%s7991_s8] sm:$0xf]  ;;  %v7253_v38 = vld [vmem:[%s7985_s10 + $0xa94] sm:$0xf0]  ;;  %v6072_v49 = vld [vmem:[%s7985_s10 + $0x968] sm:$0xf] }
 0x226   : > { %4205 = vmatpush.bf16.msrb.mxu3 %v5689_v56  ;;  %4218 = vmatpush.bf16.msra.mxu0 %v5817_v60  ;;  %v1104_v55 = vperm.slane %v8734_v54, 1  ;;  %v6137_v56 = vor.u32 %v7233_v13, %v6136_v46  ;;  %v5992_v60 = vld [vmem:[%s7985_s10 + $0x8c8] sm:$0xf]  ;;  %v7285_v43 = vld [vmem:[%s7985_s10 + $0xb94] sm:$0xf0]  ;;  %v5961_v46 = vor.u32 %v7189_v31, %v5960_v30 }
 0x227   : > { %v5993_v16 = vor.u32 %v7197_v3, %v5992_v60  ;;  %v6200_v51 = vld [vmem:[%s7985_s10 + $0xa68] sm:$0xf]  ;;  %v6073_v3 = vor.u32 %v7217_v50, %v6072_v49  ;;  %v7241_v30 = vld [vmem:[%s7985_s10 + $0xa34] sm:$0xf0] }
 0x228   : > { %v6056_v10 = vld [vmem:[%s7985_s10 + $0x948] sm:$0xf]  ;;  %v7329_v49 = vld [vmem:[%s7985_s10 + $0xcf4] sm:$0xf0] }
 0x229   : > { %4180 = vmatpush.bf16.msrb.mxu1 %v5417_v14  ;;  %4193 = vmatpush.bf16.msrb.mxu2 %v5545_v15  ;;  %v7293_v14 = vld [vmem:[%s7985_s10 + $0xbd4] sm:$0xf0]  ;;  %v3925_v15 = vadd.f32 %v8685_v41, %v1104_v55  ;;  %v6328_v55 = vld [vmem:[%s7985_s10 + $0xb68] sm:$0xf] }
 0x22a   : > { %4206 = vmatpush.bf16.msrb.mxu3 %v5673_v18  ;;  %4219 = vmatpush.bf16.msra.mxu0 %v5801_v20  ;;  %v5976_v18 = vld [vmem:[%s7985_s10 + $0x8a8] sm:$0xf]  ;;  %v7193_v20 = vld [vmem:[%s7985_s10 + $0x8b4] sm:$0xf0]  ;;  %v6377_v21 = vor.u32 %v7293_v14, %v6376_v12 }
 0x22b   : > { %v3938_v41 = vadd.f32 %v8699_v61, %v3925_v15  ;;  %v5977_v61 = vor.u32 %v7193_v20, %v5976_v18  ;;  %v6184_v12 = vld [vmem:[%s7985_s10 + $0xa48] sm:$0xf]  ;;  %v7277_v18 = vld [vmem:[%s7985_s10 + $0xb54] sm:$0xf0] }
 0x22c   : > { %v5912_v24 = vld [vmem:[%s7985_s10 + $0x828] sm:$0xf] }
 0x22d   : > { %4181 = vmatpush.bf16.msrb.mxu1 %v5401_v27  ;;  %4194 = vmatpush.bf16.msrb.mxu2 %v5529_v28  ;;  %v7289_v27 = vld [vmem:[%s7985_s10 + $0xbb4] sm:$0xf0]  ;;  %v6105_v28 = vor.u32 %v7225_v23, %v6104_v22  ;;  %v3951_v5 = vadd.f32 %v8704_v7, %v3938_v41  ;;  %v6217_v7 = vor.u32 %v7253_v38, %v6216_v37  ;;  %v6296_v31 = vld [vmem:[%s7985_s10 + $0xb28] sm:$0xf] }
 0x22e   : > { %4207 = vmatpush.bf16.msrb.mxu3 %v5657_v34  ;;  %4220 = vmatpush.bf16.msra.mxu0 %v5785_v35  ;;  %v6361_v34 = vor.u32 %v7289_v27, %v6360_v26  ;;  %v6088_v35 = vld [vmem:[%s7985_s10 + $0x988] sm:$0xf]  ;;  %v6057_v23 = vor.u32 %v7213_v11, %v6056_v10  ;;  %v7177_v41 = vld [vmem:[%s7985_s10 + $0x834] sm:$0xf0] }
 0x22f   : > { %v6089_v13 = vor.u32 %v7221_v36, %v6088_v35  ;;  %v6040_v27 = vld [vmem:[%s7985_s10 + $0x928] sm:$0xf]  ;;  %v5913_v36 = vor.u32 %v7177_v41, %v5912_v24 }
 0x230   : > { %v5896_v35 = vld [vmem:[%s7985_s10 + $0x808] sm:$0xf] }
 0x231   : > { %4182 = vmatpush.bf16.msrb.mxu1 %v5385_v48  ;;  %4195 = vmatpush.bf16.msrb.mxu2 %v5513_v39  ;;  %v3976_v44 = vpop.f32.mrf.mxu1  ;;  %v7185_v48 = vld [vmem:[%s7985_s10 + $0x874] sm:$0xf0]  ;;  %v6345_v39 = vor.u32 %v7285_v43, %v6344_v40  ;;  %v6024_v38 = vld [vmem:[%s7985_s10 + $0x908] sm:$0xf] }
 0x232   : > { %4208 = vmatpush.bf16.msrb.mxu3 %v5641_v52  ;;  %4221 = vmatpush.bf16.msra.mxu0 %v5769_v53  ;;  %v3964_v52 = vadd.f32 %v8687_v42, %v3951_v5  ;;  %v7249_v53 = vld [vmem:[%s7985_s10 + $0xa74] sm:$0xf0]  ;;  %v5945_v60 = vor.u32 %v7185_v48, %v5944_v47  ;;  %v6280_v47 = vld [vmem:[%s7985_s10 + $0xb08] sm:$0xf] }
 0x233   : > { %v6201_v8 = vor.u32 %v7249_v53, %v6200_v51  ;;  %v7173_v5 = vld [vmem:[%s7985_s10 + $0x814] sm:$0xf0]  ;;  %v6648_v50 = vld [vmem:[%s7985_s10 + $0xde8] sm:$0xf] }
 0x234   : > { %4183 = vmatmul.bf16.vlgmr.msrb.gmra.mxu1 %v8189_v63  ;;  %4196 = vmatmul.bf16.vlgmr.msrb.gmra.mxu2 %v8191_v0  ;;  %v4015_v45 = vpop.f32.mrf.mxu0  ;;  %v7205_v40 = vld [vmem:[%s7985_s10 + $0x914] sm:$0xf0]  ;;  %v5897_v53 = vor.u32 %v7173_v5, %v5896_v35  ;;  %v6616_v41 = vld [vmem:[%s7985_s10 + $0xda8] sm:$0xf]  ;;  %v7540_v35 = vld [vmem:[#allocation1 + $0x1b] sm:$0xff] }
 0x235   : > { %4227 = vmatpush.bf16.msra.mxu1 %v6009_v32  ;;  %4240 = vmatpush.bf16.msra.mxu2 %v6137_v56  ;;  %v7281_v32 = vld [vmem:[%s7985_s10 + $0xb74] sm:$0xf0]  ;;  %v3977_v56 = vadd.f32 %v3976_v44, %v3964_v52  ;;  %v6776_v52 = vld [vmem:[%s7985_s10 + $0xee8] sm:$0xf] }
 0x236   : > { %4253 = vmatpush.bf16.msra.mxu3 %v6265_v4  ;;  %4266 = vmatpush.bf16.msrb.mxu0 %v6393_v6  ;;  %v5928_v4 = vld [vmem:[%s7985_s10 + $0x848] sm:$0xf]  ;;  %v7181_v6 = vld [vmem:[%s7985_s10 + $0x854] sm:$0xf0]  ;;  %v6329_v42 = vor.u32 %v7281_v32, %v6328_v55  ;;  %v6025_v55 = vor.u32 %v7205_v40, %v6024_v38 }
 0x237   : > { %4209 = vmatmul.bf16.vlgmr.msrb.gmra.mxu3 %v8195_v1  ;;  %4222 = vmatmul.bf16.vlgmr.msra.gmra.mxu0 %v8197_v2  ;;  %v3989_v9 = vpop.f32.mrf.mxu2  ;;  %v5929_v22 = vor.u32 %v7181_v6, %v5928_v4  ;;  %v7361_v51 = vld [vmem:[%s7985_s10 + $0xdf4] sm:$0xf0]  ;;  %v6472_v5 = vld [vmem:[%s7985_s10 + $0xc88] sm:$0xf] }
 0x238   : > { %v3990_v14 = vadd.f32 %v3989_v9, %v3977_v56  ;;  %v7393_v32 = vld [vmem:[%s7985_s10 + $0xef4] sm:$0xf0]  ;;  %v6904_v56 = vld [vmem:[%s7985_s10 + $0xfe8] sm:$0xf] }
 0x239   : > { %4228 = vmatpush.bf16.msra.mxu1 %v5993_v16  ;;  %4241 = vmatpush.bf16.msra.mxu2 %v6121_v17  ;;  %v7245_v16 = vld [vmem:[%s7985_s10 + $0xa54] sm:$0xf0]  ;;  %v6312_v17 = vld [vmem:[%s7985_s10 + $0xb48] sm:$0xf]  ;;  %v3978_v20 = vpop.f32.mrf.mxu1  ;;  %v6777_v10 = vor.u32 %v7393_v32, %v6776_v52 }
 0x23a   : > { %4254 = vmatpush.bf16.msra.mxu3 %v6249_v19  ;;  %4267 = vmatpush.bf16.msrb.mxu0 %v6377_v21  ;;  %v4002_v15 = vpop.f32.mrf.mxu3  ;;  %v6185_v25 = vor.u32 %v7245_v16, %v6184_v12  ;;  %v6313_v26 = vor.u32 %v7277_v18, %v6312_v17  ;;  %v7325_v9 = vld [vmem:[%s7985_s10 + $0xcd4] sm:$0xf0]  ;;  %v6632_v12 = vld [vmem:[%s7985_s10 + $0xdc8] sm:$0xf] }
 0x23b   : > { %v4003_v19 = vadd.f32 %v4002_v15, %v3990_v14  ;;  %v7357_v14 = vld [vmem:[%s7985_s10 + $0xdd4] sm:$0xf0]  ;;  %v6760_v15 = vld [vmem:[%s7985_s10 + $0xec8] sm:$0xf] }
 0x23c   : > { %v4017_v21 = vpop.f32.mrf.mxu0  ;;  %v7389_v16 = vld [vmem:[%s7985_s10 + $0xed4] sm:$0xf0]  ;;  %v6888_v17 = vld [vmem:[%s7985_s10 + $0xfc8] sm:$0xf] }
 0x23d   : > { %4229 = vmatpush.bf16.msra.mxu1 %v5977_v61  ;;  %4242 = vmatpush.bf16.msra.mxu2 %v6105_v28  ;;  %v7209_v61 = vld [vmem:[%s7985_s10 + $0x934] sm:$0xf0]  ;;  %v6168_v28 = vld [vmem:[%s7985_s10 + $0xa28] sm:$0xf] }
 0x23e   : > { %4255 = vmatpush.bf16.msra.mxu3 %v6233_v33  ;;  %4268 = vmatpush.bf16.msrb.mxu0 %v6361_v34  ;;  %v7273_v33 = vld [vmem:[%s7985_s10 + $0xb34] sm:$0xf0]  ;;  %v8793_v34 = vadd.f32 %v4015_v45, %v4003_v19  ;;  %v6041_v37 = vor.u32 %v7209_v61, %v6040_v27  ;;  %v6169_v43 = vor.u32 %v7241_v30, %v6168_v28  ;;  %v6488_v21 = vld [vmem:[%s7985_s10 + $0xca8] sm:$0xf] }
 0x23f   : > { %v6297_v44 = vor.u32 %v7273_v33, %v6296_v31  ;;  %v3991_v45 = vpop.f32.mrf.mxu2  ;;  %v7421_v18 = vld [vmem:[%s7985_s10 + $0xfd4] sm:$0xf0]  ;;  %v6633_v19 = vor.u32 %v7357_v14, %v6632_v12  ;;  %v7537_v27 = vld [vmem:[#allocation1] sm:$0xff]  ;;  %v7538_v61 = vld [vmem:[#allocation1 + $0x9] sm:$0xff] }
 0x240   : > { %v6889_v24 = vor.u32 %v7421_v18, %v6888_v17  ;;  %v7385_v28 = vld [vmem:[%s7985_s10 + $0xeb4] sm:$0xf0]  ;;  %v6872_v30 = vld [vmem:[%s7985_s10 + $0xfa8] sm:$0xf] }
 0x241   : > { %4230 = vmatpush.bf16.msra.mxu1 %v5961_v46  ;;  %4243 = vmatpush.bf16.msra.mxu2 %v6089_v13  ;;  %v6152_v46 = vld [vmem:[%s7985_s10 + $0xa08] sm:$0xf]  ;;  %v7237_v13 = vld [vmem:[%s7985_s10 + $0xa14] sm:$0xf0] }
 0x242   : > { %4256 = vmatpush.bf16.msra.mxu3 %v6217_v7  ;;  %4269 = vmatpush.bf16.msrb.mxu0 %v6345_v39  ;;  %v4004_v48 = vpop.f32.mrf.mxu3  ;;  %v7269_v7 = vld [vmem:[%s7985_s10 + $0xb14] sm:$0xf0]  ;;  %v6520_v39 = vld [vmem:[%s7985_s10 + $0xce8] sm:$0xf] }
 0x243   : > { %v6281_v4 = vor.u32 %v7269_v7, %v6280_v47  ;;  %v6521_v6 = vor.u32 %v7329_v49, %v6520_v39  ;;  %v7417_v31 = vld [vmem:[%s7985_s10 + $0xfb4] sm:$0xf0]  ;;  %v6856_v47 = vld [vmem:[%s7985_s10 + $0xf88] sm:$0xf] }
 0x244   : > { %v7539_v33 = vld [vmem:[#allocation1 + $0x12] sm:$0xff]  ;;  %v6456_v52 = vld [vmem:[%s7985_s10 + $0xc68] sm:$0xf] }
 0x245   : > { %4231 = vmatpush.bf16.msra.mxu1 %v5945_v60  ;;  %4244 = vmatpush.bf16.msra.mxu2 %v6073_v3  ;;  %v7425_v60 = vld [vmem:[%s7985_s10 + $0xff4] sm:$0xf0]  ;;  %v6153_v3 = vor.u32 %v7237_v13, %v6152_v46  ;;  %v6728_v46 = vld [vmem:[%s7985_s10 + $0xe88] sm:$0xf] }
 0x246   : > { %4257 = vmatpush.bf16.msra.mxu3 %v6201_v8  ;;  %4270 = vmatpush.bf16.msrb.mxu0 %v6329_v42  ;;  %v6649_v8 = vor.u32 %v7361_v51, %v6648_v50  ;;  %v6504_v42 = vld [vmem:[%s7985_s10 + $0xcc8] sm:$0xf]  ;;  %v6905_v11 = vor.u32 %v7425_v60, %v6904_v56  ;;  %v7317_v38 = vld [vmem:[%s7985_s10 + $0xc94] sm:$0xf0] }
 0x247   : > { %v6505_v20 = vor.u32 %v7325_v9, %v6504_v42  ;;  %v7349_v45 = vld [vmem:[%s7985_s10 + $0xd94] sm:$0xf0]  ;;  %v6473_v50 = vor.u32 %v7317_v38, %v6472_v5  ;;  %v6584_v56 = vld [vmem:[%s7985_s10 + $0xd68] sm:$0xf] }
 0x248   : > { %v7381_v13 = vld [vmem:[%s7985_s10 + $0xe94] sm:$0xf0]  ;;  %v6440_v9 = vld [vmem:[%s7985_s10 + $0xc48] sm:$0xf] }
 0x249   : > { %4232 = vmatpush.bf16.msra.mxu1 %v5929_v22  ;;  %4245 = vmatpush.bf16.msra.mxu2 %v6057_v23  ;;  %v7321_v22 = vld [vmem:[%s7985_s10 + $0xcb4] sm:$0xf0]  ;;  %v6761_v23 = vor.u32 %v7389_v16, %v6760_v15  ;;  %v6568_v15 = vld [vmem:[%s7985_s10 + $0xd48] sm:$0xf] }
 0x24a   : > { %4258 = vmatpush.bf16.msra.mxu3 %v6185_v25  ;;  %4271 = vmatpush.bf16.msrb.mxu0 %v6313_v26  ;;  %v7353_v25 = vld [vmem:[%s7985_s10 + $0xdb4] sm:$0xf0]  ;;  %v6744_v26 = vld [vmem:[%s7985_s10 + $0xea8] sm:$0xf] }
 0x24b   : > { %v6745_v40 = vor.u32 %v7385_v28, %v6744_v26  ;;  %v7413_v48 = vld [vmem:[%s7985_s10 + $0xf94] sm:$0xf0]  ;;  %v6696_v17 = vld [vmem:[%s7985_s10 + $0xe48] sm:$0xf] }
 0x24c   : > { %v6857_v32 = vor.u32 %v7413_v48, %v6856_v47  ;;  %v7345_v60 = vld [vmem:[%s7985_s10 + $0xd74] sm:$0xf0] }
 0x24d   : > { %4233 = vmatpush.bf16.msra.mxu1 %v5913_v36  ;;  %4246 = vmatpush.bf16.msra.mxu2 %v6041_v37  ;;  %v6489_v36 = vor.u32 %v7321_v22, %v6488_v21  ;;  %v6617_v37 = vor.u32 %v7353_v25, %v6616_v41  ;;  %v6585_v42 = vor.u32 %v7345_v60, %v6584_v56  ;;  %v7341_v16 = vld [vmem:[%s7985_s10 + $0xd54] sm:$0xf0]  ;;  %v6824_v21 = vld [vmem:[%s7985_s10 + $0xf48] sm:$0xf]  ;;  %v5114_v56 = vld [vmem:[%s7985_s10 + $0x1f8] sm:$0xf0] }
 0x24e   : > { %4259 = vmatpush.bf16.msra.mxu3 %v6169_v43  ;;  %4272 = vmatpush.bf16.msrb.mxu0 %v6297_v44  ;;  %v6873_v43 = vor.u32 %v7417_v31, %v6872_v30  ;;  %v6600_v44 = vld [vmem:[%s7985_s10 + $0xd88] sm:$0xf]  ;;  %v7405_v22 = vld [vmem:[%s7985_s10 + $0xf54] sm:$0xf0]  ;;  %v6569_v26 = vor.u32 %v7341_v16, %v6568_v15  ;;  %v7007_v60 = vld [vmem:[%s7985_s10 + $0x2ec] sm:$0xf] }
 0x24f   : > { %v6601_v51 = vor.u32 %v7349_v45, %v6600_v44  ;;  %v6825_v30 = vor.u32 %v7405_v22, %v6824_v21  ;;  %v6552_v31 = vld [vmem:[%s7985_s10 + $0xd28] sm:$0xf]  ;;  %v7401_v5 = vld [vmem:[%s7985_s10 + $0xf34] sm:$0xf0]  ;;  %v7035_v21 = vld [vmem:[%s7985_s10 + $0x3cc] sm:$0xf] }
 0x250   : > { %v7301_v45 = vld [vmem:[%s7985_s10 + $0xc14] sm:$0xf0]  ;;  %v5354_v22 = vld [vmem:[%s7985_s10 + $0x3d8] sm:$0xf0] }
 0x251   : > { %4234 = vmatpush.bf16.msra.mxu1 %v5897_v53  ;;  %4247 = vmatpush.bf16.msra.mxu2 %v6025_v55  ;;  %v4028_v7 = vpop.f32.mrf.mxu1  ;;  %v7313_v53 = vld [vmem:[%s7985_s10 + $0xc74] sm:$0xf0]  ;;  %v6729_v55 = vor.u32 %v7381_v13, %v6728_v46  ;;  %v6536_v46 = vld [vmem:[%s7985_s10 + $0xd08] sm:$0xf] }
 0x252   : > { %4260 = vmatpush.bf16.msra.mxu3 %v6153_v3  ;;  %4273 = vmatpush.bf16.msrb.mxu0 %v6281_v4  ;;  %v4029_v39 = vadd.f32 %v4028_v7, %v8793_v34  ;;  %v6712_v3 = vld [vmem:[%s7985_s10 + $0xe68] sm:$0xf]  ;;  %v7377_v4 = vld [vmem:[%s7985_s10 + $0xe74] sm:$0xf0] }
 0x253   : > { %v7409_v34 = vld [vmem:[%s7985_s10 + $0xf74] sm:$0xf0] }
 0x254   : > { %4235 = vmatmul.bf16.vlgmr.msra.gmra.mxu1 %v7537_v27  ;;  %4248 = vmatmul.bf16.vlgmr.msra.gmra.mxu2 %v7538_v61  ;;  %v4067_v49 = vpop.f32.mrf.mxu0  ;;  %v6424_v27 = vld [vmem:[%s7985_s10 + $0xc28] sm:$0xf]  ;;  %v7305_v61 = vld [vmem:[%s7985_s10 + $0xc34] sm:$0xf0] }
 0x255   : > { %4279 = vmatpush.bf16.msrb.mxu1 %v6521_v6  ;;  %4292 = vmatpush.bf16.msrb.mxu2 %v6649_v8  ;;  %v6840_v6 = vld [vmem:[%s7985_s10 + $0xf68] sm:$0xf]  ;;  %v6457_v8 = vor.u32 %v7313_v53, %v6456_v52  ;;  %v7333_v13 = vld [vmem:[%s7985_s10 + $0xd14] sm:$0xf0]  ;;  %v6943_v53 = vld [vmem:[%s7985_s10 + $0xec] sm:$0xf] }
 0x256   : > { %4305 = vmatpush.bf16.msrb.mxu3 %v6777_v10  ;;  %4318 = vmatpush.bf16.msra.mxu0 %v6905_v11  ;;  %v7309_v10 = vld [vmem:[%s7985_s10 + $0xc54] sm:$0xf0]  ;;  %v6713_v11 = vor.u32 %v7377_v4, %v6712_v3  ;;  %v6841_v12 = vor.u32 %v7409_v34, %v6840_v6  ;;  %v6537_v4 = vor.u32 %v7333_v13, %v6536_v46  ;;  %v5242_v6 = vld [vmem:[%s7985_s10 + $0x2f8] sm:$0xf0]  ;;  %v7039_v34 = vld [vmem:[%s7985_s10 + $0x3ec] sm:$0xf] }
 0x257   : > { %4261 = vmatmul.bf16.vlgmr.msra.gmra.mxu3 %v7539_v33  ;;  %4274 = vmatmul.bf16.vlgmr.msrb.gmra.mxu0 %v7540_v35  ;;  %v4041_v14 = vpop.f32.mrf.mxu2  ;;  %v6441_v25 = vor.u32 %v7309_v10, %v6440_v9  ;;  %v7337_v33 = vld [vmem:[%s7985_s10 + $0xd34] sm:$0xf0]  ;;  %v6680_v35 = vld [vmem:[%s7985_s10 + $0xe28] sm:$0xf]  ;;  %v5245_v15 = vor.u32 %v7007_v60, %v5242_v6  ;;  %v4938_v46 = vld [vmem:[%s7985_s10 + $0x98] sm:$0xf0] }
 0x258   : > { %v4042_v18 = vadd.f32 %v4041_v14, %v4029_v39  ;;  %v6553_v44 = vor.u32 %v7337_v33, %v6552_v31  ;;  %v6664_v39 = vld [vmem:[%s7985_s10 + $0xe08] sm:$0xf]  ;;  %v7397_v52 = vld [vmem:[%s7985_s10 + $0xf14] sm:$0xf0]  ;;  %v4970_v14 = vld [vmem:[%s7985_s10 + $0xd8] sm:$0xf0] }
 0x259   : > { %4280 = vmatpush.bf16.msrb.mxu1 %v6505_v20  ;;  %4293 = vmatpush.bf16.msrb.mxu2 %v6633_v19  ;;  %v7373_v19 = vld [vmem:[%s7985_s10 + $0xe54] sm:$0xf0]  ;;  %v7541_v31 = vld [vmem:[#allocation1 + $0x24] sm:$0xff]  ;;  %v7542_v33 = vld [vmem:[#allocation1 + $0x2d] sm:$0xff] }
 0x25a   : > { %4306 = vmatpush.bf16.msrb.mxu3 %v6761_v23  ;;  %4319 = vmatpush.bf16.msra.mxu0 %v6889_v24  ;;  %v4054_v20 = vpop.f32.mrf.mxu3  ;;  %v4030_v23 = vpop.f32.mrf.mxu1  ;;  %v6697_v28 = vor.u32 %v7373_v19, %v6696_v17  ;;  %v6971_v17 = vld [vmem:[%s7985_s10 + $0x1cc] sm:$0xf]  ;;  %v5226_v19 = vld [vmem:[%s7985_s10 + $0x2d8] sm:$0xf0] }
 0x25b   : > { %v4055_v24 = vadd.f32 %v4054_v20, %v4042_v18  ;;  %v5098_v18 = vld [vmem:[%s7985_s10 + $0x1d8] sm:$0xf0]  ;;  %v7003_v20 = vld [vmem:[%s7985_s10 + $0x2cc] sm:$0xf] }
 0x25c   : > { %v4069_v41 = vpop.f32.mrf.mxu0  ;;  %v6927_v60 = vld [vmem:[%s7985_s10 + $0x6c] sm:$0xf] }
 0x25d   : > { %4281 = vmatpush.bf16.msrb.mxu1 %v6489_v36  ;;  %4294 = vmatpush.bf16.msrb.mxu2 %v6617_v37  ;;  %v7369_v36 = vld [vmem:[%s7985_s10 + $0xe34] sm:$0xf0]  ;;  %v6808_v37 = vld [vmem:[%s7985_s10 + $0xf28] sm:$0xf]  ;;  %v8860_v38 = vadd.f32 %v4067_v49, %v4055_v24  ;;  %v5101_v24 = vor.u32 %v6971_v17, %v5098_v18  ;;  %v6935_v41 = vld [vmem:[%s7985_s10 + $0xac] sm:$0xf] }
 0x25e   : > { %4307 = vmatpush.bf16.msrb.mxu3 %v6745_v40  ;;  %4320 = vmatpush.bf16.msra.mxu0 %v6873_v43  ;;  %v6408_v40 = vld [vmem:[%s7985_s10 + $0xc08] sm:$0xf]  ;;  %v6425_v43 = vor.u32 %v7305_v61, %v6424_v27  ;;  %v6681_v47 = vor.u32 %v7369_v36, %v6680_v35  ;;  %v6809_v48 = vor.u32 %v7401_v5, %v6808_v37  ;;  %v7365_v49 = vld [vmem:[%s7985_s10 + $0xe14] sm:$0xf0]  ;;  %v6967_v61 = vld [vmem:[%s7985_s10 + $0x1ac] sm:$0xf] }
 0x25f   : > { %v4043_v7 = vpop.f32.mrf.mxu2  ;;  %v6409_v3 = vor.u32 %v7301_v45, %v6408_v40  ;;  %v5357_v27 = vor.u32 %v7035_v21, %v5354_v22  ;;  %v5210_v35 = vld [vmem:[%s7985_s10 + $0x2b8] sm:$0xf0]  ;;  %v7031_v36 = vld [vmem:[%s7985_s10 + $0x3ac] sm:$0xf]  ;;  %v7544_v40 = vld [vmem:[#allocation1 + $0x3f] sm:$0xff] }
 0x260   : > { %v5338_v37 = vld [vmem:[%s7985_s10 + $0x3b8] sm:$0xf0]  ;;  %v6931_v45 = vld [vmem:[%s7985_s10 + $0x8c] sm:$0xf] }
 0x261   : > { %4282 = vmatpush.bf16.msrb.mxu1 %v6473_v50  ;;  %4295 = vmatpush.bf16.msrb.mxu2 %v6601_v51  ;;  %v6792_v50 = vld [vmem:[%s7985_s10 + $0xf08] sm:$0xf]  ;;  %v7543_v5 = vld [vmem:[#allocation1 + $0x36] sm:$0xff]  ;;  %v6987_v21 = vld [vmem:[%s7985_s10 + $0x24c] sm:$0xf] }
 0x262   : > { %4308 = vmatpush.bf16.msrb.mxu3 %v6729_v55  ;;  %4321 = vmatpush.bf16.msra.mxu0 %v6857_v32  ;;  %v4056_v51 = vpop.f32.mrf.mxu3  ;;  %v4986_v55 = vld [vmem:[%s7985_s10 + $0xf8] sm:$0xf0]  ;;  %v6975_v32 = vld [vmem:[%s7985_s10 + $0x1ec] sm:$0xf]  ;;  %v6793_v9 = vor.u32 %v7397_v52, %v6792_v50 }
 0x263   : > { %v4989_v10 = vor.u32 %v6943_v53, %v4986_v55  ;;  %v5066_v7 = vld [vmem:[%s7985_s10 + $0x198] sm:$0xf0]  ;;  %v7027_v50 = vld [vmem:[%s7985_s10 + $0x38c] sm:$0xf] }
 0x264   : > { %v5322_v51 = vld [vmem:[%s7985_s10 + $0x398] sm:$0xf0] }
 0x265   : > { %4283 = vmatpush.bf16.msrb.mxu1 %v6457_v8  ;;  %4296 = vmatpush.bf16.msrb.mxu2 %v6585_v42  ;;  %v5370_v8 = vld [vmem:[%s7985_s10 + $0x3f8] sm:$0xf0]  ;;  %v6665_v42 = vor.u32 %v7365_v49, %v6664_v39  ;;  %v6995_v39 = vld [vmem:[%s7985_s10 + $0x28c] sm:$0xf]  ;;  %v5325_v6 = vor.u32 %v7027_v50, %v5322_v51 }
 0x266   : > { %4309 = vmatpush.bf16.msrb.mxu3 %v6713_v11  ;;  %4322 = vmatpush.bf16.msra.mxu0 %v6841_v12  ;;  %v5117_v11 = vor.u32 %v6975_v32, %v5114_v56  ;;  %v6939_v12 = vld [vmem:[%s7985_s10 + $0xcc] sm:$0xf]  ;;  %v5373_v16 = vor.u32 %v7039_v34, %v5370_v8  ;;  %v5194_v49 = vld [vmem:[%s7985_s10 + $0x298] sm:$0xf0]  ;;  %v4941_v32 = vor.u32 %v6931_v45, %v4938_v46 }
 0x267   : > { %v4973_v23 = vor.u32 %v6939_v12, %v4970_v14  ;;  %v6959_v34 = vld [vmem:[%s7985_s10 + $0x16c] sm:$0xf]  ;;  %v5050_v8 = vld [vmem:[%s7985_s10 + $0x178] sm:$0xf0] }
 0x268   : > { %v5053_v12 = vor.u32 %v6959_v34, %v5050_v8  ;;  %v6923_v14 = vld [vmem:[%s7985_s10 + $0x4c] sm:$0xf]  ;;  %v5274_v46 = vld [vmem:[%s7985_s10 + $0x338] sm:$0xf0] }
 0x269   : > { %4284 = vmatpush.bf16.msrb.mxu1 %v6441_v25  ;;  %4297 = vmatpush.bf16.msrb.mxu2 %v6569_v26  ;;  %v4954_v25 = vld [vmem:[%s7985_s10 + $0xb8] sm:$0xf0]  ;;  %v5229_v26 = vor.u32 %v7003_v20, %v5226_v19  ;;  %v6955_v20 = vld [vmem:[%s7985_s10 + $0x14c] sm:$0xf] }
 0x26a   : > { %4310 = vmatpush.bf16.msrb.mxu3 %v6697_v28  ;;  %4323 = vmatpush.bf16.msra.mxu0 %v6825_v30  ;;  %v5082_v28 = vld [vmem:[%s7985_s10 + $0x1b8] sm:$0xf0]  ;;  %v6999_v30 = vld [vmem:[%s7985_s10 + $0x2ac] sm:$0xf] }
 0x26b   : > { %v5213_v13 = vor.u32 %v6999_v30, %v5210_v35  ;;  %v5034_v19 = vld [vmem:[%s7985_s10 + $0x158] sm:$0xf0]  ;;  %v7015_v45 = vld [vmem:[%s7985_s10 + $0x32c] sm:$0xf] }
 0x26c   : > { %v5037_v30 = vor.u32 %v6955_v20, %v5034_v19  ;;  %v5277_v51 = vor.u32 %v7015_v45, %v5274_v46  ;;  %v5626_v34 = vld [vmem:[%s7985_s10 + $0x5f8] sm:$0xf0]  ;;  %v7135_v8 = vld [vmem:[%s7985_s10 + $0x6ec] sm:$0xf] }
 0x26d   : > { %4285 = vmatpush.bf16.msrb.mxu1 %v6425_v43  ;;  %4298 = vmatpush.bf16.msrb.mxu2 %v6553_v44  ;;  %v4957_v43 = vor.u32 %v6935_v41, %v4954_v25  ;;  %v5085_v44 = vor.u32 %v6967_v61, %v5082_v28  ;;  %v7019_v41 = vld [vmem:[%s7985_s10 + $0x34c] sm:$0xf]  ;;  %v5290_v25 = vld [vmem:[%s7985_s10 + $0x358] sm:$0xf0] }
 0x26e   : > { %4311 = vmatpush.bf16.msrb.mxu3 %v6681_v47  ;;  %4324 = vmatpush.bf16.msra.mxu0 %v6809_v48  ;;  %v5341_v47 = vor.u32 %v7031_v36, %v5338_v37  ;;  %v6963_v48 = vld [vmem:[%s7985_s10 + $0x18c] sm:$0xf]  ;;  %v5293_v36 = vor.u32 %v7019_v41, %v5290_v25  ;;  %v5866_v25 = vld [vmem:[%s7985_s10 + $0x7d8] sm:$0xf0] }
 0x26f   : > { %v5069_v56 = vor.u32 %v6963_v48, %v5066_v7  ;;  %v6951_v37 = vld [vmem:[%s7985_s10 + $0x12c] sm:$0xf]  ;;  %v4874_v7 = vld [vmem:[%s7985_s10 + $0x18] sm:$0xf0] }
 0x270   : > { %v7163_v41 = vld [vmem:[%s7985_s10 + $0x7cc] sm:$0xf]  ;;  %v5450_v46 = vld [vmem:[%s7985_s10 + $0x498] sm:$0xf0] }
 0x271   : > { %4286 = vmatpush.bf16.msrb.mxu1 %v6409_v3  ;;  %4299 = vmatpush.bf16.msrb.mxu2 %v6537_v4  ;;  %v4080_v52 = vpop.f32.mrf.mxu1  ;;  %v4922_v3 = vld [vmem:[%s7985_s10 + $0x78] sm:$0xf0]  ;;  %v5197_v4 = vor.u32 %v6995_v39, %v5194_v49  ;;  %v6947_v39 = vld [vmem:[%s7985_s10 + $0x10c] sm:$0xf] }
 0x272   : > { %4312 = vmatpush.bf16.msrb.mxu3 %v6665_v42  ;;  %4325 = vmatpush.bf16.msra.mxu0 %v6793_v9  ;;  %v4081_v53 = vadd.f32 %v4080_v52, %v8860_v38  ;;  %v6991_v42 = vld [vmem:[%s7985_s10 + $0x26c] sm:$0xf]  ;;  %v5178_v9 = vld [vmem:[%s7985_s10 + $0x278] sm:$0xf0] }
 0x273   : > { %v5306_v38 = vld [vmem:[%s7985_s10 + $0x378] sm:$0xf0] }
 0x274   : > { %4287 = vmatmul.bf16.vlgmr.msrb.gmra.mxu1 %v7541_v31  ;;  %4300 = vmatmul.bf16.vlgmr.msrb.gmra.mxu2 %v7542_v33  ;;  %v4119_v55 = vpop.f32.mrf.mxu0  ;;  %v6919_v31 = vld [vmem:[%s7985_s10 + $0x2c] sm:$0xf]  ;;  %v4890_v33 = vld [vmem:[%s7985_s10 + $0x38] sm:$0xf0] }
 0x275   : > { %4331 = vmatpush.bf16.msra.mxu1 %v4989_v10  ;;  %4344 = vmatpush.bf16.msra.mxu2 %v5117_v11  ;;  %v7023_v10 = vld [vmem:[%s7985_s10 + $0x36c] sm:$0xf]  ;;  %v4925_v11 = vor.u32 %v6927_v60, %v4922_v3  ;;  %v5002_v49 = vld [vmem:[%s7985_s10 + $0x118] sm:$0xf0] }
 0x276   : > { %4357 = vmatpush.bf16.msra.mxu3 %v5245_v15  ;;  %4370 = vmatpush.bf16.msrb.mxu0 %v5373_v16  ;;  %v4906_v15 = vld [vmem:[%s7985_s10 + $0x58] sm:$0xf0]  ;;  %v5181_v16 = vor.u32 %v6991_v42, %v5178_v9  ;;  %v5309_v17 = vor.u32 %v7023_v10, %v5306_v38  ;;  %v7071_v3 = vld [vmem:[%s7985_s10 + $0x4ec] sm:$0xf]  ;;  %v5005_v9 = vor.u32 %v6947_v39, %v5002_v49 }
 0x277   : > { %4313 = vmatmul.bf16.vlgmr.msrb.gmra.mxu3 %v7543_v5  ;;  %4326 = vmatmul.bf16.vlgmr.msra.gmra.mxu0 %v7544_v40  ;;  %v4093_v18 = vpop.f32.mrf.mxu2  ;;  %v4909_v28 = vor.u32 %v6923_v14, %v4906_v15  ;;  %v5018_v5 = vld [vmem:[%s7985_s10 + $0x138] sm:$0xf0]  ;;  %v6983_v40 = vld [vmem:[%s7985_s10 + $0x22c] sm:$0xf] }
 0x278   : > { %v4094_v22 = vadd.f32 %v4093_v18, %v4081_v53  ;;  %v5021_v48 = vor.u32 %v6951_v37, %v5018_v5  ;;  %v6979_v53 = vld [vmem:[%s7985_s10 + $0x20c] sm:$0xf]  ;;  %v5258_v60 = vld [vmem:[%s7985_s10 + $0x318] sm:$0xf0] }
 0x279   : > { %4332 = vmatpush.bf16.msra.mxu1 %v4973_v23  ;;  %4345 = vmatpush.bf16.msra.mxu2 %v5101_v24  ;;  %v5162_v24 = vld [vmem:[%s7985_s10 + $0x258] sm:$0xf0]  ;;  %v7167_v38 = vld [vmem:[%s7985_s10 + $0x7ec] sm:$0xf] }
 0x27a   : > { %4358 = vmatpush.bf16.msra.mxu3 %v5229_v26  ;;  %4371 = vmatpush.bf16.msrb.mxu0 %v5357_v27  ;;  %v4106_v23 = vpop.f32.mrf.mxu3  ;;  %v4082_v26 = vpop.f32.mrf.mxu1  ;;  %v5165_v35 = vor.u32 %v6987_v21, %v5162_v24  ;;  %v5754_v10 = vld [vmem:[%s7985_s10 + $0x6f8] sm:$0xf0]  ;;  %v7099_v21 = vld [vmem:[%s7985_s10 + $0x5cc] sm:$0xf] }
 0x27b   : > { %v4107_v27 = vadd.f32 %v4106_v23, %v4094_v22  ;;  %v5482_v18 = vld [vmem:[%s7985_s10 + $0x4d8] sm:$0xf0]  ;;  %v5757_v20 = vor.u32 %v7135_v8, %v5754_v10  ;;  %v7131_v23 = vld [vmem:[%s7985_s10 + $0x6cc] sm:$0xf] }
 0x27c   : > { %v4121_v61 = vpop.f32.mrf.mxu0  ;;  %v5610_v22 = vld [vmem:[%s7985_s10 + $0x5d8] sm:$0xf0]  ;;  %v7159_v5 = vld [vmem:[%s7985_s10 + $0x7ac] sm:$0xf] }
 0x27d   : > { %4333 = vmatpush.bf16.msra.mxu1 %v4957_v43  ;;  %4346 = vmatpush.bf16.msra.mxu2 %v5085_v44  ;;  %v8924_v43 = vadd.f32 %v4119_v55, %v4107_v27  ;;  %v5146_v44 = vld [vmem:[%s7985_s10 + $0x238] sm:$0xf0]  ;;  %v5613_v27 = vor.u32 %v7099_v21, %v5610_v22  ;;  %v7063_v61 = vld [vmem:[%s7985_s10 + $0x4ac] sm:$0xf] }
 0x27e   : > { %4359 = vmatpush.bf16.msra.mxu3 %v5213_v13  ;;  %4372 = vmatpush.bf16.msrb.mxu0 %v5341_v47  ;;  %v6915_v13 = vld [vmem:[%s7985_s10 + $0xc] sm:$0xf]  ;;  %v4893_v47 = vor.u32 %v6919_v31, %v4890_v33  ;;  %v5149_v50 = vor.u32 %v6983_v40, %v5146_v44  ;;  %v5130_v55 = vld [vmem:[%s7985_s10 + $0x218] sm:$0xf0]  ;;  %v5869_v31 = vor.u32 %v7163_v41, %v5866_v25 }
 0x27f   : > { %v4095_v52 = vpop.f32.mrf.mxu2  ;;  %v4877_v42 = vor.u32 %v6915_v13, %v4874_v7  ;;  %v5738_v24 = vld [vmem:[%s7985_s10 + $0x6d8] sm:$0xf0]  ;;  %v7095_v33 = vld [vmem:[%s7985_s10 + $0x5ac] sm:$0xf] }
 0x280   : > { %v5722_v37 = vld [vmem:[%s7985_s10 + $0x6b8] sm:$0xf0]  ;;  %v7123_v7 = vld [vmem:[%s7985_s10 + $0x68c] sm:$0xf] }
 0x281   : > { %4334 = vmatpush.bf16.msra.mxu1 %v4941_v32  ;;  %4347 = vmatpush.bf16.msra.mxu2 %v5069_v56  ;;  %v7011_v32 = vld [vmem:[%s7985_s10 + $0x30c] sm:$0xf]  ;;  %v5850_v40 = vld [vmem:[%s7985_s10 + $0x7b8] sm:$0xf0] }
 0x282   : > { %4360 = vmatpush.bf16.msra.mxu3 %v5197_v4  ;;  %4373 = vmatpush.bf16.msrb.mxu0 %v5325_v6  ;;  %v4108_v56 = vpop.f32.mrf.mxu3  ;;  %v5498_v4 = vld [vmem:[%s7985_s10 + $0x4f8] sm:$0xf0]  ;;  %v7103_v6 = vld [vmem:[%s7985_s10 + $0x5ec] sm:$0xf]  ;;  %v5261_v14 = vor.u32 %v7011_v32, %v5258_v60  ;;  %v5853_v13 = vor.u32 %v7159_v5, %v5850_v40 }
 0x283   : > { %v5501_v15 = vor.u32 %v7071_v3, %v5498_v4  ;;  %v7155_v39 = vld [vmem:[%s7985_s10 + $0x78c] sm:$0xf]  ;;  %v5434_v32 = vld [vmem:[%s7985_s10 + $0x478] sm:$0xf0] }
 0x284   : > { %v7087_v3 = vld [vmem:[%s7985_s10 + $0x56c] sm:$0xf]  ;;  %v5562_v4 = vld [vmem:[%s7985_s10 + $0x578] sm:$0xf0] }
 0x285   : > { %4335 = vmatpush.bf16.msra.mxu1 %v4925_v11  ;;  %4348 = vmatpush.bf16.msra.mxu2 %v5053_v12  ;;  %v5882_v11 = vld [vmem:[%s7985_s10 + $0x7f8] sm:$0xf0]  ;;  %v5133_v12 = vor.u32 %v6979_v53, %v5130_v55  ;;  %v7055_v55 = vld [vmem:[%s7985_s10 + $0x46c] sm:$0xf]  ;;  %v5565_v10 = vor.u32 %v7087_v3, %v5562_v4 }
 0x286   : > { %4361 = vmatpush.bf16.msra.mxu3 %v5181_v16  ;;  %4374 = vmatpush.bf16.msrb.mxu0 %v5309_v17  ;;  %v5629_v16 = vor.u32 %v7103_v6, %v5626_v34  ;;  %v7067_v17 = vld [vmem:[%s7985_s10 + $0x4cc] sm:$0xf]  ;;  %v5885_v19 = vor.u32 %v7167_v38, %v5882_v11  ;;  %v5690_v34 = vld [vmem:[%s7985_s10 + $0x678] sm:$0xf0] }
 0x287   : > { %v5485_v26 = vor.u32 %v7067_v17, %v5482_v18  ;;  %v7119_v6 = vld [vmem:[%s7985_s10 + $0x66c] sm:$0xf]  ;;  %v5418_v11 = vld [vmem:[%s7985_s10 + $0x458] sm:$0xf0] }
 0x288   : > { %v7151_v8 = vld [vmem:[%s7985_s10 + $0x76c] sm:$0xf]  ;;  %v5546_v17 = vld [vmem:[%s7985_s10 + $0x558] sm:$0xf0] }
 0x289   : > { %4336 = vmatpush.bf16.msra.mxu1 %v4909_v28  ;;  %4349 = vmatpush.bf16.msra.mxu2 %v5037_v30  ;;  %v5466_v28 = vld [vmem:[%s7985_s10 + $0x4b8] sm:$0xf0]  ;;  %v5741_v30 = vor.u32 %v7131_v23, %v5738_v24  ;;  %v7051_v38 = vld [vmem:[%s7985_s10 + $0x44c] sm:$0xf] }
 0x28a   : > { %4362 = vmatpush.bf16.msra.mxu3 %v5165_v35  ;;  %4375 = vmatpush.bf16.msrb.mxu0 %v5293_v36  ;;  %v5594_v35 = vld [vmem:[%s7985_s10 + $0x5b8] sm:$0xf0]  ;;  %v7127_v36 = vld [vmem:[%s7985_s10 + $0x6ac] sm:$0xf]  ;;  %v5469_v44 = vor.u32 %v7063_v61, %v5466_v28 }
 0x28b   : > { %v5597_v45 = vor.u32 %v7095_v33, %v5594_v35  ;;  %v7115_v18 = vld [vmem:[%s7985_s10 + $0x64c] sm:$0xf]  ;;  %v5674_v21 = vld [vmem:[%s7985_s10 + $0x658] sm:$0xf0] }
 0x28c   : > { %v7147_v22 = vld [vmem:[%s7985_s10 + $0x74c] sm:$0xf]  ;;  %v5802_v23 = vld [vmem:[%s7985_s10 + $0x758] sm:$0xf0] }
 0x28d   : > { %4337 = vmatpush.bf16.msra.mxu1 %v4893_v47  ;;  %4350 = vmatpush.bf16.msra.mxu2 %v5021_v48  ;;  %v7091_v47 = vld [vmem:[%s7985_s10 + $0x58c] sm:$0xf]  ;;  %v5578_v48 = vld [vmem:[%s7985_s10 + $0x598] sm:$0xf0] }
 0x28e   : > { %4363 = vmatpush.bf16.msra.mxu3 %v5149_v50  ;;  %4376 = vmatpush.bf16.msrb.mxu0 %v5277_v51  ;;  %v1105_v50 = vperm.slane %v8734_v54, 2  ;;  %v5581_v53 = vor.u32 %v7091_v47, %v5578_v48  ;;  %v5818_v54 = vld [vmem:[%s7985_s10 + $0x778] sm:$0xf0]  ;;  %v7047_v61 = vld [vmem:[%s7985_s10 + $0x42c] sm:$0xf] }
 0x28f   : > { %v5402_v28 = vld [vmem:[%s7985_s10 + $0x438] sm:$0xf0]  ;;  %v7079_v33 = vld [vmem:[%s7985_s10 + $0x52c] sm:$0xf] }
 0x290   : > { %v5530_v35 = vld [vmem:[%s7985_s10 + $0x538] sm:$0xf0]  ;;  %v7143_v5 = vld [vmem:[%s7985_s10 + $0x72c] sm:$0xf] }
 0x291   : > { %4338 = vmatpush.bf16.msra.mxu1 %v4877_v42  ;;  %4351 = vmatpush.bf16.msra.mxu2 %v5005_v9  ;;  %v4132_v49 = vpop.f32.mrf.mxu1  ;;  %v5437_v9 = vor.u32 %v7055_v55, %v5434_v32  ;;  %v5786_v40 = vld [vmem:[%s7985_s10 + $0x738] sm:$0xf0]  ;;  %v7231_v55 = vld [vmem:[%s7985_s10 + $0x9ec] sm:$0xf] }
 0x292   : > { %4364 = vmatpush.bf16.msra.mxu3 %v5133_v12  ;;  %4377 = vmatpush.bf16.msrb.mxu0 %v5261_v14  ;;  %v4133_v42 = vadd.f32 %v4132_v49, %v1105_v50  ;;  %v5693_v12 = vor.u32 %v7119_v6, %v5690_v34  ;;  %v5821_v14 = vor.u32 %v7151_v8, %v5818_v54  ;;  %v5514_v47 = vld [vmem:[%s7985_s10 + $0x518] sm:$0xf0]  ;;  %v7139_v49 = vld [vmem:[%s7985_s10 + $0x70c] sm:$0xf] }
 0x293   : > { %v6138_v32 = vld [vmem:[%s7985_s10 + $0x9f8] sm:$0xf0]  ;;  %v7295_v6 = vld [vmem:[%s7985_s10 + $0xbec] sm:$0xf] }
 0x294   : > { %4339 = vmatmul.bf16.vlgmr.msra.gmra.mxu1 %v8179_v57  ;;  %4352 = vmatmul.bf16.vlgmr.msra.gmra.mxu2 %v8181_v58  ;;  %v7059_v57 = vld [vmem:[%s7985_s10 + $0x48c] sm:$0xf]  ;;  %v5725_v58 = vor.u32 %v7127_v36, %v5722_v37  ;;  %v4171_v51 = vpop.f32.mrf.mxu0  ;;  %v5658_v37 = vld [vmem:[%s7985_s10 + $0x638] sm:$0xf0] }
 0x295   : > { %4383 = vmatpush.bf16.msrb.mxu1 %v5501_v15  ;;  %4396 = vmatpush.bf16.msrb.mxu2 %v5629_v16  ;;  %v5453_v52 = vor.u32 %v7059_v57, %v5450_v46  ;;  %v7083_v16 = vld [vmem:[%s7985_s10 + $0x54c] sm:$0xf]  ;;  %v5405_v57 = vor.u32 %v7047_v61, %v5402_v28  ;;  %v5533_v46 = vor.u32 %v7079_v33, %v5530_v35  ;;  %v6266_v4 = vld [vmem:[%s7985_s10 + $0xaf8] sm:$0xf0] }
 0x296   : > { %4409 = vmatpush.bf16.msrb.mxu3 %v5757_v20  ;;  %4422 = vmatpush.bf16.msra.mxu0 %v5885_v19  ;;  %v7111_v36 = vld [vmem:[%s7985_s10 + $0x62c] sm:$0xf]  ;;  %v6394_v34 = vld [vmem:[%s7985_s10 + $0xbf8] sm:$0xf0] }
 0x297   : > { %4365 = vmatmul.bf16.vlgmr.msra.gmra.mxu3 %v8183_v59  ;;  %4378 = vmatmul.bf16.vlgmr.msrb.gmra.mxu0 %v8187_v62  ;;  %v5706_v59 = vld [vmem:[%s7985_s10 + $0x698] sm:$0xf0]  ;;  %v4145_v15 = vpop.f32.mrf.mxu2  ;;  %v5661_v48 = vor.u32 %v7111_v36, %v5658_v37  ;;  %v7287_v28 = vld [vmem:[%s7985_s10 + $0xbac] sm:$0xf] }
 0x298   : > { %v5834_v62 = vld [vmem:[%s7985_s10 + $0x798] sm:$0xf0]  ;;  %v5709_v56 = vor.u32 %v7123_v7, %v5706_v59  ;;  %v4146_v20 = vadd.f32 %v4145_v15, %v4133_v42  ;;  %v5789_v7 = vor.u32 %v7143_v5, %v5786_v40  ;;  %v7219_v37 = vld [vmem:[%s7985_s10 + $0x98c] sm:$0xf] }
 0x299   : > { %4384 = vmatpush.bf16.msrb.mxu1 %v5485_v26  ;;  %4397 = vmatpush.bf16.msrb.mxu2 %v5613_v27  ;;  %v5837_v60 = vor.u32 %v7155_v39, %v5834_v62  ;;  %v4134_v24 = vpop.f32.mrf.mxu1  ;;  %v5421_v26 = vor.u32 %v7051_v38, %v5418_v11  ;;  %v5549_v27 = vor.u32 %v7083_v16, %v5546_v17  ;;  %v7107_v39 = vld [vmem:[%s7985_s10 + $0x60c] sm:$0xf]  ;;  %v5642_v62 = vld [vmem:[%s7985_s10 + $0x618] sm:$0xf0] }
 0x29a   : > { %4410 = vmatpush.bf16.msrb.mxu3 %v5741_v30  ;;  %4423 = vmatpush.bf16.msra.mxu0 %v5869_v31  ;;  %v4158_v19 = vpop.f32.mrf.mxu3  ;;  %v5677_v30 = vor.u32 %v7115_v18, %v5674_v21  ;;  %v5805_v31 = vor.u32 %v7147_v22, %v5802_v23  ;;  %v5645_v8 = vor.u32 %v7107_v39, %v5642_v62  ;;  %v5994_v38 = vld [vmem:[%s7985_s10 + $0x8d8] sm:$0xf0]  ;;  %v7259_v16 = vld [vmem:[%s7985_s10 + $0xacc] sm:$0xf] }
 0x29b   : > { %v4159_v41 = vadd.f32 %v4158_v19, %v4146_v20  ;;  %v6122_v15 = vld [vmem:[%s7985_s10 + $0x9d8] sm:$0xf0]  ;;  %v7291_v18 = vld [vmem:[%s7985_s10 + $0xbcc] sm:$0xf] }
 0x29c   : > { %v4173_v25 = vpop.f32.mrf.mxu0  ;;  %v6250_v17 = vld [vmem:[%s7985_s10 + $0xad8] sm:$0xf0]  ;;  %v7191_v22 = vld [vmem:[%s7985_s10 + $0x8ac] sm:$0xf] }
 0x29d   : > { %4385 = vmatpush.bf16.msrb.mxu1 %v5469_v44  ;;  %4398 = vmatpush.bf16.msrb.mxu2 %v5597_v45  ;;  %v8998_v44 = vadd.f32 %v4171_v51, %v4159_v41  ;;  %v7043_v45 = vld [vmem:[%s7985_s10 + $0x40c] sm:$0xf]  ;;  %v5770_v51 = vld [vmem:[%s7985_s10 + $0x718] sm:$0xf0]  ;;  %v6253_v24 = vor.u32 %v7259_v16, %v6250_v17 }
 0x29e   : > { %4411 = vmatpush.bf16.msrb.mxu3 %v5725_v58  ;;  %4424 = vmatpush.bf16.msra.mxu0 %v5853_v13  ;;  %v5386_v58 = vld [vmem:[%s7985_s10 + $0x418] sm:$0xf0]  ;;  %v7075_v13 = vld [vmem:[%s7985_s10 + $0x50c] sm:$0xf]  ;;  %v5773_v54 = vor.u32 %v7139_v49, %v5770_v51 }
 0x29f   : > { %v4147_v59 = vpop.f32.mrf.mxu2  ;;  %v5517_v3 = vor.u32 %v7075_v13, %v5514_v47  ;;  %v6378_v20 = vld [vmem:[%s7985_s10 + $0xbd8] sm:$0xf0]  ;;  %v7223_v25 = vld [vmem:[%s7985_s10 + $0x9ac] sm:$0xf] }
 0x2a0   : > { %v5978_v23 = vld [vmem:[%s7985_s10 + $0x8b8] sm:$0xf0]  ;;  %v6381_v41 = vor.u32 %v7291_v18, %v6378_v20  ;;  %v7251_v40 = vld [vmem:[%s7985_s10 + $0xa8c] sm:$0xf] }
 0x2a1   : > { %4386 = vmatpush.bf16.msrb.mxu1 %v5453_v52  ;;  %4399 = vmatpush.bf16.msrb.mxu2 %v5581_v53  ;;  %v7199_v52 = vld [vmem:[%s7985_s10 + $0x8ec] sm:$0xf]  ;;  %v6010_v53 = vld [vmem:[%s7985_s10 + $0x8f8] sm:$0xf0] }
 0x2a2   : > { %4412 = vmatpush.bf16.msrb.mxu3 %v5709_v56  ;;  %4425 = vmatpush.bf16.msra.mxu0 %v5837_v60  ;;  %v4160_v50 = vpop.f32.mrf.mxu3  ;;  %v7263_v56 = vld [vmem:[%s7985_s10 + $0xaec] sm:$0xf]  ;;  %v5389_v60 = vor.u32 %v7043_v45, %v5386_v58  ;;  %v6013_v42 = vor.u32 %v7199_v52, %v6010_v53  ;;  %v6234_v61 = vld [vmem:[%s7985_s10 + $0xab8] sm:$0xf0] }
 0x2a3   : > { %v6269_v11 = vor.u32 %v7263_v56, %v6266_v4  ;;  %v5962_v35 = vld [vmem:[%s7985_s10 + $0x898] sm:$0xf0]  ;;  %v7183_v47 = vld [vmem:[%s7985_s10 + $0x86c] sm:$0xf] }
 0x2a4   : > { %v6090_v5 = vld [vmem:[%s7985_s10 + $0x998] sm:$0xf0]  ;;  %v7215_v39 = vld [vmem:[%s7985_s10 + $0x96c] sm:$0xf] }
 0x2a5   : > { %4387 = vmatpush.bf16.msrb.mxu1 %v5437_v9  ;;  %4400 = vmatpush.bf16.msrb.mxu2 %v5565_v10  ;;  %v6141_v9 = vor.u32 %v7231_v55, %v6138_v32  ;;  %v7195_v10 = vld [vmem:[%s7985_s10 + $0x8cc] sm:$0xf]  ;;  %v6346_v45 = vld [vmem:[%s7985_s10 + $0xb98] sm:$0xf0]  ;;  %v6093_v13 = vor.u32 %v7219_v37, %v6090_v5 }
 0x2a6   : > { %4413 = vmatpush.bf16.msrb.mxu3 %v5693_v12  ;;  %4426 = vmatpush.bf16.msra.mxu0 %v5821_v14  ;;  %v6397_v12 = vor.u32 %v7295_v6, %v6394_v34  ;;  %v7227_v14 = vld [vmem:[%s7985_s10 + $0x9cc] sm:$0xf]  ;;  %v5997_v19 = vor.u32 %v7195_v10, %v5994_v38  ;;  %v6074_v62 = vld [vmem:[%s7985_s10 + $0x978] sm:$0xf0] }
 0x2a7   : > { %v6125_v21 = vor.u32 %v7227_v14, %v6122_v15  ;;  %v7247_v49 = vld [vmem:[%s7985_s10 + $0xa6c] sm:$0xf]  ;;  %v6202_v50 = vld [vmem:[%s7985_s10 + $0xa78] sm:$0xf0]  ;;  %v6077_v32 = vor.u32 %v7215_v39, %v6074_v62 }
 0x2a8   : > { %v7279_v51 = vld [vmem:[%s7985_s10 + $0xb6c] sm:$0xf]  ;;  %v6330_v52 = vld [vmem:[%s7985_s10 + $0xb78] sm:$0xf0] }
 0x2a9   : > { %4388 = vmatpush.bf16.msrb.mxu1 %v5421_v26  ;;  %4401 = vmatpush.bf16.msrb.mxu2 %v5549_v27  ;;  %v6106_v26 = vld [vmem:[%s7985_s10 + $0x9b8] sm:$0xf0]  ;;  %v7255_v27 = vld [vmem:[%s7985_s10 + $0xaac] sm:$0xf]  ;;  %v6333_v4 = vor.u32 %v7279_v51, %v6330_v52 }
 0x2aa   : > { %4414 = vmatpush.bf16.msrb.mxu3 %v5677_v30  ;;  %4427 = vmatpush.bf16.msra.mxu0 %v5805_v31  ;;  %v6362_v30 = vld [vmem:[%s7985_s10 + $0xbb8] sm:$0xf0]  ;;  %v5981_v31 = vor.u32 %v7191_v22, %v5978_v23  ;;  %v6109_v33 = vor.u32 %v7223_v25, %v6106_v26  ;;  %v7179_v56 = vld [vmem:[%s7985_s10 + $0x84c] sm:$0xf] }
 0x2ab   : > { %v6365_v36 = vor.u32 %v7287_v28, %v6362_v30  ;;  %v7211_v34 = vld [vmem:[%s7985_s10 + $0x94c] sm:$0xf]  ;;  %v6314_v38 = vld [vmem:[%s7985_s10 + $0xb58] sm:$0xf0] }
 0x2ac   : > { %v7275_v10 = vld [vmem:[%s7985_s10 + $0xb4c] sm:$0xf]  ;;  %v5914_v18 = vld [vmem:[%s7985_s10 + $0x838] sm:$0xf0] }
 0x2ad   : > { %4389 = vmatpush.bf16.msrb.mxu1 %v5405_v57  ;;  %4402 = vmatpush.bf16.msrb.mxu2 %v5533_v46  ;;  %v7175_v17 = vld [vmem:[%s7985_s10 + $0x82c] sm:$0xf]  ;;  %v6042_v22 = vld [vmem:[%s7985_s10 + $0x938] sm:$0xf0] }
 0x2ae   : > { %4415 = vmatpush.bf16.msrb.mxu3 %v5661_v48  ;;  %4428 = vmatpush.bf16.msra.mxu0 %v5789_v7  ;;  %v5946_v48 = vld [vmem:[%s7985_s10 + $0x878] sm:$0xf0]  ;;  %v7239_v23 = vld [vmem:[%s7985_s10 + $0xa2c] sm:$0xf] }
 0x2af   : > { %v5949_v55 = vor.u32 %v7183_v47, %v5946_v48  ;;  %v6298_v25 = vld [vmem:[%s7985_s10 + $0xb38] sm:$0xf0]  ;;  %v7267_v5 = vld [vmem:[%s7985_s10 + $0xb0c] sm:$0xf] }
 0x2b0   : > { %v5898_v30 = vld [vmem:[%s7985_s10 + $0x818] sm:$0xf0]  ;;  %v7323_v51 = vld [vmem:[%s7985_s10 + $0xccc] sm:$0xf] }
 0x2b1   : > { %4390 = vmatpush.bf16.msrb.mxu1 %v5389_v60  ;;  %4403 = vmatpush.bf16.msrb.mxu2 %v5517_v3  ;;  %v4184_v57 = vpop.f32.mrf.mxu1  ;;  %v5930_v60 = vld [vmem:[%s7985_s10 + $0x858] sm:$0xf0]  ;;  %v6205_v3 = vor.u32 %v7247_v49, %v6202_v50 }
 0x2b2   : > { %4416 = vmatpush.bf16.msrb.mxu3 %v5645_v8  ;;  %4429 = vmatpush.bf16.msra.mxu0 %v5773_v54  ;;  %v4185_v53 = vadd.f32 %v4184_v57, %v8998_v44  ;;  %v6058_v8 = vld [vmem:[%s7985_s10 + $0x958] sm:$0xf0]  ;;  %v7243_v54 = vld [vmem:[%s7985_s10 + $0xa4c] sm:$0xf]  ;;  %v5933_v15 = vor.u32 %v7179_v56, %v5930_v60 }
 0x2b3   : > { %v6061_v16 = vor.u32 %v7211_v34, %v6058_v8  ;;  %v6154_v37 = vld [vmem:[%s7985_s10 + $0xa18] sm:$0xf0]  ;;  %v7359_v57 = vld [vmem:[%s7985_s10 + $0xdec] sm:$0xf] }
 0x2b4   : > { %4391 = vmatmul.bf16.vlgmr.msrb.gmra.mxu1 %v8189_v63  ;;  %4404 = vmatmul.bf16.vlgmr.msrb.gmra.mxu2 %v8191_v0  ;;  %v7187_v63 = vld [vmem:[%s7985_s10 + $0x88c] sm:$0xf]  ;;  %v6237_v0 = vor.u32 %v7255_v27, %v6234_v61  ;;  %v4223_v46 = vpop.f32.mrf.mxu0  ;;  %v5917_v61 = vor.u32 %v7175_v17, %v5914_v18  ;;  %v6778_v48 = vld [vmem:[%s7985_s10 + $0xef8] sm:$0xf0]  ;;  %v7547_v18 = vld [vmem:[#allocation1 + $0x12] sm:$0xff] }
 0x2b5   : > { %4435 = vmatpush.bf16.msra.mxu1 %v6013_v42  ;;  %4448 = vmatpush.bf16.msra.mxu2 %v6141_v9  ;;  %v5965_v58 = vor.u32 %v7187_v63, %v5962_v35  ;;  %v6186_v9 = vld [vmem:[%s7985_s10 + $0xa58] sm:$0xf0]  ;;  %v7171_v27 = vld [vmem:[%s7985_s10 + $0x80c] sm:$0xf] }
 0x2b6   : > { %4461 = vmatpush.bf16.msra.mxu3 %v6269_v11  ;;  %4474 = vmatpush.bf16.msrb.mxu0 %v6397_v12  ;;  %v6189_v20 = vor.u32 %v7243_v54, %v6186_v9  ;;  %v6506_v52 = vld [vmem:[%s7985_s10 + $0xcd8] sm:$0xf0]  ;;  %v7387_v60 = vld [vmem:[%s7985_s10 + $0xecc] sm:$0xf] }
 0x2b7   : > { %4417 = vmatmul.bf16.vlgmr.msrb.gmra.mxu3 %v8195_v1  ;;  %4430 = vmatmul.bf16.vlgmr.msra.gmra.mxu0 %v8197_v2  ;;  %v6218_v1 = vld [vmem:[%s7985_s10 + $0xa98] sm:$0xf0]  ;;  %v7283_v2 = vld [vmem:[%s7985_s10 + $0xb8c] sm:$0xf]  ;;  %v4197_v6 = vpop.f32.mrf.mxu2  ;;  %v6509_v34 = vor.u32 %v7323_v51, %v6506_v52 }
 0x2b8   : > { %v6221_v7 = vor.u32 %v7251_v40, %v6218_v1  ;;  %v6349_v59 = vor.u32 %v7283_v2, %v6346_v45  ;;  %v4198_v44 = vadd.f32 %v4197_v6, %v4185_v53  ;;  %v6282_v1 = vld [vmem:[%s7985_s10 + $0xb18] sm:$0xf0]  ;;  %v7327_v2 = vld [vmem:[%s7985_s10 + $0xcec] sm:$0xf] }
 0x2b9   : > { %4436 = vmatpush.bf16.msra.mxu1 %v5997_v19  ;;  %4449 = vmatpush.bf16.msra.mxu2 %v6125_v21  ;;  %v4186_v11 = vpop.f32.mrf.mxu1  ;;  %v6317_v19 = vor.u32 %v7275_v10, %v6314_v38  ;;  %v7207_v21 = vld [vmem:[%s7985_s10 + $0x92c] sm:$0xf]  ;;  %v6522_v45 = vld [vmem:[%s7985_s10 + $0xcf8] sm:$0xf0]  ;;  %v6285_v62 = vor.u32 %v7267_v5, %v6282_v1 }
 0x2ba   : > { %4462 = vmatpush.bf16.msra.mxu3 %v6253_v24  ;;  %4475 = vmatpush.bf16.msrb.mxu0 %v6381_v41  ;;  %v4210_v42 = vpop.f32.mrf.mxu3  ;;  %v6170_v24 = vld [vmem:[%s7985_s10 + $0xa38] sm:$0xf0]  ;;  %v7271_v41 = vld [vmem:[%s7985_s10 + $0xb2c] sm:$0xf]  ;;  %v6045_v28 = vor.u32 %v7207_v21, %v6042_v22  ;;  %v6525_v49 = vor.u32 %v7327_v2, %v6522_v45 }
 0x2bb   : > { %v4211_v12 = vadd.f32 %v4210_v42, %v4198_v44  ;;  %v6173_v63 = vor.u32 %v7239_v23, %v6170_v24  ;;  %v6301_v35 = vor.u32 %v7271_v41, %v6298_v25  ;;  %v6634_v56 = vld [vmem:[%s7985_s10 + $0xdd8] sm:$0xf0]  ;;  %v7319_v54 = vld [vmem:[%s7985_s10 + $0xcac] sm:$0xf] }
 0x2bc   : > { %v4225_v14 = vpop.f32.mrf.mxu0  ;;  %v6890_v6 = vld [vmem:[%s7985_s10 + $0xfd8] sm:$0xf0]  ;;  %v7351_v10 = vld [vmem:[%s7985_s10 + $0xdac] sm:$0xf] }
 0x2bd   : > { %4437 = vmatpush.bf16.msra.mxu1 %v5981_v31  ;;  %4450 = vmatpush.bf16.msra.mxu2 %v6109_v33  ;;  %v9069_v26 = vadd.f32 %v4223_v46, %v4211_v12  ;;  %v7203_v31 = vld [vmem:[%s7985_s10 + $0x90c] sm:$0xf]  ;;  %v6026_v33 = vld [vmem:[%s7985_s10 + $0x918] sm:$0xf0]  ;;  %v7545_v12 = vld [vmem:[#allocation1] sm:$0xff] }
 0x2be   : > { %4463 = vmatpush.bf16.msra.mxu3 %v6237_v0  ;;  %4476 = vmatpush.bf16.msrb.mxu0 %v6365_v36  ;;  %v7235_v36 = vld [vmem:[%s7985_s10 + $0xa0c] sm:$0xf]  ;;  %v6650_v46 = vld [vmem:[%s7985_s10 + $0xdf8] sm:$0xf0]  ;;  %v6029_v47 = vor.u32 %v7203_v31, %v6026_v33 }
 0x2bf   : > { %v4199_v0 = vpop.f32.mrf.mxu2  ;;  %v6157_v39 = vor.u32 %v7235_v36, %v6154_v37  ;;  %v6653_v50 = vor.u32 %v7359_v57, %v6650_v46  ;;  %v6490_v44 = vld [vmem:[%s7985_s10 + $0xcb8] sm:$0xf0]  ;;  %v7383_v11 = vld [vmem:[%s7985_s10 + $0xeac] sm:$0xf] }
 0x2c0   : > { %v6618_v38 = vld [vmem:[%s7985_s10 + $0xdb8] sm:$0xf0]  ;;  %v7546_v14 = vld [vmem:[#allocation1 + $0x9] sm:$0xff] }
 0x2c1   : > { %4438 = vmatpush.bf16.msra.mxu1 %v5965_v58  ;;  %4451 = vmatpush.bf16.msra.mxu2 %v6093_v13  ;;  %v7391_v58 = vld [vmem:[%s7985_s10 + $0xeec] sm:$0xf]  ;;  %v5901_v13 = vor.u32 %v7171_v27, %v5898_v30  ;;  %v6874_v17 = vld [vmem:[%s7985_s10 + $0xfb8] sm:$0xf0]  ;;  %v6621_v21 = vor.u32 %v7351_v10, %v6618_v38 }
 0x2c2   : > { %4464 = vmatpush.bf16.msra.mxu3 %v6221_v7  ;;  %4477 = vmatpush.bf16.msrb.mxu0 %v6349_v59  ;;  %v4212_v40 = vpop.f32.mrf.mxu3  ;;  %v7423_v7 = vld [vmem:[%s7985_s10 + $0xfec] sm:$0xf]  ;;  %v6906_v59 = vld [vmem:[%s7985_s10 + $0xff8] sm:$0xf0]  ;;  %v6781_v53 = vor.u32 %v7391_v58, %v6778_v48 }
 0x2c3   : > { %v7315_v22 = vld [vmem:[%s7985_s10 + $0xc8c] sm:$0xf]  ;;  %v6474_v23 = vld [vmem:[%s7985_s10 + $0xc98] sm:$0xf0] }
 0x2c4   : > { %v7347_v25 = vld [vmem:[%s7985_s10 + $0xd8c] sm:$0xf]  ;;  %v6602_v27 = vld [vmem:[%s7985_s10 + $0xd98] sm:$0xf0] }
 0x2c5   : > { %4439 = vmatpush.bf16.msra.mxu1 %v5949_v55  ;;  %4452 = vmatpush.bf16.msra.mxu2 %v6077_v32  ;;  %v6909_v55 = vor.u32 %v7423_v7, %v6906_v59  ;;  %v7355_v32 = vld [vmem:[%s7985_s10 + $0xdcc] sm:$0xf]  ;;  %v6858_v31 = vld [vmem:[%s7985_s10 + $0xf98] sm:$0xf0]  ;;  %v6605_v0 = vor.u32 %v7347_v25, %v6602_v27 }
 0x2c6   : > { %4465 = vmatpush.bf16.msra.mxu3 %v6205_v3  ;;  %4478 = vmatpush.bf16.msrb.mxu0 %v6333_v4  ;;  %v6762_v3 = vld [vmem:[%s7985_s10 + $0xed8] sm:$0xf0]  ;;  %v7419_v4 = vld [vmem:[%s7985_s10 + $0xfcc] sm:$0xf]  ;;  %v6637_v8 = vor.u32 %v7355_v32, %v6634_v56 }
 0x2c7   : > { %v6765_v42 = vor.u32 %v7387_v60, %v6762_v3  ;;  %v6893_v9 = vor.u32 %v7419_v4, %v6890_v6  ;;  %v7411_v30 = vld [vmem:[%s7985_s10 + $0xf8c] sm:$0xf]  ;;  %v6458_v37 = vld [vmem:[%s7985_s10 + $0xc78] sm:$0xf0] }
 0x2c8   : > { %v7311_v36 = vld [vmem:[%s7985_s10 + $0xc6c] sm:$0xf]  ;;  %v6861_v40 = vor.u32 %v7411_v30, %v6858_v31  ;;  %v6586_v2 = vld [vmem:[%s7985_s10 + $0xd78] sm:$0xf0]  ;;  %v4559_v31 = vld [vmem:[%s7993_s12 + $0x78] sm:$0xff] }
 0x2c9   : > { %4440 = vmatpush.bf16.msra.mxu1 %v5933_v15  ;;  %4453 = vmatpush.bf16.msra.mxu2 %v6061_v16  ;;  %v6746_v15 = vld [vmem:[%s7985_s10 + $0xeb8] sm:$0xf0]  ;;  %v7415_v16 = vld [vmem:[%s7985_s10 + $0xfac] sm:$0xf] }
 0x2ca   : > { %4466 = vmatpush.bf16.msra.mxu3 %v6189_v20  ;;  %4479 = vmatpush.bf16.msrb.mxu0 %v6317_v19  ;;  %v7548_v20 = vld [vmem:[#allocation1 + $0x1b] sm:$0xff]  ;;  %v6493_v19 = vor.u32 %v7319_v54, %v6490_v44  ;;  %v6749_v24 = vor.u32 %v7383_v11, %v6746_v15  ;;  %v6877_v41 = vor.u32 %v7415_v16, %v6874_v17  ;;  %v7343_v1 = vld [vmem:[%s7985_s10 + $0xd6c] sm:$0xf] }
 0x2cb   : > { %v7375_v45 = vld [vmem:[%s7985_s10 + $0xe6c] sm:$0xf]  ;;  %v6714_v57 = vld [vmem:[%s7985_s10 + $0xe78] sm:$0xf0] }
 0x2cc   : > { %v7407_v46 = vld [vmem:[%s7985_s10 + $0xf6c] sm:$0xf]  ;;  %v6842_v58 = vld [vmem:[%s7985_s10 + $0xf78] sm:$0xf0]  ;;  %v6717_v59 = vor.u32 %v7375_v45, %v6714_v57  ;;  %v4557_v45 = vld [vmem:[%s7993_s12 + $0x68] sm:$0xff] }
 0x2cd   : > { %4441 = vmatpush.bf16.msra.mxu1 %v5917_v61  ;;  %4454 = vmatpush.bf16.msra.mxu2 %v6045_v28  ;;  %v7379_v61 = vld [vmem:[%s7985_s10 + $0xe8c] sm:$0xf]  ;;  %v6730_v28 = vld [vmem:[%s7985_s10 + $0xe98] sm:$0xf0]  ;;  %v7552_v57 = vld [vmem:[#allocation1 + $0x3f] sm:$0xff] }
 0x2ce   : > { %4467 = vmatpush.bf16.msra.mxu3 %v6173_v63  ;;  %4480 = vmatpush.bf16.msrb.mxu0 %v6301_v35  ;;  %v6477_v35 = vor.u32 %v7315_v22, %v6474_v23  ;;  %v6733_v5 = vor.u32 %v7379_v61, %v6730_v28  ;;  %v7307_v48 = vld [vmem:[%s7985_s10 + $0xc4c] sm:$0xf]  ;;  %v6442_v7 = vld [vmem:[%s7985_s10 + $0xc58] sm:$0xf0] }
 0x2cf   : > { %v7371_v51 = vld [vmem:[%s7985_s10 + $0xe4c] sm:$0xf]  ;;  %v6826_v32 = vld [vmem:[%s7985_s10 + $0xf58] sm:$0xf0]  ;;  %v6445_v3 = vor.u32 %v7307_v48, %v6442_v7 }
 0x2d0   : > { %v7303_v6 = vld [vmem:[%s7985_s10 + $0xc2c] sm:$0xf]  ;;  %v6682_v10 = vld [vmem:[%s7985_s10 + $0xe38] sm:$0xf0] }
 0x2d1   : > { %4442 = vmatpush.bf16.msra.mxu1 %v5901_v13  ;;  %4455 = vmatpush.bf16.msra.mxu2 %v6029_v47  ;;  %v9111_v33 = vpop.f32.mrf.mxu1  ;;  %v6461_v13 = vor.u32 %v7311_v36, %v6458_v37  ;;  %v6589_v47 = vor.u32 %v7343_v1, %v6586_v2  ;;  %v7335_v44 = vld [vmem:[%s7985_s10 + $0xd2c] sm:$0xf]  ;;  %v6810_v11 = vld [vmem:[%s7985_s10 + $0xf38] sm:$0xf0] }
 0x2d2   : > { %4468 = vmatpush.bf16.msra.mxu3 %v6157_v39  ;;  %4481 = vmatpush.bf16.msrb.mxu0 %v6285_v62  ;;  %v6845_v39 = vor.u32 %v7407_v46, %v6842_v58  ;;  %v7399_v38 = vld [vmem:[%s7985_s10 + $0xf2c] sm:$0xf]  ;;  %v6410_v16 = vld [vmem:[%s7985_s10 + $0xc18] sm:$0xf0]  ;;  %v4573_v46 = vld [vmem:[%s7993_s12 + $0xe8] sm:$0xff]  ;;  %v4237_v7 = vadd.f32 %v9111_v33, %v9069_v26 }
 0x2d3   : > { %v7299_v15 = vld [vmem:[%s7985_s10 + $0xc0c] sm:$0xf]  ;;  %v6794_v25 = vld [vmem:[%s7985_s10 + $0xf18] sm:$0xf0]  ;;  %v4589_v58 = vld [vmem:[%s7993_s12 + $0x168] sm:$0xff] }
 0x2d4   : > { %4443 = vmatmul.bf16.vlgmr.msra.gmra.mxu1 %v7545_v12  ;;  %4456 = vmatmul.bf16.vlgmr.msra.gmra.mxu2 %v7546_v14  ;;  %v9113_v63 = vpop.f32.mrf.mxu0  ;;  %v7363_v22 = vld [vmem:[%s7985_s10 + $0xe0c] sm:$0xf]  ;;  %v6413_v27 = vor.u32 %v7299_v15, %v6410_v16  ;;  %v4558_v36 = vld [vmem:[%s7993_s12 + $0x70] sm:$0xff]  ;;  %v4549_v15 = vld [vmem:[%s7993_s12 + $0x28] sm:$0xff] }
 0x2d5   : > { %4487 = vmatpush.bf16.msrb.mxu1 %v6525_v49  ;;  %4500 = vmatpush.bf16.msrb.mxu2 %v6653_v50  ;;  %v7339_v49 = vld [vmem:[%s7985_s10 + $0xd4c] sm:$0xf]  ;;  %v6570_v50 = vld [vmem:[%s7985_s10 + $0xd58] sm:$0xf0]  ;;  %v4565_v16 = vld [vmem:[%s7993_s12 + $0xa8] sm:$0xff] }
 0x2d6   : > { %4513 = vmatpush.bf16.msrb.mxu3 %v6781_v53  ;;  %4526 = vmatpush.bf16.msra.mxu0 %v6909_v55  ;;  %v6698_v53 = vld [vmem:[%s7985_s10 + $0xe58] sm:$0xf0]  ;;  %v7403_v55 = vld [vmem:[%s7985_s10 + $0xf4c] sm:$0xf]  ;;  %v6573_v4 = vor.u32 %v7339_v49, %v6570_v50  ;;  %v4587_v49 = vld [vmem:[%s7993_s12 + $0x158] sm:$0xff] }
 0x2d7   : > { %4469 = vmatmul.bf16.vlgmr.msra.gmra.mxu3 %v7547_v18  ;;  %4482 = vmatmul.bf16.vlgmr.msrb.gmra.mxu0 %v7548_v20  ;;  %v9125_v62 = vpop.f32.mrf.mxu2  ;;  %v6829_v54 = vor.u32 %v7403_v55, %v6826_v32  ;;  %v6813_v18 = vor.u32 %v7399_v38, %v6810_v11  ;;  %v7549_v37 = vld [vmem:[#allocation1 + $0x24] sm:$0xff]  ;;  %v7550_v1 = vld [vmem:[#allocation1 + $0x2d] sm:$0xff]  ;;  %v7551_v2 = vld [vmem:[#allocation1 + $0x36] sm:$0xff] }
 0x2d8   : > { %v4588_v48 = vld [vmem:[%s7993_s12 + $0x160] sm:$0xff]  ;;  %v4570_v26 = vld [vmem:[%s7993_s12 + $0xd0] sm:$0xff]  ;;  %v4553_v32 = vld [vmem:[%s7993_s12 + $0x48] sm:$0xff] }
 0x2d9   : > { %4488 = vmatpush.bf16.msrb.mxu1 %v6509_v34  ;;  %4501 = vmatpush.bf16.msrb.mxu2 %v6637_v8  ;;  %v4238_v56 = vpop.f32.mrf.mxu1  ;;  %v6426_v34 = vld [vmem:[%s7985_s10 + $0xc38] sm:$0xf0]  ;;  %v6701_v8 = vor.u32 %v7371_v51, %v6698_v53  ;;  %v4250_v51 = vadd.f32 %v9125_v62, %v4237_v7  ;;  %v4585_v62 = vld [vmem:[%s7993_s12 + $0x148] sm:$0xff] }
 0x2da   : > { %4514 = vmatpush.bf16.msrb.mxu3 %v6765_v42  ;;  %4527 = vmatpush.bf16.msra.mxu0 %v6893_v9  ;;  %v9130_v52 = vpop.f32.mrf.mxu3  ;;  %v6554_v42 = vld [vmem:[%s7985_s10 + $0xd38] sm:$0xf0]  ;;  %v7367_v9 = vld [vmem:[%s7985_s10 + $0xe2c] sm:$0xf]  ;;  %v6429_v12 = vor.u32 %v7303_v6, %v6426_v34  ;;  %v4569_v56 = vld [vmem:[%s7993_s12 + $0xc8] sm:$0xff] }
 0x2db   : > { %v6557_v14 = vor.u32 %v7335_v44, %v6554_v42  ;;  %v6685_v17 = vor.u32 %v7367_v9, %v6682_v10  ;;  %v4554_v53 = vld [vmem:[%s7993_s12 + $0x50] sm:$0xff]  ;;  %v4584_v6 = vld [vmem:[%s7993_s12 + $0x140] sm:$0xff]  ;;  %v4567_v44 = vld [vmem:[%s7993_s12 + $0xb8] sm:$0xff] }
 0x2dc   : > { %v4277_v60 = vpop.f32.mrf.mxu0  ;;  %v4586_v33 = vld [vmem:[%s7993_s12 + $0x150] sm:$0xff]  ;;  %v4583_v42 = vld [vmem:[%s7993_s12 + $0x138] sm:$0xff] }
 0x2dd   : > { %4489 = vmatpush.bf16.msrb.mxu1 %v6493_v19  ;;  %4502 = vmatpush.bf16.msrb.mxu2 %v6621_v21  ;;  %v7331_v19 = vld [vmem:[%s7985_s10 + $0xd0c] sm:$0xf]  ;;  %v6538_v21 = vld [vmem:[%s7985_s10 + $0xd18] sm:$0xf0]  ;;  %v4263_v60 = vadd.f32 %v9130_v52, %v4250_v51 }
 0x2de   : > { %4515 = vmatpush.bf16.msrb.mxu3 %v6749_v24  ;;  %4528 = vmatpush.bf16.msra.mxu0 %v6877_v41  ;;  %v6666_v24 = vld [vmem:[%s7985_s10 + $0xe18] sm:$0xf0]  ;;  %v7395_v41 = vld [vmem:[%s7985_s10 + $0xf0c] sm:$0xf]  ;;  %v6541_v61 = vor.u32 %v7331_v19, %v6538_v21 }
 0x2df   : > { %v4251_v20 = vpop.f32.mrf.mxu2  ;;  %v6669_v28 = vor.u32 %v7363_v22, %v6666_v24  ;;  %v6797_v30 = vor.u32 %v7395_v41, %v6794_v25  ;;  %v4276_v9 = vadd.f32 %v9113_v63, %v4263_v60  ;;  %v4550_v10 = vld [vmem:[%s7993_s12 + $0x30] sm:$0xff]  ;;  %v4581_v63 = vld [vmem:[%s7993_s12 + $0x128] sm:$0xff]  ;;  %v4580_v19 = vld [vmem:[%s7993_s12 + $0x120] sm:$0xff] }
 0x2e0   : > { %v4566_v11 = vld [vmem:[%s7993_s12 + $0xb0] sm:$0xff]  ;;  %v4564_v20 = vld [vmem:[%s7993_s12 + $0xa0] sm:$0xff]  ;;  %v4547_v22 = vld [vmem:[%s7993_s12 + $0x18] sm:$0xff] }
 0x2e1   : > { %4490 = vmatpush.bf16.msrb.mxu1 %v6477_v35  ;;  %4503 = vmatpush.bf16.msrb.mxu2 %v6605_v0  ;;  %v4575_v35 = vld [vmem:[%s7993_s12 + $0xf8] sm:$0xff]  ;;  %v4605_v60 = vld [vmem:[%s7993_s12 + $0x1e8] sm:$0xff] }
 0x2e2   : > { %4516 = vmatpush.bf16.msrb.mxu3 %v6733_v5  ;;  %4529 = vmatpush.bf16.msra.mxu0 %v6861_v40  ;;  %v4264_v23 = vpop.f32.mrf.mxu3  ;;  %v4591_v0 = vld [vmem:[%s7993_s12 + $0x178] sm:$0xff]  ;;  %v4574_v5 = vld [vmem:[%s7993_s12 + $0xf0] sm:$0xff] }
 0x2e3   : > { %v4590_v40 = vld [vmem:[%s7993_s12 + $0x170] sm:$0xff]  ;;  %v4563_v24 = vld [vmem:[%s7993_s12 + $0x98] sm:$0xff] }
 0x2e4   : > { %v4579_v41 = vld [vmem:[%s7993_s12 + $0x118] sm:$0xff] }
 0x2e5   : > { %4491 = vmatpush.bf16.msrb.mxu1 %v6461_v13  ;;  %4504 = vmatpush.bf16.msrb.mxu2 %v6589_v47  ;;  %v4556_v13 = vld [vmem:[%s7993_s12 + $0x60] sm:$0xff] }
 0x2e6   : > { %4517 = vmatpush.bf16.msrb.mxu3 %v6717_v59  ;;  %4530 = vmatpush.bf16.msra.mxu0 %v6845_v39  ;;  %v4572_v47 = vld [vmem:[%s7993_s12 + $0xe0] sm:$0xff]  ;;  %v4555_v59 = vld [vmem:[%s7993_s12 + $0x58] sm:$0xff] }
 0x2e7   : > { %v4571_v39 = vld [vmem:[%s7993_s12 + $0xd8] sm:$0xff] }
 0x2e9   : > { %4492 = vmatpush.bf16.msrb.mxu1 %v6445_v3  ;;  %4505 = vmatpush.bf16.msrb.mxu2 %v6573_v4  ;;  %v4552_v3 = vld [vmem:[%s7993_s12 + $0x40] sm:$0xff] }
 0x2ea   : > { %4518 = vmatpush.bf16.msrb.mxu3 %v6701_v8  ;;  %4531 = vmatpush.bf16.msra.mxu0 %v6829_v54  ;;  %v4568_v4 = vld [vmem:[%s7993_s12 + $0xc0] sm:$0xff]  ;;  %v4551_v8 = vld [vmem:[%s7993_s12 + $0x38] sm:$0xff] }
 0x2ed   : > { %4493 = vmatpush.bf16.msrb.mxu1 %v6429_v12  ;;  %4506 = vmatpush.bf16.msrb.mxu2 %v6557_v14  ;;  %v4582_v12 = vld [vmem:[%s7993_s12 + $0x130] sm:$0xff] }
 0x2ee   : > { %4519 = vmatpush.bf16.msrb.mxu3 %v6685_v17  ;;  %4532 = vmatpush.bf16.msra.mxu0 %v6813_v18  ;;  %v4548_v18 = vld [vmem:[%s7993_s12 + $0x20] sm:$0xff] }
 0x2f1   : > { %4494 = vmatpush.bf16.msrb.mxu1 %v6413_v27  ;;  %4507 = vmatpush.bf16.msrb.mxu2 %v6541_v61  ;;  %v4288_v50 = vpop.f32.mrf.mxu1  ;;  %v4546_v27 = vld [vmem:[%s7993_s12 + $0x10] sm:$0xff] }
 0x2f2   : > { %4520 = vmatpush.bf16.msrb.mxu3 %v6669_v28  ;;  %4533 = vmatpush.bf16.msra.mxu0 %v6797_v30  ;;  %v4289_v14 = vadd.f32 %v4288_v50, %v4276_v9  ;;  %v4562_v61 = vld [vmem:[%s7993_s12 + $0x90] sm:$0xff]  ;;  %v4545_v30 = vld [vmem:[%s7993_s12 + $0x8] sm:$0xff] }
 0x2f3   : > { %v4578_v28 = vld [vmem:[%s7993_s12 + $0x110] sm:$0xff] }
 0x2f4   : > { %4495 = vmatmul.bf16.vlgmr.msrb.gmra.mxu1 %v7549_v37  ;;  %4508 = vmatmul.bf16.vlgmr.msrb.gmra.mxu2 %v7550_v1  ;;  %v9170_v55 = vpop.f32.mrf.mxu0  ;;  %v4560_v37 = vld [vmem:[%s7993_s12 + $0x80] sm:$0xff]  ;;  %v4540_v1 = vmax.f32 %v8924_v43, 0.0 }
 0x2f5   : > { %4608 = vmatpush.msra.mxu1 %v4559_v31  ;;  %4628 = vmatpush.msra.mxu2 %v4575_v35  ;;  %v4561_v31 = vld [vmem:[%s7993_s12 + $0x88] sm:$0xff] }
 0x2f6   : > { %4648 = vmatpush.msra.mxu3 %v4591_v0  ;;  %4534 = vmatmul.bf16.vlgmr.msra.gmra.mxu0 %v7552_v57  ;;  %v4577_v35 = vld [vmem:[%s7993_s12 + $0x108] sm:$0xff]  ;;  %v7553_v57 = vld [vmem:[%s7991_s8] sm:$0xf] }
 0x2f7   : > { %4521 = vmatmul.bf16.vlgmr.msrb.gmra.mxu3 %v7551_v2  ;;  %4609 = vmatpush.msra.mxu1 %v4558_v36  ;;  %v4301_v34 = vpop.f32.mrf.mxu2  ;;  %v4544_v36 = vld [vmem:[%s7993_s12] sm:$0xff] }
 0x2f8   : > { %4629 = vmatpush.msra.mxu2 %v4574_v5  ;;  %4649 = vmatpush.msra.mxu3 %v4590_v40  ;;  %v4302_v17 = vadd.f32 %v4301_v34, %v4289_v14  ;;  %v4576_v5 = vld [vmem:[%s7993_s12 + $0x100] sm:$0xff]  ;;  %v4539_v40 = vmax.f32 %v8636_v29, 0.0  ;;  %v4603_v34 = vld [vmem:[%s7993_s12 + $0x1d8] sm:$0xff] }
 0x2f9   : > { %4610 = vmatpush.msra.mxu1 %v4557_v45  ;;  %v4290_v52 = vpop.f32.mrf.mxu1 }
 0x2fa   : > { %4630 = vmatpush.msra.mxu2 %v4573_v46  ;;  %4650 = vmatpush.msra.mxu3 %v4589_v58  ;;  %v4314_v54 = vpop.f32.mrf.mxu3  ;;  %v1106_v46 = vperm.slane %v7553_v57, 3  ;;  %v4598_v52 = vld [vmem:[%s7993_s12 + $0x1b0] sm:$0xff] }
 0x2fb   : > { %4611 = vmatpush.msra.mxu1 %v4556_v13  ;;  %v4315_v25 = vadd.f32 %v4314_v54, %v4302_v17  ;;  %v4601_v54 = vld [vmem:[%s7993_s12 + $0x1c8] sm:$0xff]  ;;  %v4594_v17 = vld [vmem:[%s7993_s12 + $0x190] sm:$0xff] }
 0x2fc   : > { %4631 = vmatpush.msra.mxu2 %v4572_v47  ;;  %4651 = vmatpush.msra.mxu3 %v4588_v48  ;;  %v4329_v38 = vpop.f32.mrf.mxu0 }
 0x2fd   : > { %4612 = vmatpush.msra.mxu1 %v4555_v59  ;;  %v4328_v0 = vadd.f32 %v9170_v55, %v4315_v25  ;;  %v4597_v38 = vld [vmem:[%s7993_s12 + $0x1a8] sm:$0xff] }
 0x2fe   : > { %4632 = vmatpush.msra.mxu2 %v4571_v39  ;;  %4652 = vmatpush.msra.mxu3 %v4587_v49 }
 0x2ff   : > { %4613 = vmatpush.msra.mxu1 %v4554_v53  ;;  %v4303_v21 = vpop.f32.mrf.mxu2  ;;  %v4541_v2 = vmax.f32 %v4328_v0, 0.0 }
 0x300   : > { %4633 = vmatpush.msra.mxu2 %v4570_v26  ;;  %4653 = vmatpush.msra.mxu3 %v4586_v33  ;;  %v4607_v33 = vld [vmem:[%s7993_s12 + $0x1f8] sm:$0xff] }
 0x301   : > { %4614 = vmatpush.msra.mxu1 %v4553_v32  ;;  %4668 = vmatpush.msrb.mxu0 %v4607_v33 }
 0x302   : > { %4634 = vmatpush.msra.mxu2 %v4569_v56  ;;  %4654 = vmatpush.msra.mxu3 %v4585_v62  ;;  %v4316_v23 = vpop.f32.mrf.mxu3  ;;  %v4606_v62 = vld [vmem:[%s7993_s12 + $0x1f0] sm:$0xff] }
 0x303   : > { %4615 = vmatpush.msra.mxu1 %v4552_v3  ;;  %4669 = vmatpush.msrb.mxu0 %v4606_v62 }
 0x304   : > { %4635 = vmatpush.msra.mxu2 %v4568_v4  ;;  %4655 = vmatpush.msra.mxu3 %v4584_v6  ;;  %v4604_v6 = vld [vmem:[%s7993_s12 + $0x1e0] sm:$0xff] }
 0x305   : > { %4616 = vmatpush.msra.mxu1 %v4551_v8  ;;  %4670 = vmatpush.msrb.mxu0 %v4605_v60  ;;  %v4602_v8 = vld [vmem:[%s7993_s12 + $0x1d0] sm:$0xff] }
 0x306   : > { %4636 = vmatpush.msra.mxu2 %v4567_v44  ;;  %4656 = vmatpush.msra.mxu3 %v4583_v42  ;;  %v4600_v44 = vld [vmem:[%s7993_s12 + $0x1c0] sm:$0xff]  ;;  %v4599_v42 = vld [vmem:[%s7993_s12 + $0x1b8] sm:$0xff] }
 0x307   : > { %4617 = vmatpush.msra.mxu1 %v4550_v10  ;;  %4671 = vmatpush.msrb.mxu0 %v4604_v6 }
 0x308   : > { %4637 = vmatpush.msra.mxu2 %v4566_v11  ;;  %4657 = vmatpush.msra.mxu3 %v4582_v12  ;;  %v4596_v12 = vld [vmem:[%s7993_s12 + $0x1a0] sm:$0xff] }
 0x309   : > { %4618 = vmatpush.msra.mxu1 %v4549_v15  ;;  %4672 = vmatpush.msrb.mxu0 %v4603_v34 }
 0x30a   : > { %4638 = vmatpush.msra.mxu2 %v4565_v16  ;;  %4658 = vmatpush.msra.mxu3 %v4581_v63  ;;  %v4595_v16 = vld [vmem:[%s7993_s12 + $0x198] sm:$0xff] }
 0x30b   : > { %4619 = vmatpush.msra.mxu1 %v4548_v18  ;;  %4673 = vmatpush.msrb.mxu0 %v4602_v8 }
 0x30c   : > { %4639 = vmatpush.msra.mxu2 %v4564_v20  ;;  %4659 = vmatpush.msra.mxu3 %v4580_v19  ;;  %v4593_v20 = vld [vmem:[%s7993_s12 + $0x188] sm:$0xff]  ;;  %v4592_v19 = vld [vmem:[%s7993_s12 + $0x180] sm:$0xff] }
 0x30d   : > { %4620 = vmatpush.msra.mxu1 %v4547_v22  ;;  %4674 = vmatpush.msrb.mxu0 %v4601_v54 }
 0x30e   : > { %4640 = vmatpush.msra.mxu2 %v4563_v24  ;;  %4660 = vmatpush.msra.mxu3 %v4579_v41 }
 0x30f   : > { %4621 = vmatpush.msra.mxu1 %v4546_v27  ;;  %4675 = vmatpush.msrb.mxu0 %v4600_v44 }
 0x310   : > { %4641 = vmatpush.msra.mxu2 %v4562_v61  ;;  %4661 = vmatpush.msra.mxu3 %v4578_v28 }
 0x311   : > { %4622 = vmatpush.msra.mxu1 %v4545_v30  ;;  %v4340_v45 = vpop.f32.mrf.mxu1  ;;  %4676 = vmatpush.msrb.mxu0 %v4599_v42 }
 0x312   : > { %4642 = vmatpush.msra.mxu2 %v4561_v31  ;;  %4662 = vmatpush.msra.mxu3 %v4577_v35  ;;  %v4341_v13 = vadd.f32 %v4340_v45, %v1106_v46 }
 0x313   : > { %4623 = vmatpush.msra.mxu1 %v4544_v36  ;;  %4677 = vmatpush.msrb.mxu0 %v4598_v52 }
 0x314   : > { %4643 = vmatpush.msra.mxu2 %v4560_v37  ;;  %4663 = vmatpush.msra.mxu3 %v4576_v5  ;;  %v4379_v58 = vpop.f32.mrf.mxu0 }
 0x315   : > { %4624 = vmatmul.f32.vlgmr.msra.gmra.mxu1 %v4539_v40  ;;  %4644 = vmatmul.f32.vlgmr.msra.gmra.mxu2 %v4540_v1  ;;  %v577_v40 = vld [vmem:[#allocation10] sm:$0x1]  ;;  %v581_v1 = vstv %s580_s14 }
 0x316   : > { %4664 = vmatmul.f32.vlgmr.msra.gmra.mxu3 %v4541_v2  ;;  %4678 = vmatpush.msrb.mxu0 %v4597_v38  ;;  %v582_v57 = vmul.f32 %v581_v1, %v577_v40 }
 0x317   : > { %v4353_v47 = vpop.f32.mrf.mxu2 }
 0x318   : > { %v4354_v48 = vadd.f32 %v4353_v47, %v4341_v13  ;;  %4679 = vmatpush.msrb.mxu0 %v4596_v12 }
 0x319   : > { %v4342_v29 = vpop.f32.mrf.mxu1 }
 0x31a   : > { %v4366_v7 = vpop.f32.mrf.mxu3  ;;  %4680 = vmatpush.msrb.mxu0 %v4595_v16 }
 0x31b   : > { %v4367_v43 = vadd.f32 %v4366_v7, %v4354_v48 }
 0x31c   : > { %v4381_v59 = vpop.f32.mrf.mxu0  ;;  %4681 = vmatpush.msrb.mxu0 %v4594_v17 }
 0x31d   : > { %v4380_v39 = vadd.f32 %v4379_v58, %v4367_v43  ;;  %v584_v58 = vperm.slane %v582_v57, 0 }
 0x31e   : > { %4682 = vmatpush.msrb.mxu0 %v4593_v20 }
 0x31f   : > { %v4355_v49 = vpop.f32.mrf.mxu2  ;;  %586 = vst [vmem:[%s441_s22] sm:$0x3] %v584_v58 }
 0x320   : > { %4683 = vmatpush.msrb.mxu0 %v4592_v19 }
 0x322   : > { %v4368_v50 = vpop.f32.mrf.mxu3 }
 0x326   : > { %v4543_v49 = vld [vmem:[%s441_s22] sm:$0x3] }
 0x331   : > { %v4392_v51 = vpop.f32.mrf.mxu1 }
 0x332   : > { %v4393_v18 = vadd.f32 %v4392_v51, %v4380_v39 }
 0x334   : > { %v4431_v53 = vpop.f32.mrf.mxu0 }
 0x337   : > { %v4405_v55 = vpop.f32.mrf.mxu2 }
 0x338   : > { %v4406_v21 = vadd.f32 %v4405_v55, %v4393_v18 }
 0x339   : > { %v4394_v32 = vpop.f32.mrf.mxu1 }
 0x33a   : > { %v4418_v26 = vpop.f32.mrf.mxu3 }
 0x33b   : > { %v4419_v24 = vadd.f32 %v4418_v26, %v4406_v21 }
 0x33c   : > { %v4433_v56 = vpop.f32.mrf.mxu0 }
 0x33d   : > { %v4432_v41 = vadd.f32 %v4431_v53, %v4419_v24 }
 0x33f   : > { %v4407_v3 = vpop.f32.mrf.mxu2 }
 0x342   : > { %v4420_v4 = vpop.f32.mrf.mxu3 }
 0x351   : > { %v4444_v9 = vpop.f32.mrf.mxu1 }
 0x352   : > { %v4445_v25 = vadd.f32 %v4444_v9, %v4432_v41 }
 0x354   : > { %v4483_v10 = vpop.f32.mrf.mxu0 }
 0x357   : > { %v4457_v11 = vpop.f32.mrf.mxu2 }
 0x358   : > { %v4458_v27 = vadd.f32 %v4457_v11, %v4445_v25 }
 0x359   : > { %v4446_v15 = vpop.f32.mrf.mxu1 }
 0x35a   : > { %v4470_v14 = vpop.f32.mrf.mxu3 }
 0x35b   : > { %v4471_v61 = vadd.f32 %v4470_v14, %v4458_v27 }
 0x35c   : > { %v4485_v63 = vpop.f32.mrf.mxu0 }
 0x35d   : > { %v4484_v31 = vadd.f32 %v4483_v10, %v4471_v61 }
 0x35f   : > { %v4459_v22 = vpop.f32.mrf.mxu2 }
 0x362   : > { %v4472_v23 = vpop.f32.mrf.mxu3 }
 0x371   : > { %v4496_v28 = vpop.f32.mrf.mxu1 }
 0x372   : > { %v4497_v35 = vadd.f32 %v4496_v28, %v4484_v31 }
 0x373   : > { %v4535_v30 = vpop.f32.mrf.mxu0 }
 0x377   : > { %v4509_v0 = vpop.f32.mrf.mxu2 }
 0x378   : > { %v4510_v37 = vadd.f32 %v4509_v0, %v4497_v35 }
 0x379   : > { %v4498_v5 = vpop.f32.mrf.mxu1 }
 0x37a   : > { %v4522_v36 = vpop.f32.mrf.mxu3 }
 0x37b   : > { %v4523_v2 = vadd.f32 %v4522_v36, %v4510_v37  ;;  %v4537_v45 = vpop.f32.mrf.mxu0 }
 0x37d   : > { %v4536_v46 = vadd.f32 %v4535_v30, %v4523_v2 }
 0x37f   : > { %v4542_v13 = vmax.f32 %v4536_v46, 0.0  ;;  %v4511_v47 = vpop.f32.mrf.mxu2 }
 0x381   : > { %4684 = vmatmul.f32.vlgmr.msrb.gmra.mxu0 %v4542_v13 }
 0x382   : > { %v4524_v48 = vpop.f32.mrf.mxu3 }
 0x392   : > { %v4625_v29 = vpop.f32.mrf.mxu1 }
 0x398   : > { %v4645_v7 = vpop.f32.mrf.mxu2 }
 0x399   : > { %v4646_v43 = vadd.f32 %v4645_v7, %v4625_v29  ;;  %v4665_v59 = vpop.f32.mrf.mxu3 }
 0x39b   : > { %v4666_v39 = vadd.f32 %v4665_v59, %v4646_v43 }
 0x3fe   : > { %v4685_v50 = vpop.f32.mrf.mxu0 }
 0x3ff   : > { %v4686_v51 = vadd.f32 %v4685_v50, %v4666_v39 }
 0x401   : > { %v4688_v53 = vadd.f32 %v4686_v51, %v4543_v49 }
 0x403   : > { %4689 = vst [vmem:[%s441_s22] sm:$0x3] %v4688_v53 }
 0x404 PF: > { %s19_s29 = sadd.s32 1, %s7796_s29   ;;  %s9277_s10 = sld [smem:[#allocation16_spill]] }
 0x405   : > { %p16_p3 = scmp.ge.s32.totalorder %s19_s29, 4   ;;  %s9278_s24 = smov %s7780_s25 }
 0x406   : > { %s9279_s25 = smov %s7784_s26  ;;  %s9280_s26 = smov %s7939_s17 }
 0x407   : > { %s9281_s27 = smov %s7792_s28  ;;  %18 = sbr.rel (!%p16_p3) target bundleno = 8 (0x8), region = 137 }
 0x40a   : > { %s9282_s28 = smov %s9277_s10 }
 0x40c   :  { %4709 = vsyncpa [#allocation4], 1 }
 0x40d   :  { %4711 = vsyncpa [#allocation4 + $0x1], 1 }
 0x40e   :  { %4712 = vsyncpa [#allocation6], 1 }

</bundles_post_ra>
